<compile_context>
chip_gen: v6e
topology: v6e:2x2x1
jax: 0.10.0
libtpu: 0.0.40
codegen_flags: <defaults>
</compile_context>

<pallas_src>
import jax
import jax.numpy as jnp
from jax.experimental import pallas as pl
from jax.experimental.pallas import tpu as pltpu

LATENT = 100
LATENT_PAD = 128            # 100 padded up to one full lane tile
H1, H2, H3 = 256, 512, 1024
OUT = 784
OUT_PAD = 896               # 7 * 128 -> lane-dense output stores


def _round_up(n, m):
    return (n + m - 1) // m * m


def generator_kernel(x_ref,
                     w1_ref, b1_ref,
                     w2_ref, b2_ref,
                     w3_ref, b3_ref,
                     w4_ref, b4_ref,
                     o_ref):
    cdt = w1_ref.dtype  # bf16 compute dtype for the MXU dots

    # Layer 1: Linear(100->256) + ReLU   (bf16 MXU dot, f32 accumulate)
    h = jnp.dot(x_ref[...], w1_ref[...], preferred_element_type=jnp.float32)
    h = jnp.maximum(h + b1_ref[...], 0.0)

    # Layer 2: Linear(256->512) + ReLU
    h = jnp.dot(h.astype(cdt), w2_ref[...], preferred_element_type=jnp.float32)
    h = jnp.maximum(h + b2_ref[...], 0.0)

    # Layer 3: Linear(512->1024) + ReLU
    h = jnp.dot(h.astype(cdt), w3_ref[...], preferred_element_type=jnp.float32)
    h = jnp.maximum(h + b3_ref[...], 0.0)

    # Layer 4: Linear(1024->784, padded to 896) + Tanh (tanh -> EUP slot)
    h = jnp.dot(h.astype(cdt), w4_ref[...], preferred_element_type=jnp.float32)
    o_ref[...] = jnp.tanh(h + b4_ref[...]).astype(o_ref.dtype)


def generator_forward(x, params, *, block_b=256):
    """x: (B, 100) float32. params: pre-padded bf16 weights / f32 biases.
    Returns (B, 784) float32."""
    B = x.shape[0]
    # Batch tile: multiple of 8 (sublane), capped at block_b so the VMEM
    # working set (weights + x/out double buffers + f32 intermediates) stays
    # comfortably inside the default scoped-VMEM limit on every chip.
    tb = _round_up(min(block_b, max(B, 1)), 8)
    b_pad = _round_up(B, tb)

    # Pad latent 100 -> 128, batch -> multiple of tb; cast input to bf16.
    x_p = jnp.zeros((b_pad, LATENT_PAD), jnp.bfloat16)
    x_p = x_p.at[:B, :LATENT].set(x.astype(jnp.bfloat16))

    grid = (b_pad // tb,)

    def const_map(i):       # weights / biases: fetched once, stay VMEM-resident
        return (0, 0)

    def batch_map(i):       # x / out: streamed over the batch grid
        return (i, 0)

    w_specs = []
    for w_key, b_key in (("w1", "b1"), ("w2", "b2"), ("w3", "b3"), ("w4", "b4")):
        w_specs.append(pl.BlockSpec(params[w_key].shape, const_map))
        w_specs.append(pl.BlockSpec(params[b_key].shape, const_map))

    flops = 2 * b_pad * (LATENT_PAD * H1 + H1 * H2 + H2 * H3 + H3 * OUT_PAD)
    weight_bytes = sum(int(params[k].size) * params[k].dtype.itemsize
                       for k in params)
    bytes_accessed = weight_bytes + b_pad * (LATENT_PAD * 2 + OUT_PAD * 4)
    cost = pl.CostEstimate(flops=flops,
                           transcendentals=b_pad * OUT_PAD,
                           bytes_accessed=bytes_accessed)

    out = pl.pallas_call(
        generator_kernel,
        out_shape=jax.ShapeDtypeStruct((b_pad, OUT_PAD), jnp.float32),
        grid_spec=pltpu.PrefetchScalarGridSpec(
            num_scalar_prefetch=0,
            grid=grid,
            in_specs=[pl.BlockSpec((tb, LATENT_PAD), batch_map)] + w_specs,
            out_specs=pl.BlockSpec((tb, OUT_PAD), batch_map),
        ),
        compiler_params=pltpu.CompilerParams(
            dimension_semantics=("parallel",)),
        cost_estimate=cost,
    )(x_p,
      params["w1"], params["b1"],
      params["w2"], params["b2"],
      params["w3"], params["b3"],
      params["w4"], params["b4"])
    return out[:B, :OUT]


def init_params(key):
    """PyTorch nn.Linear-style init (uniform +/- 1/sqrt(fan_in)), stored
    pre-padded to lane-aligned shapes, weights in bf16, biases in f32."""
    dims = [(LATENT, H1), (H1, H2), (H2, H3), (H3, OUT)]
    pad_in = [LATENT_PAD, H1, H2, H3]
    pad_out = [H1, H2, H3, OUT_PAD]
    params = {}
    for i, (fan_in, fan_out) in enumerate(dims, start=1):
        key, kw, kb = jax.random.split(key, 3)
        bound = 1.0 / jnp.sqrt(jnp.float32(fan_in))
        w = jax.random.uniform(kw, (fan_in, fan_out), jnp.float32,
                               minval=-bound, maxval=bound)
        b = jax.random.uniform(kb, (1, fan_out), jnp.float32,
                               minval=-bound, maxval=bound)
        w_p = jnp.zeros((pad_in[i - 1], pad_out[i - 1]), jnp.float32)
        w_p = w_p.at[:fan_in, :fan_out].set(w)
        b_p = jnp.zeros((1, pad_out[i - 1]), jnp.float32)
        b_p = b_p.at[:, :fan_out].set(b)
        params[f"w{i}"] = w_p.astype(jnp.bfloat16)  # bf16 weights: halve HBM bytes
        params[f"b{i}"] = b_p                       # biases stay f32
    return params


def reference_forward(x, params):
    """Pure-JAX reference with the same bf16-weight / f32-accumulate math."""
    xp = jnp.zeros((x.shape[0], LATENT_PAD), jnp.bfloat16)
    xp = xp.at[:, :LATENT].set(x.astype(jnp.bfloat16))
    h = jnp.dot(xp, params["w1"], preferred_element_type=jnp.float32) + params["b1"]
    h = jnp.maximum(h, 0.0)
    h = jnp.dot(h.astype(jnp.bfloat16), params["w2"],
                preferred_element_type=jnp.float32) + params["b2"]
    h = jnp.maximum(h, 0.0)
    h = jnp.dot(h.astype(jnp.bfloat16), params["w3"],
                preferred_element_type=jnp.float32) + params["b3"]
    h = jnp.maximum(h, 0.0)
    h = jnp.dot(h.astype(jnp.bfloat16), params["w4"],
                preferred_element_type=jnp.float32) + params["b4"]
    return jnp.tanh(h)[:, :OUT]


if __name__ == "__main__":
    key = jax.random.PRNGKey(0)
    key, kx = jax.random.split(key)
    batch = 16
    x = jax.random.normal(kx, (batch, LATENT), jnp.float32)  # latent noise
    params = init_params(key)

    # block_b=8 -> grid=(2,): exercises the batch grid, VMEM-resident weights
    # and the "parallel" batch axis even at this small demo size.
    out = generator_forward(x, params, block_b=8)
    out = jax.block_until_ready(out)

    ref = reference_forward(x, params)
    assert out.shape == (batch, OUT)
    assert jnp.allclose(out, ref, atol=2e-2, rtol=2e-2), "mismatch vs reference"
    print("KERNEL_OK")
</pallas_src>

<mosaic_0001>
module attributes {stable_mosaic.version = 11 : i64} {
  func.func @generator_kernel(%arg0: i32, %arg1: memref<8x128xbf16, #tpu.memory_space<vmem>>, %arg2: memref<128x256xbf16, #tpu.memory_space<vmem>>, %arg3: memref<1x256xf32, #tpu.memory_space<vmem>>, %arg4: memref<256x512xbf16, #tpu.memory_space<vmem>>, %arg5: memref<1x512xf32, #tpu.memory_space<vmem>>, %arg6: memref<512x1024xbf16, #tpu.memory_space<vmem>>, %arg7: memref<1x1024xf32, #tpu.memory_space<vmem>>, %arg8: memref<1024x896xbf16, #tpu.memory_space<vmem>>, %arg9: memref<1x896xf32, #tpu.memory_space<vmem>>, %arg10: memref<8x896xf32, #tpu.memory_space<vmem>>) attributes {dimension_semantics = [#tpu.dimension_semantics<parallel>], iteration_bounds = array<i64: 2>, scalar_prefetch = 0 : i64, scratch_operands = 0 : i64, tpu.core_type = #tpu.core_type<tc>, window_params = [{transform_indices = @transform_0, window_bounds = array<i64: 8, 128>}, {pipeline_mode = #tpu.pipeline_mode<synchronous>, transform_indices = @transform_1, window_bounds = array<i64: 128, 256>}, {pipeline_mode = #tpu.pipeline_mode<synchronous>, transform_indices = @transform_2, window_bounds = array<i64: 1, 256>}, {pipeline_mode = #tpu.pipeline_mode<synchronous>, transform_indices = @transform_3, window_bounds = array<i64: 256, 512>}, {pipeline_mode = #tpu.pipeline_mode<synchronous>, transform_indices = @transform_4, window_bounds = array<i64: 1, 512>}, {pipeline_mode = #tpu.pipeline_mode<synchronous>, transform_indices = @transform_5, window_bounds = array<i64: 512, 1024>}, {pipeline_mode = #tpu.pipeline_mode<synchronous>, transform_indices = @transform_6, window_bounds = array<i64: 1, 1024>}, {pipeline_mode = #tpu.pipeline_mode<synchronous>, transform_indices = @transform_7, window_bounds = array<i64: 1024, 896>}, {pipeline_mode = #tpu.pipeline_mode<synchronous>, transform_indices = @transform_8, window_bounds = array<i64: 1, 896>}, {transform_indices = @transform_9, window_bounds = array<i64: 8, 896>}]} {
    %c0 = arith.constant 0 : index
    %c0_0 = arith.constant 0 : index
    %0 = vector.load %arg1[%c0, %c0_0] : memref<8x128xbf16, #tpu.memory_space<vmem>>, vector<8x128xbf16>
    %c0_1 = arith.constant 0 : index
    %c0_2 = arith.constant 0 : index
    %1 = vector.load %arg2[%c0_1, %c0_2] : memref<128x256xbf16, #tpu.memory_space<vmem>>, vector<128x256xbf16>
    %cst = arith.constant dense<0.000000e+00> : vector<8x256xf32>
    %2 = tpu.matmul %0, %1, %cst {dimension_numbers = #tpu.dot_dimension_numbers<[1], [0], [0], [1], [0, 0, 1, 1], [], []>} : vector<8x128xbf16>, vector<128x256xbf16>, vector<8x256xf32> -> vector<8x256xf32>
    %c0_3 = arith.constant 0 : index
    %c0_4 = arith.constant 0 : index
    %3 = vector.load %arg3[%c0_3, %c0_4] : memref<1x256xf32, #tpu.memory_space<vmem>>, vector<1x256xf32>
    %4 = vector.broadcast %3 : vector<1x256xf32> to vector<8x256xf32>
    %5 = arith.addf %2, %4 : vector<8x256xf32>
    %cst_5 = arith.constant 0.000000e+00 : f32
    %6 = vector.broadcast %cst_5 : f32 to vector<8x256xf32>
    %7 = arith.maximumf %5, %6 : vector<8x256xf32>
    %8 = arith.truncf %7 : vector<8x256xf32> to vector<8x256xbf16>
    %c0_6 = arith.constant 0 : index
    %c0_7 = arith.constant 0 : index
    %9 = vector.load %arg4[%c0_6, %c0_7] : memref<256x512xbf16, #tpu.memory_space<vmem>>, vector<256x512xbf16>
    %cst_8 = arith.constant dense<0.000000e+00> : vector<8x512xf32>
    %10 = tpu.matmul %8, %9, %cst_8 {dimension_numbers = #tpu.dot_dimension_numbers<[1], [0], [0], [1], [0, 0, 1, 1], [], []>} : vector<8x256xbf16>, vector<256x512xbf16>, vector<8x512xf32> -> vector<8x512xf32>
    %c0_9 = arith.constant 0 : index
    %c0_10 = arith.constant 0 : index
    %11 = vector.load %arg5[%c0_9, %c0_10] : memref<1x512xf32, #tpu.memory_space<vmem>>, vector<1x512xf32>
    %12 = vector.broadcast %11 : vector<1x512xf32> to vector<8x512xf32>
    %13 = arith.addf %10, %12 : vector<8x512xf32>
    %cst_11 = arith.constant 0.000000e+00 : f32
    %14 = vector.broadcast %cst_11 : f32 to vector<8x512xf32>
    %15 = arith.maximumf %13, %14 : vector<8x512xf32>
    %16 = arith.truncf %15 : vector<8x512xf32> to vector<8x512xbf16>
    %c0_12 = arith.constant 0 : index
    %c0_13 = arith.constant 0 : index
    %17 = vector.load %arg6[%c0_12, %c0_13] : memref<512x1024xbf16, #tpu.memory_space<vmem>>, vector<512x1024xbf16>
    %cst_14 = arith.constant dense<0.000000e+00> : vector<8x1024xf32>
    %18 = tpu.matmul %16, %17, %cst_14 {dimension_numbers = #tpu.dot_dimension_numbers<[1], [0], [0], [1], [0, 0, 1, 1], [], []>} : vector<8x512xbf16>, vector<512x1024xbf16>, vector<8x1024xf32> -> vector<8x1024xf32>
    %c0_15 = arith.constant 0 : index
    %c0_16 = arith.constant 0 : index
    %19 = vector.load %arg7[%c0_15, %c0_16] : memref<1x1024xf32, #tpu.memory_space<vmem>>, vector<1x1024xf32>
    %20 = vector.broadcast %19 : vector<1x1024xf32> to vector<8x1024xf32>
    %21 = arith.addf %18, %20 : vector<8x1024xf32>
    %cst_17 = arith.constant 0.000000e+00 : f32
    %22 = vector.broadcast %cst_17 : f32 to vector<8x1024xf32>
    %23 = arith.maximumf %21, %22 : vector<8x1024xf32>
    %24 = arith.truncf %23 : vector<8x1024xf32> to vector<8x1024xbf16>
    %c0_18 = arith.constant 0 : index
    %c0_19 = arith.constant 0 : index
    %25 = vector.load %arg8[%c0_18, %c0_19] : memref<1024x896xbf16, #tpu.memory_space<vmem>>, vector<1024x896xbf16>
    %cst_20 = arith.constant dense<0.000000e+00> : vector<8x896xf32>
    %26 = tpu.matmul %24, %25, %cst_20 {dimension_numbers = #tpu.dot_dimension_numbers<[1], [0], [0], [1], [0, 0, 1, 1], [], []>} : vector<8x1024xbf16>, vector<1024x896xbf16>, vector<8x896xf32> -> vector<8x896xf32>
    %c0_21 = arith.constant 0 : index
    %c0_22 = arith.constant 0 : index
    %27 = vector.load %arg9[%c0_21, %c0_22] : memref<1x896xf32, #tpu.memory_space<vmem>>, vector<1x896xf32>
    %28 = vector.broadcast %27 : vector<1x896xf32> to vector<8x896xf32>
    %29 = arith.addf %26, %28 : vector<8x896xf32>
    %30 = math.tanh %29 : vector<8x896xf32>
    %c0_23 = arith.constant 0 : index
    %c0_24 = arith.constant 0 : index
    %31 = vector.load %arg10[%c0_23, %c0_24] : memref<8x896xf32, #tpu.memory_space<vmem>>, vector<8x896xf32>
    tpu.vector_store %arg10[%c0_23, %c0_24], %30 {strides = array<i32>} : memref<8x896xf32, #tpu.memory_space<vmem>>, vector<8x896xf32>,
    return
  }
  func.func @transform_0(%arg0: i32) -> (i32, i32) {
    %c0_i32 = arith.constant 0 : i32
    %c0_i32_0 = arith.constant 0 : i32
    return %arg0, %c0_i32 : i32, i32
  }
  func.func @transform_1(%arg0: i32) -> (i32, i32) {
    %c0_i32 = arith.constant 0 : i32
    %c0_i32_0 = arith.constant 0 : i32
    %c0_i32_1 = arith.constant 0 : i32
    return %c0_i32, %c0_i32_0 : i32, i32
  }
  func.func @transform_2(%arg0: i32) -> (i32, i32) {
    %c0_i32 = arith.constant 0 : i32
    %c0_i32_0 = arith.constant 0 : i32
    %c0_i32_1 = arith.constant 0 : i32
    return %c0_i32, %c0_i32_0 : i32, i32
  }
  func.func @transform_3(%arg0: i32) -> (i32, i32) {
    %c0_i32 = arith.constant 0 : i32
    %c0_i32_0 = arith.constant 0 : i32
    %c0_i32_1 = arith.constant 0 : i32
    return %c0_i32, %c0_i32_0 : i32, i32
  }
  func.func @transform_4(%arg0: i32) -> (i32, i32) {
    %c0_i32 = arith.constant 0 : i32
    %c0_i32_0 = arith.constant 0 : i32
    %c0_i32_1 = arith.constant 0 : i32
    return %c0_i32, %c0_i32_0 : i32, i32
  }
  func.func @transform_5(%arg0: i32) -> (i32, i32) {
    %c0_i32 = arith.constant 0 : i32
    %c0_i32_0 = arith.constant 0 : i32
    %c0_i32_1 = arith.constant 0 : i32
    return %c0_i32, %c0_i32_0 : i32, i32
  }
  func.func @transform_6(%arg0: i32) -> (i32, i32) {
    %c0_i32 = arith.constant 0 : i32
    %c0_i32_0 = arith.constant 0 : i32
    %c0_i32_1 = arith.constant 0 : i32
    return %c0_i32, %c0_i32_0 : i32, i32
  }
  func.func @transform_7(%arg0: i32) -> (i32, i32) {
    %c0_i32 = arith.constant 0 : i32
    %c0_i32_0 = arith.constant 0 : i32
    %c0_i32_1 = arith.constant 0 : i32
    return %c0_i32, %c0_i32_0 : i32, i32
  }
  func.func @transform_8(%arg0: i32) -> (i32, i32) {
    %c0_i32 = arith.constant 0 : i32
    %c0_i32_0 = arith.constant 0 : i32
    %c0_i32_1 = arith.constant 0 : i32
    return %c0_i32, %c0_i32_0 : i32, i32
  }
  func.func @transform_9(%arg0: i32) -> (i32, i32) {
    %c0_i32 = arith.constant 0 : i32
    %c0_i32_0 = arith.constant 0 : i32
    return %arg0, %c0_i32 : i32, i32
  }
}

</mosaic_0001>

<bundles_post_ra>
// kernel: tpu_custom_call.1
= control target key start
LH: loop header
LB: loop body
LE: loop exit
PB: predicated region body
PF: predicated region fallthrough
CT: control target
= control target key end

     0   :  { %s9331_s0 = inlined_call_operand.hbm [shape: bf16[16,128], index: 0, kind: input, shape index: {}]   ;;  %s9332_s1 = inlined_call_operand.hbm [shape: bf16[128,256], index: 1, kind: input, shape index: {}]   ;;  %s9333_s2 = inlined_call_operand.hbm [shape: f32[1,256], index: 2, kind: input, shape index: {}]   ;;  %s9334_s3 = inlined_call_operand.hbm [shape: bf16[256,512], index: 3, kind: input, shape index: {}]   ;;  %s9335_s4 = inlined_call_operand.hbm [shape: f32[1,512], index: 4, kind: input, shape index: {}]   ;;  %s9336_s5 = inlined_call_operand.hbm [shape: bf16[512,1024], index: 5, kind: input, shape index: {}]   ;;  %s9337_s6 = inlined_call_operand.hbm [shape: f32[1,1024], index: 6, kind: input, shape index: {}]   ;;  %s9338_s7 = inlined_call_operand.hbm [shape: bf16[1024,896], index: 7, kind: input, shape index: {}]   ;;  %s9339_s8 = inlined_call_operand.hbm [shape: f32[1,896], index: 8, kind: input, shape index: {}]   ;;  %s9340_s9 = inlined_call_operand.hbm [shape: f32[16,896], index: 9, kind: output, shape index: {}]  }
   0x1   :  { %9345 = sst [smem:[#allocation24_spill]] %s9332_s1 }
   0x2   :  { %9346 = sst [smem:[#allocation25_spill]] %s9333_s2 }
   0x3   :  { %9347 = sst [smem:[#allocation26_spill]] %s9334_s3 }
   0x4   :  { %9348 = sst [smem:[#allocation27_spill]] %s9335_s4 }
   0x5   :  { %14 = vsyncpa [#allocation3], 0 }
   0x6   :  { %16 = vsyncpa [#allocation3 + $0x1], 0 }
   0x7   :  { %17 = vsyncpa [#allocation6], 0 }
   0x8   :  { %18 = vsyncpa [#allocation9], 0 }
   0x9   :  { %19 = vsyncpa [#allocation12], 0 }
   0xa   :  { %20 = vsyncpa [#allocation15], 0 }
   0xb   :  { %21 = vsyncpa [#allocation4], 0 }
   0xc   :  { %23 = vsyncpa [#allocation4 + $0x1], 0  ;;  %s8907_s30 = smov 0   ;;  %s8909_s10 = smov 0  }
   0xd   :  { %s8911_s11 = smov 0   ;;  %s8913_s12 = smov 0  }
   0xe LB: > { %s8838_s13 = smov [#allocation5]   ;;  %s8928_s15 = sadd.s32 4294967295, %s8836_s12   ;;  %s8836_s12 = sphi %s8913_s12, %s9378_s12   ;;  %s8832_s11 = sphi %s8911_s11, %s9377_s11   ;;  %s8828_s10 = sphi %s8909_s10, %s9376_s10   ;;  %s8824_s30 = sphi %s8907_s30, %s9375_s30  }
   0xf   : > { %s266_s14 = sshll.u32 %s8838_s13, 4  ;;  %p6710_p0 = scmp.ge.s32.totalorder %s8836_s12, 1  ;;  %s267_s14 = int_to_ptr.vmem [resolvable:$true] %s266_s14 }
  0x10   : > { %p9341_p1 = scmp.eq.s32.totalorder %s8928_s15, 0  ;;  %p254_p2 = scmp.lt.s32.totalorder %s8836_s12, 3 }
  0x11   : > { %s8839_s17 = smov [#allocation8]   ;;  %s8840_s20 = smov [#allocation11]  }
  0x12   : > { %p8933_p3 = pnand %p6710_p0, %p254_p2  ;;  %s290_s18 = sshll.u32 %s8839_s17, 4  ;;  %s8946_s18 = int_to_ptr.vmem [resolvable:$true] %s290_s18 }
  0x13   : > { %s8948_s21 = sshll.u32 %s8840_s20, 4  ;;  %s8531_s23 = scalar_lea.vmem %s267_s14, 2048  ;;  %s315_s21 = int_to_ptr.vmem [resolvable:$true] %s8948_s21 }
  0x14   : > { %s9349_s16 = scalar_select %p8933_p3, 1, 0 }
  0x15   : > { %p7645_p5 = pneg %p8933_p3  ;;  %p8532_p8 = scmp.ne.s32.totalorder %s267_s14, %s8531_s23 }
  0x16   : > { %p8539_p11 = scmp.lt.s32.totalorder %s267_s14, %s267_s14  ;;  %p8540_p12 = scmp.lt.s32.totalorder %s8531_s23, %s8531_s23 }
  0x17   : > { %p8942_p6 = pnand %p7645_p5, %p9341_p1 }
  0x18   : > { %p8541_p13 = por %p8540_p12, %p8539_p11 }
  0x19   : > { %p8952_p7 = pneg %p8942_p6 }
  0x1b   : > { %p8534_p9 = pnand %p8532_p8, %p8952_p7 }
  0x1d   : > { %p8535_p10 = pneg %p8534_p9 }
  0x1f   : > { %p8542_p0 = pnand %p8541_p13, %p8535_p10 }
  0x21   : > { %8545 = shalt.err (!%p8542_p0)
}
  0x22   : > { %s8841_s24 = smov 128   ;;  %s8842_s25 = smov 8  }
  0x23   : > { %s9352_s1 = sld [smem:[#allocation24_spill]]  ;;  %s8557_s28 = scalar_lea.vmem %s8946_s18, 8192 }
  0x24   : > { %p8558_p2 = scmp.ne.s32.totalorder %s8946_s18, %s8557_s28  ;;  %p8565_p9 = scmp.lt.s32.totalorder %s8946_s18, %s8946_s18 }
  0x25   : > { %p8566_p10 = scmp.lt.s32.totalorder %s8557_s28, %s8557_s28 }
  0x26   : > { %p8560_p5 = pnand %p8558_p2, %p8952_p7 }
  0x27   : > { %p8567_p11 = por %p8566_p10, %p8565_p9 }
  0x28   : > { %p8561_p8 = pneg %p8560_p5 }
  0x29   : > { %7648 = dma.hbm_to_vmem [thread:$0]  (!%p8942_p6), %s9352_s1, 2048, %s267_s14, [#allocation6], %s8841_s24, %s8841_s24, %s8842_s25  }
  0x2a   : > { %p8568_p12 = pnand %p8567_p11, %p8561_p8 }
  0x2c   : > { %8571 = shalt.err (!%p8568_p12)
}
  0x2d   : > { %s8843_s29 = smov 256   ;;  %s8844_s13 = smov 16  }
  0x2e   : > { %s9353_s3 = sld [smem:[#allocation26_spill]]  ;;  %s8583_s20 = scalar_lea.vmem %s315_s21, 32768 }
  0x2f   : > { %p8584_p13 = scmp.ne.s32.totalorder %s315_s21, %s8583_s20  ;;  %p8591_p5 = scmp.lt.s32.totalorder %s315_s21, %s315_s21 }
  0x30   : > { %p8592_p8 = scmp.lt.s32.totalorder %s8583_s20, %s8583_s20 }
  0x31   : > { %p8586_p0 = pnand %p8584_p13, %p8952_p7 }
  0x32   : > { %p8593_p9 = por %p8592_p8, %p8591_p5 }
  0x33   : > { %p8587_p2 = pneg %p8586_p0 }
  0x34   : > { %7654 = dma.hbm_to_vmem [thread:$0]  (!%p8942_p6), %s9353_s3, 8192, %s8946_s18, [#allocation9], %s8843_s29, %s8843_s29, %s8844_s13  }
  0x35   : > { %p8594_p10 = pnand %p8593_p9, %p8587_p2 }
  0x37   : > { %8597 = shalt.err (!%p8594_p10)
}
  0x38   : > { %s8845_s23 = smov 512   ;;  %s8846_s24 = smov 32  }
  0x39   : > { %7660 = dma.hbm_to_vmem [thread:$0]  (!%p8942_p6), %s9336_s5, 32768, %s315_s21, [#allocation12], %s8845_s23, %s8845_s23, %s8846_s24  }
  0x3a   : > { %s8847_s18 = smov [#allocation14]  }
  0x3b   : > { %s338_s27 = sshll.u32 %s8847_s18, 4  ;;  %s339_s27 = int_to_ptr.vmem [resolvable:$true] %s338_s27 }
  0x3c   : > { %s8609_s28 = scalar_lea.vmem %s339_s27, 57344  ;;  %p8617_p0 = scmp.lt.s32.totalorder %s339_s27, %s339_s27 }
  0x3d   : > { %p8610_p11 = scmp.ne.s32.totalorder %s339_s27, %s8609_s28  ;;  %p8618_p2 = scmp.lt.s32.totalorder %s8609_s28, %s8609_s28 }
  0x3f   : > { %p8612_p12 = pnand %p8610_p11, %p8952_p7  ;;  %p8619_p5 = por %p8618_p2, %p8617_p0 }
  0x41   : > { %p8613_p13 = pneg %p8612_p12 }
  0x43   : > { %p8620_p8 = pnand %p8619_p5, %p8613_p13 }
  0x45   : > { %8623 = shalt.err (!%p8620_p8)
}
  0x46   : > { %s8848_s29 = smov 448   ;;  %s8849_s13 = smov 28  }
  0x47   : > { %7666 = dma.hbm_to_vmem [thread:$0]  (!%p8942_p6), %s9338_s7, 57344, %s339_s27, [#allocation15], %s8848_s29, %s8848_s29, %s8849_s13  }
  0x48   : > { %s8850_s14 = smov [#allocation7]   ;;  %s8851_s23 = smov [#allocation10]  }
  0x49   : > { %s280_s20 = sshll.u32 %s8850_s14, 4  ;;  %s304_s24 = sshll.u32 %s8851_s23, 4  ;;  %s281_s20 = int_to_ptr.vmem [resolvable:$true] %s280_s20  ;;  %s305_s24 = int_to_ptr.vmem [resolvable:$true] %s304_s24 }
  0x4a   : > { %s8635_s25 = scalar_lea.vmem %s281_s20, 32  ;;  %p8643_p12 = scmp.lt.s32.totalorder %s281_s20, %s281_s20 }
  0x4b   : > { %p8636_p9 = scmp.ne.s32.totalorder %s281_s20, %s8635_s25  ;;  %p8644_p13 = scmp.lt.s32.totalorder %s8635_s25, %s8635_s25 }
  0x4d   : > { %p8638_p10 = pnand %p8636_p9, %p8952_p7  ;;  %p8645_p0 = por %p8644_p13, %p8643_p12 }
  0x4f   : > { %p8639_p11 = pneg %p8638_p10 }
  0x51   : > { %p8646_p2 = pnand %p8645_p0, %p8639_p11 }
  0x53   : > { %8649 = shalt.err (!%p8646_p2)
}
  0x54   : > { %s9354_s2 = sld [smem:[#allocation25_spill]]  ;;  %s8661_s27 = scalar_lea.vmem %s305_s24, 64 }
  0x55   : > { %p8662_p5 = scmp.ne.s32.totalorder %s305_s24, %s8661_s27  ;;  %p8669_p1 = scmp.lt.s32.totalorder %s305_s24, %s305_s24 }
  0x56   : > { %p8670_p9 = scmp.lt.s32.totalorder %s8661_s27, %s8661_s27 }
  0x57   : > { %p8664_p8 = pnand %p8662_p5, %p8952_p7 }
  0x58   : > { %p8671_p10 = por %p8670_p9, %p8669_p1 }
  0x59   : > { %p8665_p4 = pneg %p8664_p8 }
  0x5a   : > { %7651 = dma.hbm_to_vmem [thread:$0]  (!%p8942_p6), %s9354_s2, 32, %s281_s20, [#allocation6]  }
  0x5b   : > { %p8672_p3 = pnand %p8671_p10, %p8665_p4 }
  0x5d   : > { %8675 = shalt.err (!%p8672_p3)
}
  0x5e   : > { %s9355_s4 = sld [smem:[#allocation27_spill]]  ;;  %s8852_s13 = smov [#allocation13]  }
  0x5f   : > { %s328_s17 = sshll.u32 %s8852_s13, 4  ;;  %s8853_s21 = smov [#allocation16]   ;;  %s329_s17 = int_to_ptr.vmem [resolvable:$true] %s328_s17 }
  0x60   : > { %s352_s14 = sshll.u32 %s8853_s21, 4  ;;  %s8687_s20 = scalar_lea.vmem %s329_s17, 128  ;;  %s353_s14 = int_to_ptr.vmem [resolvable:$true] %s352_s14 }
  0x61   : > { %p8688_p11 = scmp.ne.s32.totalorder %s329_s17, %s8687_s20  ;;  %p8695_p4 = scmp.lt.s32.totalorder %s329_s17, %s329_s17 }
  0x62   : > { %p8696_p3 = scmp.lt.s32.totalorder %s8687_s20, %s8687_s20 }
  0x63   : > { %p8690_p12 = pnand %p8688_p11, %p8952_p7 }
  0x64   : > { %7657 = dma.hbm_to_vmem [thread:$0]  (!%p8942_p6), %s9355_s4, 64, %s305_s24, [#allocation9]  }
  0x65   : > { %p8691_p1 = pneg %p8690_p12  ;;  %p8697_p13 = por %p8696_p3, %p8695_p4 }
  0x67   : > { %p8698_p0 = pnand %p8697_p13, %p8691_p1 }
  0x69   : > { %8701 = shalt.err (!%p8698_p0)
}
  0x6a   : > { %7663 = dma.hbm_to_vmem [thread:$0]  (!%p8942_p6), %s9337_s6, 128, %s329_s17, [#allocation12]  }
  0x6b   : > { %s8713_s25 = scalar_lea.vmem %s353_s14, 112  ;;  %s8720_s26 = scalar_lea.vmem %s353_s14, 128 }
  0x6c   : > { %p8714_p2 = scmp.ne.s32.totalorder %s353_s14, %s8713_s25  ;;  %p8721_p9 = scmp.lt.s32.totalorder %s353_s14, %s353_s14 }
  0x6d   : > { %p8722_p10 = scmp.lt.s32.totalorder %s8720_s26, %s8713_s25 }
  0x6e   : > { %p8716_p5 = pnand %p8714_p2, %p8952_p7 }
  0x6f   : > { %p8723_p11 = por %p8722_p10, %p8721_p9 }
  0x70   : > { %p8717_p8 = pneg %p8716_p5 }
  0x72   : > { %p8724_p12 = pnand %p8723_p11, %p8717_p8 }
  0x74   : > { %8727 = shalt.err (!%p8724_p12)
}
  0x75   : > { %7669 = dma.hbm_to_vmem [thread:$0]  (!%p8942_p6), %s9339_s8, 112, %s353_s14, [#allocation15]  }
  0x76   : > { %s6709_s22 = sadd.s32 4294967294, %s8836_s12   ;;  %s9020_s19 = sadd.s32 1, %s8836_s12  }
  0x77   : > { %s33_s28 = ssub.s32 %s8836_s12, %s9020_s19  ;;  %s36_s29 = sadd.s32 1, %s8832_s11 }
  0x78   : > { %p34_p7 = scmp.eq.s32.totalorder %s33_s28, 0  ;;  %p43_p1 = scmp.ne.s32.totalorder %s8832_s11, %s8828_s10 }
  0x79   : > { %p44_p4 = scmp.eq.s32.totalorder %s8836_s12, 0  ;;  %p49_p3 = scmp.ne.s32.totalorder %s8828_s10, %s8824_s30 }
  0x7a   : > { %s9031_s13 = scalar_select %p34_p7, %s8832_s11, %s36_s29  }
  0x7b   : > { %p9033_p13 = por %p44_p4, %p43_p1  ;;  %p9357_p0 = scmp.eq.s32.totalorder %s8928_s15, 0 }
  0x7c   : > { %p241_p2 = scmp.eq.s32.totalorder %s8928_s15, 1  ;;  %p247_p5 = scmp.eq.s32.totalorder %s6709_s22, 1 }
  0x7d   : > { %p9039_p6 = por %p9357_p0, %p49_p3  ;;  %p7686_p8 = scmp.lt.s32.totalorder %s8836_s12, 2 }
  0x7e   : > { %s363_s14 = sand.u32 1, %s8832_s11   ;;  %p9046_p9 = por %p241_p2, %p43_p1 }
  0x7f   : > { %s9358_s21 = scalar_select %p9039_p6, 1, 0 }
  0x80   : > { %s9359_s20 = scalar_select %p9046_p9, 1, 0 }
  0x81   : > { %p9050_p10 = por %p247_p5, %p49_p3  ;;  %s6720_s24 = sshll.u32 %s363_s14, 2 }
  0x82   : > { %s6721_s25 = sshll.u32 %s8836_s12, 6  ;;  %s367_s22 = scalar_lea.vmem [#allocation2], %s6720_s24 }
  0x83   : > { %s9360_s23 = scalar_select %p9050_p10, 1, 0 }
  0x84   : > { %s9058_s27 = scalar_lea.hbm %s9331_s0, %s6721_s25  ;;  %s374_s28 = sshll.u32 %s367_s22, 4  ;;  %s375_s28 = int_to_ptr.vmem [resolvable:$true] %s374_s28 }
  0x85   : > { %p9062_p11 = pnand %p7686_p8, %p9033_p13  ;;  %s364_s1 = scalar_lea.sflag [#allocation3], %s363_s14 }
  0x86   : > { %s8728_s2 = scalar_lea.hbm %s9058_s27, 64  ;;  %s8733_s18 = scalar_lea.hbm %s9331_s0, 128 }
  0x87   : > { %p8729_p12 = scmp.ne.s32.totalorder %s9058_s27, %s8728_s2  ;;  %p8730_p7 = pneg %p9062_p11 }
  0x88   : > { %p8734_p3 = scmp.lt.s32.totalorder %s9058_s27, %s9331_s0  ;;  %p8735_p13 = scmp.lt.s32.totalorder %s8733_s18, %s8728_s2 }
  0x89   : > { %p8731_p1 = pnand %p8730_p7, %p8729_p12 }
  0x8a   : > { %p8736_p0 = por %p8735_p13, %p8734_p3 }
  0x8b   : > { %p8732_p4 = pneg %p8731_p1 }
  0x8d   : > { %p8737_p2 = pnand %p8736_p0, %p8732_p4 }
  0x8f   : > { %8740 = shalt.err (!%p8737_p2)
}
  0x90   : > { %s8741_s17 = scalar_lea.vmem %s375_s28, 64  ;;  %s8854_s14 = smov [#allocation2]  }
  0x91   : > { %p8742_p5 = scmp.ne.s32.totalorder %s375_s28, %s8741_s17  ;;  %s8746_s3 = sshll.u32 %s8854_s14, 4  ;;  %s8747_s3 = int_to_ptr.vmem [resolvable:$false] %s8746_s3 }
  0x92   : > { %s8748_s4 = scalar_lea.vmem %s8747_s3, 128  ;;  %p8749_p12 = scmp.lt.s32.totalorder %s375_s28, %s8747_s3 }
  0x93   : > { %p8744_p8 = pnand %p8742_p5, %p8730_p7  ;;  %p8750_p1 = scmp.lt.s32.totalorder %s8748_s4, %s8741_s17 }
  0x95   : > { %p8745_p10 = pneg %p8744_p8  ;;  %p8751_p9 = por %p8750_p1, %p8749_p12 }
  0x97   : > { %p8752_p6 = pnand %p8751_p9, %p8745_p10 }
  0x99   : > { %8755 = shalt.err (!%p8752_p6)
}
  0x9a   : > { %7673 = dma.hbm_to_vmem [thread:$0]  (!%p9062_p11), %s9058_s27, 64, %s375_s28, %s364_s1  }
  0x9b   : > { %p9362_p4 = scmp.ne.s32.totalorder %s9349_s16, 0 }
  0x9c   : > { %s9083_s2 = sand.u32 (!%p9362_p4), 1, %s8828_s10   ;;  %p9363_p7 = scmp.ne.s32.totalorder (!%p9362_p4), %s9358_s21, 0 }
  0x9d   : > { %383 = sbr.rel (%p9362_p4) target bundleno = 1554 (0x612), region = 56  ;;  %s6723_s25 = sshll.u32 (!%p9362_p4), %s9083_s2, 2 }
  0x9e   : > { %s386_s26 = scalar_lea.sflag (!%p9362_p4), [#allocation3], %s9083_s2  ;;  %s9087_s3 = scalar_lea.vmem (!%p9362_p4), [#allocation2], %s6723_s25 }
  0xa2   : > { %8799 = dma.done.wait (%p9363_p7), %s386_s26, 64  }
  0xa3   : > { %8801 = vsyncadd (%p9363_p7), %s386_s26, 4294967232  ;;  %p9364_p6 = scmp.eq.s32.totalorder %s8928_s15, 0 }
  0xa5   : > { %8803 = dma.done.wait (%p9364_p6), [#allocation6], 2080   ;;  %p9365_p9 = pmov %p9364_p6 }
  0xa6   : > { %p9366_p10 = pmov %p9364_p6 }
  0xa7   : > { %8805 = vsyncadd (%p9365_p9), [#allocation6], 4294965216 }
  0xa8   : > { %8807 = dma.done.wait (%p9366_p10), [#allocation9], 8256   ;;  %p9367_p11 = pmov %p9364_p6 }
  0xa9   : > { %p9368_p3 = pmov %p9364_p6 }
  0xaa   : > { %8809 = vsyncadd (%p9367_p11), [#allocation9], 4294959040 }
  0xab   : > { %8811 = dma.done.wait (%p9368_p3), [#allocation12], 32896   ;;  %p9369_p13 = pmov %p9368_p3 }
  0xac   : > { %p9370_p0 = pmov %p9368_p3 }
  0xad   : > { %8813 = vsyncadd (%p9369_p13), [#allocation12], 4294934400 }
  0xae   : > { %8815 = dma.done.wait (%p9370_p0), [#allocation15], 57456   ;;  %p9371_p2 = pmov %p9370_p0 }
  0xaf   : > { %v8855_v0 = vmov 0   ;;  %v7745_v1 = vld [vmem:[#allocation5 + $0x74] ss:$8 sps:$4 sm:$0xff]   ;;  %v7747_v2 = vld [vmem:[#allocation5 + $0x70] ss:$8 sps:$4 sm:$0xff]   ;;  %s7607_s1 = smul.u32 56, %s9083_s2 }
  0xb0   : > { %8817 = vsyncadd (%p9371_p2), [#allocation15], 4294909840  ;;  %598 = vmatprep.mubr.bf16.mxu0 %v8855_v0  ;;  %566 = vmatprep.subr.bf16.mxu0 %v7745_v1  ;;  %v7748_v3 = vld [vmem:[#allocation5 + $0x64] ss:$8 sps:$4 sm:$0xff]   ;;  %v7750_v4 = vld [vmem:[#allocation5 + $0x60] ss:$8 sps:$4 sm:$0xff]  }
  0xb1   : > { %567 = vmatpush1.bf16.msra.mxu0 %v7747_v2  ;;  %v7751_v5 = vld [vmem:[#allocation5 + $0x54] ss:$8 sps:$4 sm:$0xff]   ;;  %v7753_v6 = vld [vmem:[#allocation5 + $0x50] ss:$8 sps:$4 sm:$0xff]   ;;  %v7754_v7 = vld [vmem:[#allocation5 + $0x44] ss:$8 sps:$4 sm:$0xff]  }
  0xb2   : > { %568 = vmatprep.subr.bf16.mxu0 %v7748_v3  ;;  %v7756_v8 = vld [vmem:[#allocation5 + $0x40] ss:$8 sps:$4 sm:$0xff]   ;;  %v7757_v10 = vld [vmem:[#allocation5 + $0x34] ss:$8 sps:$4 sm:$0xff]   ;;  %v7759_v13 = vld [vmem:[#allocation5 + $0x30] ss:$8 sps:$4 sm:$0xff]  }
  0xb3   : > { %v7769_v9 = vld [vmem:[#allocation8 + $0xe4] ss:$16 sps:$4 sm:$0xff]   ;;  %v7774_v11 = vld [vmem:[#allocation8 + $0xe0] ss:$16 sps:$4 sm:$0xff]   ;;  %v7773_v26 = vld [vmem:[#allocation8 + $0xec] ss:$16 sps:$4 sm:$0xff]  }
  0xb4   : > { %1017 = vmatprep.subr.bf16.mxu1 %v7769_v9  ;;  %v7775_v12 = vld [vmem:[#allocation8 + $0xc4] ss:$16 sps:$4 sm:$0xff]   ;;  %v7780_v15 = vld [vmem:[#allocation8 + $0xc0] ss:$16 sps:$4 sm:$0xff]   ;;  %v7771_v30 = vld [vmem:[#allocation8 + $0xe8] ss:$16 sps:$4 sm:$0xff]  }
  0xb5   : > { %569 = vmatpush1.bf16.msra.mxu0 %v7750_v4  ;;  %v7760_v14 = vld [vmem:[#allocation5 + $0x24] ss:$8 sps:$4 sm:$0xff]   ;;  %1018 = vmatpush1.bf16.msra.mxu1 %v7774_v11  ;;  %v7762_v17 = vld [vmem:[#allocation5 + $0x20] ss:$8 sps:$4 sm:$0xff]   ;;  %v7763_v18 = vld [vmem:[#allocation5 + $0x14] ss:$8 sps:$4 sm:$0xff]  }
  0xb6   : > { %570 = vmatprep.subr.bf16.mxu0 %v7751_v5  ;;  %1019 = vmatprep.subr.bf16.mxu1 %v7775_v12  ;;  %v7781_v16 = vld [vmem:[#allocation8 + $0xa4] ss:$16 sps:$4 sm:$0xff]   ;;  %v7786_v19 = vld [vmem:[#allocation8 + $0xa0] ss:$16 sps:$4 sm:$0xff]   ;;  %v7779_v31 = vld [vmem:[#allocation8 + $0xcc] ss:$16 sps:$4 sm:$0xff]  }
  0xb7   : > { %v7787_v20 = vld [vmem:[#allocation8 + $0x84] ss:$16 sps:$4 sm:$0xff]   ;;  %v7792_v23 = vld [vmem:[#allocation8 + $0x80] ss:$16 sps:$4 sm:$0xff]   ;;  %v7777_v34 = vld [vmem:[#allocation8 + $0xc8] ss:$16 sps:$4 sm:$0xff]  }
  0xb8   : > { %v7765_v21 = vld [vmem:[#allocation5 + $0x10] ss:$8 sps:$4 sm:$0xff]   ;;  %v7766_v22 = vld [vmem:[#allocation5 + $0x4] ss:$8 sps:$4 sm:$0xff]   ;;  %v7768_v25 = vld [vmem:[#allocation5] ss:$8 sps:$4 sm:$0xff]  }
  0xb9   : > { %571 = vmatpush1.bf16.msra.mxu0 %v7753_v6  ;;  %1020 = vmatpush1.bf16.msra.mxu1 %v7780_v15  ;;  %v7793_v24 = vld [vmem:[#allocation8 + $0x64] ss:$16 sps:$4 sm:$0xff]   ;;  %v7798_v27 = vld [vmem:[#allocation8 + $0x60] ss:$16 sps:$4 sm:$0xff]   ;;  %v7785_v35 = vld [vmem:[#allocation8 + $0xac] ss:$16 sps:$4 sm:$0xff]  }
  0xba   : > { %572 = vmatprep.subr.bf16.mxu0 %v7754_v7  ;;  %1021 = vmatprep.subr.bf16.mxu1 %v7781_v16  ;;  %v7799_v28 = vld [vmem:[#allocation8 + $0x44] ss:$16 sps:$4 sm:$0xff]   ;;  %v7804_v32 = vld [vmem:[#allocation8 + $0x40] ss:$16 sps:$4 sm:$0xff]   ;;  %v7783_v38 = vld [vmem:[#allocation8 + $0xa8] ss:$16 sps:$4 sm:$0xff]  }
  0xbb   : > { %v457_v29 = vld [vmem:[%s9087_s3] sm:$0xf]  ;;  %v7810_v36 = vld [vmem:[#allocation8 + $0x20] ss:$16 sps:$4 sm:$0xff]   ;;  %s9243_s4 = scalar_lea.vmem [#allocation17], %s7607_s1  ;;  %s7608_s16 = smul.u32 896, %s8928_s15 }
  0xbc   : > { %v7805_v33 = vld [vmem:[#allocation8 + $0x24] ss:$16 sps:$4 sm:$0xff]   ;;  %v7791_v39 = vld [vmem:[#allocation8 + $0x8c] ss:$16 sps:$4 sm:$0xff]   ;;  %v7816_v40 = vld [vmem:[#allocation8] ss:$16 sps:$4 sm:$0xff]  }
  0xbd   : > { %573 = vmatpush1.bf16.msra.mxu0 %v7756_v8  ;;  %1022 = vmatpush1.bf16.msra.mxu1 %v7786_v19  ;;  %v7811_v37 = vld [vmem:[#allocation8 + $0x4] ss:$16 sps:$4 sm:$0xff]   ;;  %v7789_v42 = vld [vmem:[#allocation8 + $0x88] ss:$16 sps:$4 sm:$0xff]   ;;  %v7797_v43 = vld [vmem:[#allocation8 + $0x6c] ss:$16 sps:$4 sm:$0xff]   ;;  %s9293_s29 = scalar_lea.hbm %s9340_s9, %s7608_s16 }
  0xbe   : > { %574 = vmatprep.subr.bf16.mxu0 %v7757_v10  ;;  %1023 = vmatprep.subr.bf16.mxu1 %v7787_v20  ;;  %v7817_v41 = vld [vmem:[#allocation8 + $0x1e4] ss:$16 sps:$4 sm:$0xff]   ;;  %v7822_v44 = vld [vmem:[#allocation8 + $0x1e0] ss:$16 sps:$4 sm:$0xff]   ;;  %v7795_v46 = vld [vmem:[#allocation8 + $0x68] ss:$16 sps:$4 sm:$0xff]  }
  0xbf   : > { %v7823_v45 = vld [vmem:[#allocation8 + $0x1c4] ss:$16 sps:$4 sm:$0xff]   ;;  %v7828_v47 = vld [vmem:[#allocation8 + $0x1c0] ss:$16 sps:$4 sm:$0xff]   ;;  %v7803_v48 = vld [vmem:[#allocation8 + $0x4c] ss:$16 sps:$4 sm:$0xff]  }
  0xc0   : > { %v7829_v49 = vld [vmem:[#allocation8 + $0x1a4] ss:$16 sps:$4 sm:$0xff]   ;;  %v7801_v50 = vld [vmem:[#allocation8 + $0x48] ss:$16 sps:$4 sm:$0xff]   ;;  %v7834_v51 = vld [vmem:[#allocation8 + $0x1a0] ss:$16 sps:$4 sm:$0xff]  }
  0xc1   : > { %575 = vmatpush1.bf16.msra.mxu0 %v7759_v13  ;;  %1024 = vmatpush1.bf16.msra.mxu1 %v7792_v23  ;;  %v7809_v52 = vld [vmem:[#allocation8 + $0x2c] ss:$16 sps:$4 sm:$0xff]   ;;  %v7835_v53 = vld [vmem:[#allocation8 + $0x184] ss:$16 sps:$4 sm:$0xff]   ;;  %v7807_v54 = vld [vmem:[#allocation8 + $0x28] ss:$16 sps:$4 sm:$0xff]  }
  0xc2   : > { %576 = vmatprep.subr.bf16.mxu0 %v7760_v14  ;;  %1025 = vmatprep.subr.bf16.mxu1 %v7793_v24  ;;  %v7840_v55 = vld [vmem:[#allocation8 + $0x180] ss:$16 sps:$4 sm:$0xff]   ;;  %v7815_v56 = vld [vmem:[#allocation8 + $0xc] ss:$16 sps:$4 sm:$0xff]   ;;  %v7841_v57 = vld [vmem:[#allocation8 + $0x164] ss:$16 sps:$4 sm:$0xff]  }
  0xc3   : > { %v7813_v58 = vld [vmem:[#allocation8 + $0x8] ss:$16 sps:$4 sm:$0xff]   ;;  %v7846_v59 = vld [vmem:[#allocation8 + $0x160] ss:$16 sps:$4 sm:$0xff]   ;;  %v7821_v60 = vld [vmem:[#allocation8 + $0x1ec] ss:$16 sps:$4 sm:$0xff]  }
  0xc4   : > { %v7847_v61 = vld [vmem:[#allocation8 + $0x144] ss:$16 sps:$4 sm:$0xff]   ;;  %v7819_v62 = vld [vmem:[#allocation8 + $0x1e8] ss:$16 sps:$4 sm:$0xff]   ;;  %v7852_v63 = vld [vmem:[#allocation8 + $0x140] ss:$16 sps:$4 sm:$0xff]  }
  0xc5   : > { %577 = vmatpush1.bf16.msra.mxu0 %v7762_v17  ;;  %1026 = vmatpush1.bf16.msra.mxu1 %v7798_v27  ;;  %v7827_v0 = vld [vmem:[#allocation8 + $0x1cc] ss:$16 sps:$4 sm:$0xff]   ;;  %v7825_v1 = vld [vmem:[#allocation8 + $0x1c8] ss:$16 sps:$4 sm:$0xff]   ;;  %v7853_v10 = vld [vmem:[#allocation8 + $0x124] ss:$16 sps:$4 sm:$0xff]  }
  0xc6   : > { %578 = vmatprep.subr.bf16.mxu0 %v7763_v18  ;;  %1027 = vmatprep.subr.bf16.mxu1 %v7799_v28  ;;  %v7833_v2 = vld [vmem:[#allocation8 + $0x1ac] ss:$16 sps:$4 sm:$0xff]   ;;  %v7831_v3 = vld [vmem:[#allocation8 + $0x1a8] ss:$16 sps:$4 sm:$0xff]   ;;  %v7858_v13 = vld [vmem:[#allocation8 + $0x120] ss:$16 sps:$4 sm:$0xff]  }
  0xc7   : > { %v7839_v4 = vld [vmem:[#allocation8 + $0x18c] ss:$16 sps:$4 sm:$0xff]   ;;  %v7837_v5 = vld [vmem:[#allocation8 + $0x188] ss:$16 sps:$4 sm:$0xff]   ;;  %v7859_v14 = vld [vmem:[#allocation8 + $0x104] ss:$16 sps:$4 sm:$0xff]  }
  0xc8   : > { %v7845_v6 = vld [vmem:[#allocation8 + $0x16c] ss:$16 sps:$4 sm:$0xff]   ;;  %v7843_v7 = vld [vmem:[#allocation8 + $0x168] ss:$16 sps:$4 sm:$0xff]   ;;  %v7864_v17 = vld [vmem:[#allocation8 + $0x100] ss:$16 sps:$4 sm:$0xff]  }
  0xc9   : > { %579 = vmatpush1.bf16.msra.mxu0 %v7765_v21  ;;  %1028 = vmatpush1.bf16.msra.mxu1 %v7804_v32  ;;  %v7851_v8 = vld [vmem:[#allocation8 + $0x14c] ss:$16 sps:$4 sm:$0xff]   ;;  %v7849_v9 = vld [vmem:[#allocation8 + $0x148] ss:$16 sps:$4 sm:$0xff]   ;;  %s6563_s21 = sshll.u32 %s9243_s4, 4  ;;  %s6549_s18 = scalar_lea.sflag [#allocation4], %s9083_s2  ;;  %s6564_s21 = int_to_ptr.vmem [resolvable:$true] %s6563_s21 }
  0xca   : > { %580 = vmatprep.subr.bf16.mxu0 %v7766_v22  ;;  %1029 = vmatprep.subr.bf16.mxu1 %v7805_v33  ;;  %v7857_v11 = vld [vmem:[#allocation8 + $0x12c] ss:$16 sps:$4 sm:$0xff]   ;;  %v7855_v12 = vld [vmem:[#allocation8 + $0x128] ss:$16 sps:$4 sm:$0xff]   ;;  %s8756_s24 = scalar_lea.vmem %s6564_s21, 896  ;;  %p9372_p8 = scmp.ne.s32.totalorder %s9359_s20, 0 }
  0xcb   : > { %v7863_v15 = vld [vmem:[#allocation8 + $0x10c] ss:$16 sps:$4 sm:$0xff]   ;;  %v7861_v16 = vld [vmem:[#allocation8 + $0x108] ss:$16 sps:$4 sm:$0xff]   ;;  %p8757_p5 = scmp.ne.s32.totalorder %s6564_s21, %s8756_s24  ;;  %s8856_s22 = smov [#allocation17]  }
  0xcc   : > { %v1163_v18 = vld [vmem:[#allocation11 + $0x1c0] sm:$0xff]  ;;  %v474_v28 = vld [vmem:[#allocation7] sm:$0x3]  ;;  %s8760_s17 = sshll.u32 %s8856_s22, 4  ;;  %s8761_s17 = int_to_ptr.vmem [resolvable:$false] %s8760_s17 }
  0xcd   : > { %581 = vmatpush1.bf16.msra.mxu0 %v7768_v25  ;;  %1030 = vmatpush1.bf16.msra.mxu1 %v7810_v36  ;;  %v1167_v19 = vld [vmem:[#allocation11 + $0x1e0] sm:$0xff]  ;;  %p8758_p12 = pnand %p8757_p5, %p9372_p8  ;;  %s8762_s14 = scalar_lea.vmem %s8761_s17, 1792 }
  0xce   : > { %1058 = vmatprep.subr.bf16.mxu0 %v7773_v26  ;;  %1031 = vmatprep.subr.bf16.mxu1 %v7811_v37  ;;  %v1291_v20 = vld [vmem:[#allocation11 + $0x5c0] sm:$0xff]  ;;  %v6868_v21 = vcombine.low %v1163_v18, %v1167_v19  ;;  %v6869_v22 = vcombine.high %v1163_v18, %v1167_v19  ;;  %v476_v26 = vlaneseq  ;;  %p8763_p4 = scmp.lt.s32.totalorder %s6564_s21, %s8761_s17  ;;  %p8764_p7 = scmp.lt.s32.totalorder %s8762_s14, %s8756_s24 }
  0xcf   : > { %v1295_v23 = vld [vmem:[#allocation11 + $0x5e0] sm:$0xff]  ;;  %p8759_p1 = pneg %p8758_p12 }
  0xd0   : > { %599 = vmatmul.mubr.bf16.vlgmr.msra.gmra.mxu0 %v457_v29  ;;  %v6996_v24 = vcombine.low %v1291_v20, %v1295_v23  ;;  %v6997_v25 = vcombine.high %v1291_v20, %v1295_v23  ;;  %v9110_v27 = vshrl.u32 %v476_v26, 7  ;;  %v1119_v18 = vld [vmem:[#allocation11 + $0x60] sm:$0xff]  ;;  %p8765_p6 = por %p8764_p7, %p8763_p4 }
  0xd1   : > { %1059 = vmatpush1.bf16.msra.mxu0 %v7771_v30  ;;  %1032 = vmatpush1.bf16.msra.mxu1 %v7816_v40  ;;  %v1283_v40 = vld [vmem:[#allocation11 + $0x580] sm:$0xff] }
  0xd2   : > { %1060 = vmatprep.subr.bf16.mxu0 %v7779_v31  ;;  %1033 = vmatprep.subr.bf16.mxu1 %v7817_v41  ;;  %v9113_v29 = vsub.s32 0, %v9110_v27  ;;  %v9116_v30 = vsub.s32 1, %v9110_v27  ;;  %v1243_v19 = vld [vmem:[#allocation11 + $0x440] sm:$0xff]  ;;  %p8766_p9 = pnand %p8765_p6, %p8759_p1 }
  0xd3   : > { %v1247_v20 = vld [vmem:[#allocation11 + $0x460] sm:$0xff] }
  0xd4   : > { %v479_v31 = vrot.slane %v474_v28, %v9113_v29  ;;  %v483_v32 = vrot.slane %v474_v28, %v9116_v30  ;;  %v1111_v26 = vld [vmem:[#allocation11 + $0x20] sm:$0xff] }
  0xd5   : > { %1061 = vmatpush1.bf16.msra.mxu0 %v7777_v34  ;;  %1034 = vmatpush2.bf16.msra.mxu1 %v7822_v44  ;;  %v1235_v28 = vld [vmem:[#allocation11 + $0x400] sm:$0xff] }
  0xd6   : > { %1062 = vmatprep.subr.bf16.mxu0 %v7785_v35  ;;  %1035 = vmatprep.subr.bf16.mxu1 %v7823_v45 }
  0xd9   : > { %1063 = vmatpush1.bf16.msra.mxu0 %v7783_v38  ;;  %1036 = vmatpush2.bf16.msra.mxu1 %v7828_v47  ;;  %v1155_v38 = vld [vmem:[#allocation11 + $0x180] sm:$0xff] }
  0xda   : > { %1064 = vmatprep.subr.bf16.mxu0 %v7791_v39  ;;  %1037 = vmatprep.subr.bf16.mxu1 %v7829_v49  ;;  %v1159_v39 = vld [vmem:[#allocation11 + $0x1a0] sm:$0xff] }
  0xdb   : > { %v1151_v47 = vld [vmem:[#allocation11 + $0x160] sm:$0xff] }
  0xdc   : > { %v1279_v49 = vld [vmem:[#allocation11 + $0x560] sm:$0xff] }
  0xdd   : > { %1065 = vmatpush1.bf16.msra.mxu0 %v7789_v42  ;;  %1038 = vmatpush2.bf16.msra.mxu1 %v7834_v51  ;;  %v6861_v51 = vcombine.high %v1155_v38, %v1159_v39 }
  0xde   : > { %1066 = vmatprep.subr.bf16.mxu0 %v7797_v43  ;;  %1039 = vmatprep.subr.bf16.mxu1 %v7835_v53  ;;  %v1287_v43 = vld [vmem:[#allocation11 + $0x5a0] sm:$0xff]  ;;  %v6860_v53 = vcombine.low %v1155_v38, %v1159_v39 }
  0xdf   : > { %v1355_v38 = vld [vmem:[#allocation11 + $0x7c0] sm:$0xff] }
  0xe0   : > { %v1359_v39 = vld [vmem:[#allocation11 + $0x7e0] sm:$0xff] }
  0xe1   : > { %1067 = vmatpush1.bf16.msra.mxu0 %v7795_v46  ;;  %1040 = vmatpush2.bf16.msra.mxu1 %v7840_v55  ;;  %v1147_v46 = vld [vmem:[#allocation11 + $0x140] sm:$0xff] }
  0xe2   : > { %1068 = vmatprep.subr.bf16.mxu0 %v7803_v48  ;;  %1041 = vmatprep.subr.bf16.mxu1 %v7841_v57  ;;  %v1275_v48 = vld [vmem:[#allocation11 + $0x540] sm:$0xff] }
  0xe3   : > { %v1139_v55 = vld [vmem:[#allocation11 + $0x100] sm:$0xff] }
  0xe4   : > { %v1267_v57 = vld [vmem:[#allocation11 + $0x500] sm:$0xff] }
  0xe5   : > { %1069 = vmatpush1.bf16.msra.mxu0 %v7801_v50  ;;  %1042 = vmatpush2.bf16.msra.mxu1 %v7846_v59  ;;  %v6853_v59 = vcombine.high %v1147_v46, %v1151_v47 }
  0xe6   : > { %1070 = vmatprep.subr.bf16.mxu0 %v7809_v52  ;;  %1043 = vmatprep.subr.bf16.mxu1 %v7847_v61  ;;  %v6989_v52 = vcombine.high %v1283_v40, %v1287_v43  ;;  %v6852_v61 = vcombine.low %v1147_v46, %v1151_v47  ;;  %v1347_v46 = vld [vmem:[#allocation11 + $0x780] sm:$0xff] }
  0xe7   : > { %v1351_v47 = vld [vmem:[#allocation11 + $0x7a0] sm:$0xff] }
  0xe9   : > { %1071 = vmatpush1.bf16.msra.mxu0 %v7807_v54  ;;  %1044 = vmatpush2.bf16.msra.mxu1 %v7852_v63  ;;  %v6988_v54 = vcombine.low %v1283_v40, %v1287_v43  ;;  %v1131_v63 = vld [vmem:[#allocation11 + $0xc0] sm:$0xff]  ;;  %v7061_v43 = vcombine.high %v1355_v38, %v1359_v39 }
  0xea   : > { %1072 = vmatprep.subr.bf16.mxu0 %v7815_v56  ;;  %1045 = vmatprep.subr.bf16.mxu1 %v7853_v10  ;;  %v1143_v56 = vld [vmem:[#allocation11 + $0x120] sm:$0xff] }
  0xeb   : > { %v1127_v10 = vld [vmem:[#allocation11 + $0xa0] sm:$0xff] }
  0xed   : > { %1073 = vmatpush1.bf16.msra.mxu0 %v7813_v58  ;;  %1046 = vmatpush2.bf16.msra.mxu1 %v7858_v13  ;;  %v1271_v58 = vld [vmem:[#allocation11 + $0x520] sm:$0xff] }
  0xee   : > { %1074 = vmatprep.subr.bf16.mxu0 %v7821_v60  ;;  %1047 = vmatprep.subr.bf16.mxu1 %v7859_v14  ;;  %v6981_v60 = vcombine.high %v1275_v48, %v1279_v49 }
  0xf1   : > { %1075 = vmatpush2.bf16.msra.mxu0 %v7819_v62  ;;  %1048 = vmatpush2.bf16.msra.mxu1 %v7864_v17  ;;  %v6980_v62 = vcombine.low %v1275_v48, %v1279_v49  ;;  %v1115_v17 = vld [vmem:[#allocation11 + $0x40] sm:$0xff]  ;;  %v7060_v49 = vcombine.low %v1355_v38, %v1359_v39 }
  0xf2   : > { %1076 = vmatprep.subr.bf16.mxu0 %v7827_v0  ;;  %2685 = vmatprep.subr.bf16.mxu1 %v6869_v22  ;;  %v1135_v0 = vld [vmem:[#allocation11 + $0xe0] sm:$0xff]  ;;  %v6821_v23 = vcombine.high %v1115_v17, %v1119_v18 }
  0xf3   : > { %v6836_v13 = vcombine.low %v1131_v63, %v1135_v0 }
  0xf5   : > { %1077 = vmatpush2.bf16.msra.mxu0 %v7825_v1  ;;  %v1259_v1 = vld [vmem:[#allocation11 + $0x4c0] sm:$0xff] }
  0xf6   : > { %1078 = vmatprep.subr.bf16.mxu0 %v7833_v2  ;;  %v1263_v2 = vld [vmem:[#allocation11 + $0x4e0] sm:$0xff] }
  0xf7   : > { %v6964_v14 = vcombine.low %v1259_v1, %v1263_v2 }
  0xf9   : > { %1079 = vmatpush2.bf16.msra.mxu0 %v7831_v3  ;;  %v6845_v3 = vcombine.high %v1139_v55, %v1143_v56 }
  0xfa   : > { %1080 = vmatprep.subr.bf16.mxu0 %v7839_v4  ;;  %v6973_v4 = vcombine.high %v1267_v57, %v1271_v58 }
  0xfd   : > { %1081 = vmatpush2.bf16.msra.mxu0 %v7837_v5  ;;  %v6844_v5 = vcombine.low %v1139_v55, %v1143_v56  ;;  %v1343_v55 = vld [vmem:[#allocation11 + $0x760] sm:$0xff] }
  0xfe   : > { %1082 = vmatprep.subr.bf16.mxu0 %v7845_v6  ;;  %v6972_v6 = vcombine.low %v1267_v57, %v1271_v58  ;;  %v7052_v57 = vcombine.low %v1347_v46, %v1351_v47 }
 0x101   : > { %1083 = vmatpush2.bf16.msra.mxu0 %v7843_v7  ;;  %v6837_v7 = vcombine.high %v1131_v63, %v1135_v0  ;;  %v1335_v63 = vld [vmem:[#allocation11 + $0x720] sm:$0xff] }
 0x102   : > { %1084 = vmatprep.subr.bf16.mxu0 %v7851_v8  ;;  %v6965_v8 = vcombine.high %v1259_v1, %v1263_v2 }
 0x105   : > { %1085 = vmatpush2.bf16.msra.mxu0 %v7849_v9  ;;  %v1123_v9 = vld [vmem:[#allocation11 + $0x80] sm:$0xff] }
 0x106   : > { %1086 = vmatprep.subr.bf16.mxu0 %v7857_v11  ;;  %v1251_v11 = vld [vmem:[#allocation11 + $0x480] sm:$0xff] }
 0x109   : > { %1087 = vmatpush2.bf16.msra.mxu0 %v7855_v12  ;;  %v1255_v12 = vld [vmem:[#allocation11 + $0x4a0] sm:$0xff] }
 0x10a   : > { %1088 = vmatprep.subr.bf16.mxu0 %v7863_v15  ;;  %v6829_v15 = vcombine.high %v1123_v9, %v1127_v10  ;;  %v6956_v22 = vcombine.low %v1251_v11, %v1255_v12 }
 0x10d   : > { %1089 = vmatpush2.bf16.msra.mxu0 %v7861_v16  ;;  %v6957_v16 = vcombine.high %v1251_v11, %v1255_v12  ;;  %v1187_v12 = vld [vmem:[#allocation11 + $0x280] sm:$0xff] }
 0x10e   : > { %2726 = vmatprep.subr.bf16.mxu0 %v6997_v25  ;;  %v1107_v25 = vld [vmem:[#allocation11] sm:$0xff] }
 0x10f   : > { %v6812_v40 = vcombine.low %v1107_v25, %v1111_v26 }
 0x190   : > { %v600_v33 = vpop.f32.mrf.mxu0 }
 0x191   : > { %v601_v34 = vadd.f32 %v600_v33, %v479_v31  ;;  %v1239_v31 = vld [vmem:[#allocation11 + $0x420] sm:$0xff]  ;;  %v6948_v33 = vcombine.low %v1243_v19, %v1247_v20 }
 0x192   : > { %v602_v35 = vpop.f32.mrf.mxu0 }
 0x193   : > { %v607_v36 = vmax.f32 %v601_v34, 0.0  ;;  %v603_v37 = vadd.f32 %v602_v35, %v483_v32  ;;  %v6820_v32 = vcombine.low %v1115_v17, %v1119_v18  ;;  %v6813_v34 = vcombine.high %v1107_v25, %v1111_v26  ;;  %v1311_v26 = vld [vmem:[#allocation11 + $0x660] sm:$0xff] }
 0x194   : > { %v604_v41 = vpop.f32.mrf.mxu0  ;;  %v6941_v35 = vcombine.high %v1235_v28, %v1239_v31 }
 0x195   : > { %v608_v42 = vmax.f32 %v603_v37, 0.0  ;;  %v609_v50 = vpack.c.bf16 %v607_v36, %v607_v36  ;;  %v1227_v36 = vld [vmem:[#allocation11 + $0x3c0] sm:$0xff]  ;;  %v6940_v41 = vcombine.low %v1235_v28, %v1239_v31 }
 0x196   : > { %v605_v44 = vpop.f32.mrf.mxu0  ;;  %v1231_v37 = vld [vmem:[#allocation11 + $0x3e0] sm:$0xff] }
 0x197   : > { %v610_v45 = vpack.c.bf16 %v608_v42, %v608_v42  ;;  %v6933_v42 = vcombine.high %v1227_v36, %v1231_v37  ;;  %v1219_v44 = vld [vmem:[#allocation11 + $0x380] sm:$0xff]  ;;  %v6932_v48 = vcombine.low %v1227_v36, %v1231_v37 }
 0x198   : > { %v1303_v37 = vld [vmem:[#allocation11 + $0x620] sm:$0xff] }
 0x199   : > { %1049 = vmatprep.mubr.bf16.mxu1 %v610_v45  ;;  %1090 = vmatprep.mubr.bf16.mxu0 %v610_v45  ;;  %v1223_v45 = vld [vmem:[#allocation11 + $0x3a0] sm:$0xff] }
 0x19a   : > { %1050 = vmatmul.mubr.bf16.vlgmr.msra.gmra.mxu1 %v609_v50  ;;  %1091 = vmatmul.mubr.bf16.vlgmr.msra.gmra.mxu0 %v609_v50  ;;  %v6925_v50 = vcombine.high %v1219_v44, %v1223_v45  ;;  %v6924_v56 = vcombine.low %v1219_v44, %v1223_v45  ;;  %v1296_v45 = vld [vmem:[#allocation11 + $0x5e8] sm:$0xff] }
 0x19b   : > { %2686 = vmatpush1.bf16.msra.mxu1 %v6868_v21  ;;  %2727 = vmatpush1.bf16.msra.mxu0 %v6996_v24  ;;  %v6828_v21 = vcombine.low %v1123_v9, %v1127_v10  ;;  %v6949_v24 = vcombine.high %v1243_v19, %v1247_v20 }
 0x19c   : > { %2687 = vmatprep.subr.bf16.mxu1 %v6861_v51  ;;  %2728 = vmatprep.subr.bf16.mxu0 %v6989_v52  ;;  %v7053_v51 = vcombine.high %v1347_v46, %v1351_v47  ;;  %v1211_v52 = vld [vmem:[#allocation11 + $0x340] sm:$0xff] }
 0x19f   : > { %2688 = vmatpush1.bf16.msra.mxu1 %v6860_v53  ;;  %2729 = vmatpush1.bf16.msra.mxu0 %v6988_v54  ;;  %v1215_v53 = vld [vmem:[#allocation11 + $0x360] sm:$0xff] }
 0x1a0   : > { %2689 = vmatprep.subr.bf16.mxu1 %v6853_v59  ;;  %2730 = vmatprep.subr.bf16.mxu0 %v6981_v60  ;;  %v1339_v54 = vld [vmem:[#allocation11 + $0x740] sm:$0xff]  ;;  %v6917_v58 = vcombine.high %v1211_v52, %v1215_v53  ;;  %v6916_v0 = vcombine.low %v1211_v52, %v1215_v53 }
 0x1a1   : > { %v7045_v59 = vcombine.high %v1339_v54, %v1343_v55  ;;  %v1203_v60 = vld [vmem:[#allocation11 + $0x300] sm:$0xff]  ;;  %v7044_v1 = vcombine.low %v1339_v54, %v1343_v55 }
 0x1a3   : > { %2690 = vmatpush1.bf16.msra.mxu1 %v6852_v61  ;;  %2731 = vmatpush1.bf16.msra.mxu0 %v6980_v62  ;;  %v1207_v61 = vld [vmem:[#allocation11 + $0x320] sm:$0xff] }
 0x1a4   : > { %2691 = vmatprep.subr.bf16.mxu1 %v6845_v3  ;;  %2732 = vmatprep.subr.bf16.mxu0 %v6973_v4  ;;  %v1331_v62 = vld [vmem:[#allocation11 + $0x700] sm:$0xff]  ;;  %v6909_v2 = vcombine.high %v1203_v60, %v1207_v61 }
 0x1a5   : > { %v7037_v3 = vcombine.high %v1331_v62, %v1335_v63  ;;  %v1195_v4 = vld [vmem:[#allocation11 + $0x2c0] sm:$0xff]  ;;  %v7036_v9 = vcombine.low %v1331_v62, %v1335_v63 }
 0x1a7   : > { %2692 = vmatpush1.bf16.msra.mxu1 %v6844_v5  ;;  %2733 = vmatpush1.bf16.msra.mxu0 %v6972_v6  ;;  %v1199_v5 = vld [vmem:[#allocation11 + $0x2e0] sm:$0xff] }
 0x1a8   : > { %2693 = vmatprep.subr.bf16.mxu1 %v6837_v7  ;;  %2734 = vmatprep.subr.bf16.mxu0 %v6965_v8  ;;  %v1323_v6 = vld [vmem:[#allocation11 + $0x6c0] sm:$0xff]  ;;  %v6908_v8 = vcombine.low %v1203_v60, %v1207_v61  ;;  %v6901_v10 = vcombine.high %v1195_v4, %v1199_v5 }
 0x1a9   : > { %v1327_v7 = vld [vmem:[#allocation11 + $0x6e0] sm:$0xff] }
 0x1aa   : > { %v7029_v11 = vcombine.high %v1323_v6, %v1327_v7  ;;  %v7028_v17 = vcombine.low %v1323_v6, %v1327_v7  ;;  %v1156_v6 = vld [vmem:[#allocation11 + $0x188] sm:$0xff] }
 0x1ab   : > { %2694 = vmatpush1.bf16.msra.mxu1 %v6836_v13  ;;  %2735 = vmatpush1.bf16.msra.mxu0 %v6964_v14  ;;  %v1191_v13 = vld [vmem:[#allocation11 + $0x2a0] sm:$0xff] }
 0x1ac   : > { %2695 = vmatprep.subr.bf16.mxu1 %v6829_v15  ;;  %2736 = vmatprep.subr.bf16.mxu0 %v6957_v16  ;;  %v1315_v14 = vld [vmem:[#allocation11 + $0x680] sm:$0xff]  ;;  %v6900_v16 = vcombine.low %v1195_v4, %v1199_v5  ;;  %v6893_v18 = vcombine.high %v1187_v12, %v1191_v13  ;;  %v6892_v20 = vcombine.low %v1187_v12, %v1191_v13 }
 0x1ad   : > { %v1319_v15 = vld [vmem:[#allocation11 + $0x6a0] sm:$0xff] }
 0x1ae   : > { %v7021_v19 = vcombine.high %v1315_v14, %v1319_v15 }
 0x1af   : > { %2696 = vmatpush1.bf16.msra.mxu1 %v6828_v21  ;;  %2737 = vmatpush1.bf16.msra.mxu0 %v6956_v22  ;;  %v7020_v21 = vcombine.low %v1315_v14, %v1319_v15  ;;  %v1179_v22 = vld [vmem:[#allocation11 + $0x240] sm:$0xff] }
 0x1b0   : > { %2697 = vmatprep.subr.bf16.mxu1 %v6821_v23  ;;  %2738 = vmatprep.subr.bf16.mxu0 %v6949_v24  ;;  %v1183_v23 = vld [vmem:[#allocation11 + $0x260] sm:$0xff] }
 0x1b1   : > { %v1307_v24 = vld [vmem:[#allocation11 + $0x640] sm:$0xff]  ;;  %v6885_v25 = vcombine.high %v1179_v22, %v1183_v23  ;;  %v6884_v28 = vcombine.low %v1179_v22, %v1183_v23 }
 0x1b2   : > { %v7012_v31 = vcombine.low %v1307_v24, %v1311_v26 }
 0x1b3   : > { %2698 = vmatpush1.bf16.msra.mxu1 %v6820_v32  ;;  %2739 = vmatpush1.bf16.msra.mxu0 %v6948_v33  ;;  %v7013_v32 = vcombine.high %v1307_v24, %v1311_v26  ;;  %v1171_v33 = vld [vmem:[#allocation11 + $0x200] sm:$0xff]  ;;  %v1140_v26 = vld [vmem:[#allocation11 + $0x108] sm:$0xff] }
 0x1b4   : > { %2699 = vmatprep.subr.bf16.mxu1 %v6813_v34  ;;  %2740 = vmatprep.subr.bf16.mxu0 %v6941_v35  ;;  %v1175_v34 = vld [vmem:[#allocation11 + $0x220] sm:$0xff] }
 0x1b5   : > { %v1299_v35 = vld [vmem:[#allocation11 + $0x600] sm:$0xff]  ;;  %v6877_v36 = vcombine.high %v1171_v33, %v1175_v34  ;;  %v6876_v38 = vcombine.low %v1171_v33, %v1175_v34 }
 0x1b6   : > { %v7004_v39 = vcombine.low %v1299_v35, %v1303_v37 }
 0x1b7   : > { %2700 = vmatpush1.bf16.msra.mxu1 %v6812_v40  ;;  %2741 = vmatpush1.bf16.msra.mxu0 %v6940_v41  ;;  %v7005_v40 = vcombine.high %v1299_v35, %v1303_v37  ;;  %v1164_v41 = vld [vmem:[#allocation11 + $0x1c8] sm:$0xff] }
 0x1b8   : > { %2701 = vmatprep.subr.bf16.mxu1 %v6933_v42  ;;  %2742 = vmatprep.subr.bf16.mxu0 %v7061_v43  ;;  %v1168_v42 = vld [vmem:[#allocation11 + $0x1e8] sm:$0xff] }
 0x1b9   : > { %v1292_v43 = vld [vmem:[#allocation11 + $0x5c8] sm:$0xff]  ;;  %v6871_v44 = vcombine.high %v1164_v41, %v1168_v42  ;;  %v6870_v46 = vcombine.low %v1164_v41, %v1168_v42 }
 0x1ba   : > { %v6998_v47 = vcombine.low %v1292_v43, %v1296_v45  ;;  %v1132_v37 = vld [vmem:[#allocation11 + $0xc8] sm:$0xff] }
 0x1bb   : > { %2702 = vmatpush2.bf16.msra.mxu1 %v6932_v48  ;;  %2743 = vmatpush2.bf16.msra.mxu0 %v7060_v49  ;;  %v6999_v48 = vcombine.high %v1292_v43, %v1296_v45  ;;  %v9121_v49 = vsub.s32 2, %v9110_v27  ;;  %v1124_v45 = vld [vmem:[#allocation11 + $0x88] sm:$0xff] }
 0x1bc   : > { %2703 = vmatprep.subr.bf16.mxu1 %v6925_v50  ;;  %2744 = vmatprep.subr.bf16.mxu0 %v7053_v51  ;;  %v675_v50 = vld [vmem:[#allocation10] sm:$0xf]  ;;  %v9124_v51 = vsub.s32 3, %v9110_v27 }
 0x1bd   : > { %v680_v52 = vrot.slane %v675_v50, %v9113_v29  ;;  %v688_v53 = vrot.slane %v675_v50, %v9121_v49  ;;  %v684_v54 = vrot.slane %v675_v50, %v9116_v30 }
 0x1be   : > { %v692_v55 = vrot.slane %v675_v50, %v9124_v51 }
 0x1bf   : > { %2704 = vmatpush2.bf16.msra.mxu1 %v6924_v56  ;;  %2745 = vmatpush2.bf16.msra.mxu0 %v7052_v57 }
 0x1c0   : > { %2705 = vmatprep.subr.bf16.mxu1 %v6917_v58  ;;  %2746 = vmatprep.subr.bf16.mxu0 %v7045_v59 }
 0x1c3   : > { %2706 = vmatpush2.bf16.msra.mxu1 %v6916_v0  ;;  %2747 = vmatpush2.bf16.msra.mxu0 %v7044_v1 }
 0x1c4   : > { %2707 = vmatprep.subr.bf16.mxu1 %v6909_v2  ;;  %2748 = vmatprep.subr.bf16.mxu0 %v7037_v3 }
 0x1c7   : > { %2708 = vmatpush2.bf16.msra.mxu1 %v6908_v8  ;;  %2749 = vmatpush2.bf16.msra.mxu0 %v7036_v9  ;;  %v1160_v9 = vld [vmem:[#allocation11 + $0x1a8] sm:$0xff] }
 0x1c8   : > { %2709 = vmatprep.subr.bf16.mxu1 %v6901_v10  ;;  %2750 = vmatprep.subr.bf16.mxu0 %v7029_v11  ;;  %v1284_v10 = vld [vmem:[#allocation11 + $0x588] sm:$0xff]  ;;  %v6862_v22 = vcombine.low %v1156_v6, %v1160_v9 }
 0x1c9   : > { %v1288_v11 = vld [vmem:[#allocation11 + $0x5a8] sm:$0xff] }
 0x1ca   : > { %v6990_v23 = vcombine.low %v1284_v10, %v1288_v11 }
 0x1cb   : > { %2710 = vmatpush2.bf16.msra.mxu1 %v6900_v16  ;;  %2751 = vmatpush2.bf16.msra.mxu0 %v7028_v17  ;;  %v1148_v16 = vld [vmem:[#allocation11 + $0x148] sm:$0xff]  ;;  %v6863_v17 = vcombine.high %v1156_v6, %v1160_v9 }
 0x1cc   : > { %2711 = vmatprep.subr.bf16.mxu1 %v6893_v18  ;;  %2752 = vmatprep.subr.bf16.mxu0 %v7021_v19  ;;  %v6991_v18 = vcombine.high %v1284_v10, %v1288_v11  ;;  %v1152_v19 = vld [vmem:[#allocation11 + $0x168] sm:$0xff] }
 0x1cd   : > { %v6855_v24 = vcombine.high %v1148_v16, %v1152_v19  ;;  %v6854_v33 = vcombine.low %v1148_v16, %v1152_v19  ;;  %v1356_v9 = vld [vmem:[#allocation11 + $0x7c8] sm:$0xff] }
 0x1ce   : > { %v1360_v10 = vld [vmem:[#allocation11 + $0x7e8] sm:$0xff] }
 0x1cf   : > { %2712 = vmatpush2.bf16.msra.mxu1 %v6892_v20  ;;  %2753 = vmatpush2.bf16.msra.mxu0 %v7020_v21  ;;  %v1276_v20 = vld [vmem:[#allocation11 + $0x548] sm:$0xff] }
 0x1d0   : > { %2713 = vmatprep.subr.bf16.mxu1 %v6885_v25  ;;  %2754 = vmatprep.subr.bf16.mxu0 %v7013_v32  ;;  %v1280_v21 = vld [vmem:[#allocation11 + $0x568] sm:$0xff] }
 0x1d1   : > { %v6983_v25 = vcombine.high %v1276_v20, %v1280_v21  ;;  %v1272_v32 = vld [vmem:[#allocation11 + $0x528] sm:$0xff]  ;;  %v6982_v34 = vcombine.low %v1276_v20, %v1280_v21 }
 0x1d2   : > { %v1220_v19 = vld [vmem:[#allocation11 + $0x388] sm:$0xff] }
 0x1d3   : > { %2714 = vmatpush2.bf16.msra.mxu1 %v6884_v28  ;;  %2755 = vmatpush2.bf16.msra.mxu0 %v7012_v31  ;;  %v1144_v28 = vld [vmem:[#allocation11 + $0x128] sm:$0xff] }
 0x1d4   : > { %2715 = vmatprep.subr.bf16.mxu1 %v6877_v36  ;;  %2756 = vmatprep.subr.bf16.mxu0 %v7005_v40  ;;  %v1268_v31 = vld [vmem:[#allocation11 + $0x508] sm:$0xff]  ;;  %v6847_v35 = vcombine.high %v1140_v26, %v1144_v28  ;;  %v6846_v41 = vcombine.low %v1140_v26, %v1144_v28 }
 0x1d5   : > { %v6975_v36 = vcombine.high %v1268_v31, %v1272_v32  ;;  %v1264_v40 = vld [vmem:[#allocation11 + $0x4e8] sm:$0xff]  ;;  %v6974_v42 = vcombine.low %v1268_v31, %v1272_v32 }
 0x1d6   : > { %v1224_v20 = vld [vmem:[#allocation11 + $0x3a8] sm:$0xff] }
 0x1d7   : > { %2716 = vmatpush2.bf16.msra.mxu1 %v6876_v38  ;;  %2757 = vmatpush2.bf16.msra.mxu0 %v7004_v39  ;;  %v1136_v38 = vld [vmem:[#allocation11 + $0xe8] sm:$0xff] }
 0x1d8   : > { %2767 = vmatprep.subr.bf16.mxu1 %v6871_v44  ;;  %2808 = vmatprep.subr.bf16.mxu0 %v6999_v48  ;;  %v1260_v39 = vld [vmem:[#allocation11 + $0x4c8] sm:$0xff]  ;;  %v6839_v43 = vcombine.high %v1132_v37, %v1136_v38  ;;  %v6838_v50 = vcombine.low %v1132_v37, %v1136_v38 }
 0x1d9   : > { %v6967_v44 = vcombine.high %v1260_v39, %v1264_v40  ;;  %v1256_v48 = vld [vmem:[#allocation11 + $0x4a8] sm:$0xff] }
 0x1da   : > { %v1348_v21 = vld [vmem:[#allocation11 + $0x788] sm:$0xff] }
 0x1db   : > { %v1212_v28 = vld [vmem:[#allocation11 + $0x348] sm:$0xff] }
 0x1dc   : > { %v1216_v31 = vld [vmem:[#allocation11 + $0x368] sm:$0xff] }
 0x1dd   : > { %v1340_v32 = vld [vmem:[#allocation11 + $0x748] sm:$0xff] }
 0x1de   : > { %v1204_v38 = vld [vmem:[#allocation11 + $0x308] sm:$0xff] }
 0x25a   : > { %v1051_v56 = vpop.f32.mrf.mxu1  ;;  %v1092_v57 = vpop.f32.mrf.mxu0 }
 0x25b   : > { %v1052_v58 = vadd.f32 %v1051_v56, %v680_v52  ;;  %v1093_v59 = vadd.f32 %v1092_v57, %v688_v53  ;;  %v6966_v52 = vcombine.low %v1260_v39, %v1264_v40  ;;  %v1120_v56 = vld [vmem:[#allocation11 + $0x68] sm:$0xff] }
 0x25c   : > { %v1053_v60 = vpop.f32.mrf.mxu1  ;;  %v1094_v61 = vpop.f32.mrf.mxu0  ;;  %v1244_v57 = vld [vmem:[#allocation11 + $0x448] sm:$0xff] }
 0x25d   : > { %v1054_v62 = vadd.f32 %v1053_v60, %v684_v54  ;;  %v1095_v63 = vadd.f32 %v1094_v61, %v692_v55  ;;  %v1099_v0 = vmax.f32 %v1052_v58, 0.0  ;;  %v1101_v1 = vmax.f32 %v1093_v59, 0.0  ;;  %v1116_v55 = vld [vmem:[#allocation11 + $0x48] sm:$0xff] }
 0x25e   : > { %v1055_v2 = vpop.f32.mrf.mxu1  ;;  %v1096_v3 = vpop.f32.mrf.mxu0  ;;  %v1248_v58 = vld [vmem:[#allocation11 + $0x468] sm:$0xff]  ;;  %v6823_v61 = vcombine.high %v1116_v55, %v1120_v56 }
 0x25f   : > { %v1100_v4 = vmax.f32 %v1054_v62, 0.0  ;;  %v1102_v5 = vmax.f32 %v1095_v63, 0.0  ;;  %v9134_v14 = vpack.c.bf16 %v1099_v0, %v1099_v0  ;;  %v9136_v15 = vpack.c.bf16 %v1101_v1, %v1101_v1  ;;  %v1108_v63 = vld [vmem:[#allocation11 + $0x8] sm:$0xff] }
 0x260   : > { %v1056_v7 = vpop.f32.mrf.mxu1  ;;  %v1097_v8 = vpop.f32.mrf.mxu0  ;;  %v6951_v62 = vcombine.high %v1244_v57, %v1248_v58  ;;  %v1112_v0 = vld [vmem:[#allocation11 + $0x28] sm:$0xff]  ;;  %v6822_v3 = vcombine.low %v1116_v55, %v1120_v56 }
 0x261   : > { %v9130_v12 = vpack.c.bf16 %v1100_v4, %v1100_v4  ;;  %v9132_v13 = vpack.c.bf16 %v1102_v5, %v1102_v5  ;;  %v1236_v1 = vld [vmem:[#allocation11 + $0x408] sm:$0xff]  ;;  %v6950_v4 = vcombine.low %v1244_v57, %v1248_v58  ;;  %v6815_v5 = vcombine.high %v1108_v63, %v1112_v0 }
 0x262   : > { %v1240_v2 = vld [vmem:[#allocation11 + $0x428] sm:$0xff]  ;;  %v6814_v11 = vcombine.low %v1108_v63, %v1112_v0 }
 0x263   : > { %2717 = vmatprep.mubr.bf16.mxu1 %v9130_v12  ;;  %2758 = vmatprep.mubr.bf16.mxu0 %v9132_v13  ;;  %v6943_v6 = vcombine.high %v1236_v1, %v1240_v2  ;;  %v1228_v7 = vld [vmem:[#allocation11 + $0x3c8] sm:$0xff]  ;;  %v6942_v16 = vcombine.low %v1236_v1, %v1240_v2 }
 0x264   : > { %2718 = vmatmul.mubr.bf16.vlgmr.msra.gmra.mxu1 %v9134_v14  ;;  %2759 = vmatmul.mubr.bf16.vlgmr.msra.gmra.mxu0 %v9136_v15  ;;  %v1232_v8 = vld [vmem:[#allocation11 + $0x3e8] sm:$0xff] }
 0x265   : > { %2768 = vmatpush1.bf16.msra.mxu1 %v6870_v46  ;;  %2809 = vmatpush1.bf16.msra.mxu0 %v6998_v47  ;;  %v1128_v46 = vld [vmem:[#allocation11 + $0xa8] sm:$0xff] }
 0x266   : > { %2799 = vmatprep.mubr.bf16.mxu1 %v9130_v12  ;;  %2840 = vmatprep.mubr.bf16.mxu0 %v9132_v13  ;;  %v1252_v47 = vld [vmem:[#allocation11 + $0x488] sm:$0xff]  ;;  %v6831_v53 = vcombine.high %v1124_v45, %v1128_v46  ;;  %v6830_v59 = vcombine.low %v1124_v45, %v1128_v46 }
 0x267   : > { %2769 = vmatprep.subr.bf16.mxu1 %v6863_v17  ;;  %2810 = vmatprep.subr.bf16.mxu0 %v6991_v18  ;;  %v6959_v54 = vcombine.high %v1252_v47, %v1256_v48  ;;  %v6958_v60 = vcombine.low %v1252_v47, %v1256_v48  ;;  %v6935_v17 = vcombine.high %v1228_v7, %v1232_v8  ;;  %v1208_v39 = vld [vmem:[#allocation11 + $0x328] sm:$0xff] }
 0x268   : > { %v7063_v18 = vcombine.high %v1356_v9, %v1360_v10  ;;  %v1332_v40 = vld [vmem:[#allocation11 + $0x708] sm:$0xff] }
 0x269   : > { %2770 = vmatpush1.bf16.msra.mxu1 %v6862_v22  ;;  %2811 = vmatpush1.bf16.msra.mxu0 %v6990_v23  ;;  %v1352_v22 = vld [vmem:[#allocation11 + $0x7a8] sm:$0xff]  ;;  %v6934_v23 = vcombine.low %v1228_v7, %v1232_v8 }
 0x26a   : > { %2771 = vmatprep.subr.bf16.mxu1 %v6855_v24  ;;  %2812 = vmatprep.subr.bf16.mxu0 %v6983_v25  ;;  %v7062_v24 = vcombine.low %v1356_v9, %v1360_v10  ;;  %v6927_v25 = vcombine.high %v1220_v19, %v1224_v20  ;;  %v7055_v26 = vcombine.high %v1348_v21, %v1352_v22  ;;  %v1196_v46 = vld [vmem:[#allocation11 + $0x2c8] sm:$0xff] }
 0x26b   : > { %v1200_v47 = vld [vmem:[#allocation11 + $0x2e8] sm:$0xff] }
 0x26c   : > { %v1324_v48 = vld [vmem:[#allocation11 + $0x6c8] sm:$0xff] }
 0x26d   : > { %2772 = vmatpush1.bf16.msra.mxu1 %v6854_v33  ;;  %2813 = vmatpush1.bf16.msra.mxu0 %v6982_v34  ;;  %v1344_v33 = vld [vmem:[#allocation11 + $0x768] sm:$0xff]  ;;  %v6926_v34 = vcombine.low %v1220_v19, %v1224_v20  ;;  %v1165_v20 = vld [vmem:[#allocation11 + $0x1d0] sm:$0xff] }
 0x26e   : > { %2773 = vmatprep.subr.bf16.mxu1 %v6847_v35  ;;  %2814 = vmatprep.subr.bf16.mxu0 %v6975_v36  ;;  %v7054_v35 = vcombine.low %v1348_v21, %v1352_v22  ;;  %v6919_v36 = vcombine.high %v1212_v28, %v1216_v31  ;;  %v7047_v37 = vcombine.high %v1340_v32, %v1344_v33  ;;  %v1188_v56 = vld [vmem:[#allocation11 + $0x288] sm:$0xff]  ;;  %v1169_v21 = vld [vmem:[#allocation11 + $0x1f0] sm:$0xff] }
 0x26f   : > { %v1192_v57 = vld [vmem:[#allocation11 + $0x2a8] sm:$0xff]  ;;  %v1293_v22 = vld [vmem:[#allocation11 + $0x5d0] sm:$0xff] }
 0x270   : > { %v1316_v58 = vld [vmem:[#allocation11 + $0x688] sm:$0xff] }
 0x271   : > { %2774 = vmatpush1.bf16.msra.mxu1 %v6846_v41  ;;  %2815 = vmatpush1.bf16.msra.mxu0 %v6974_v42  ;;  %v1336_v41 = vld [vmem:[#allocation11 + $0x728] sm:$0xff]  ;;  %v6918_v42 = vcombine.low %v1212_v28, %v1216_v31  ;;  %v1157_v31 = vld [vmem:[#allocation11 + $0x190] sm:$0xff] }
 0x272   : > { %2775 = vmatprep.subr.bf16.mxu1 %v6839_v43  ;;  %2816 = vmatprep.subr.bf16.mxu0 %v6967_v44  ;;  %v7046_v43 = vcombine.low %v1340_v32, %v1344_v33  ;;  %v6911_v44 = vcombine.high %v1204_v38, %v1208_v39  ;;  %v7039_v45 = vcombine.high %v1332_v40, %v1336_v41  ;;  %v1180_v0 = vld [vmem:[#allocation11 + $0x248] sm:$0xff]  ;;  %v1161_v32 = vld [vmem:[#allocation11 + $0x1b0] sm:$0xff] }
 0x273   : > { %v1184_v1 = vld [vmem:[#allocation11 + $0x268] sm:$0xff]  ;;  %v1285_v33 = vld [vmem:[#allocation11 + $0x590] sm:$0xff] }
 0x274   : > { %v1308_v2 = vld [vmem:[#allocation11 + $0x648] sm:$0xff] }
 0x275   : > { %2776 = vmatpush1.bf16.msra.mxu1 %v6838_v50  ;;  %2817 = vmatpush1.bf16.msra.mxu0 %v6966_v52  ;;  %v1328_v50 = vld [vmem:[#allocation11 + $0x6e8] sm:$0xff]  ;;  %v6910_v52 = vcombine.low %v1204_v38, %v1208_v39  ;;  %v1149_v39 = vld [vmem:[#allocation11 + $0x150] sm:$0xff] }
 0x276   : > { %2777 = vmatprep.subr.bf16.mxu1 %v6831_v53  ;;  %2818 = vmatprep.subr.bf16.mxu0 %v6959_v54  ;;  %v7038_v53 = vcombine.low %v1332_v40, %v1336_v41  ;;  %v6903_v54 = vcombine.high %v1196_v46, %v1200_v47  ;;  %v7031_v55 = vcombine.high %v1324_v48, %v1328_v50  ;;  %v1172_v8 = vld [vmem:[#allocation11 + $0x208] sm:$0xff]  ;;  %v1153_v40 = vld [vmem:[#allocation11 + $0x170] sm:$0xff] }
 0x277   : > { %v1176_v9 = vld [vmem:[#allocation11 + $0x228] sm:$0xff]  ;;  %v1277_v41 = vld [vmem:[#allocation11 + $0x550] sm:$0xff] }
 0x278   : > { %v1300_v10 = vld [vmem:[#allocation11 + $0x608] sm:$0xff] }
 0x279   : > { %2778 = vmatpush1.bf16.msra.mxu1 %v6830_v59  ;;  %2819 = vmatpush1.bf16.msra.mxu0 %v6958_v60  ;;  %v1320_v59 = vld [vmem:[#allocation11 + $0x6a8] sm:$0xff]  ;;  %v6902_v60 = vcombine.low %v1196_v46, %v1200_v47  ;;  %v1141_v47 = vld [vmem:[#allocation11 + $0x110] sm:$0xff] }
 0x27a   : > { %2779 = vmatprep.subr.bf16.mxu1 %v6823_v61  ;;  %2820 = vmatprep.subr.bf16.mxu0 %v6951_v62  ;;  %v7030_v61 = vcombine.low %v1324_v48, %v1328_v50  ;;  %v6895_v62 = vcombine.high %v1188_v56, %v1192_v57  ;;  %v7023_v63 = vcombine.high %v1316_v58, %v1320_v59  ;;  %v1145_v48 = vld [vmem:[#allocation11 + $0x130] sm:$0xff] }
 0x27b   : > { %v1269_v50 = vld [vmem:[#allocation11 + $0x510] sm:$0xff] }
 0x27d   : > { %2780 = vmatpush1.bf16.msra.mxu1 %v6822_v3  ;;  %2821 = vmatpush1.bf16.msra.mxu0 %v6950_v4  ;;  %v1312_v3 = vld [vmem:[#allocation11 + $0x668] sm:$0xff]  ;;  %v6894_v4 = vcombine.low %v1188_v56, %v1192_v57  ;;  %v1133_v57 = vld [vmem:[#allocation11 + $0xd0] sm:$0xff] }
 0x27e   : > { %2781 = vmatprep.subr.bf16.mxu1 %v6815_v5  ;;  %2822 = vmatprep.subr.bf16.mxu0 %v6943_v6  ;;  %v7022_v5 = vcombine.low %v1316_v58, %v1320_v59  ;;  %v6887_v6 = vcombine.high %v1180_v0, %v1184_v1  ;;  %v7015_v7 = vcombine.high %v1308_v2, %v1312_v3  ;;  %v1137_v58 = vld [vmem:[#allocation11 + $0xf0] sm:$0xff] }
 0x27f   : > { %v1261_v59 = vld [vmem:[#allocation11 + $0x4d0] sm:$0xff] }
 0x281   : > { %2782 = vmatpush1.bf16.msra.mxu1 %v6814_v11  ;;  %2823 = vmatpush1.bf16.msra.mxu0 %v6942_v16  ;;  %v1304_v11 = vld [vmem:[#allocation11 + $0x628] sm:$0xff]  ;;  %v6886_v16 = vcombine.low %v1180_v0, %v1184_v1  ;;  %v1125_v1 = vld [vmem:[#allocation11 + $0x90] sm:$0xff] }
 0x282   : > { %2783 = vmatprep.subr.bf16.mxu1 %v6935_v17  ;;  %2824 = vmatprep.subr.bf16.mxu0 %v7063_v18  ;;  %v7014_v17 = vcombine.low %v1308_v2, %v1312_v3  ;;  %v6879_v18 = vcombine.high %v1172_v8, %v1176_v9  ;;  %v7007_v19 = vcombine.high %v1300_v10, %v1304_v11  ;;  %v1129_v2 = vld [vmem:[#allocation11 + $0xb0] sm:$0xff] }
 0x283   : > { %v1253_v3 = vld [vmem:[#allocation11 + $0x490] sm:$0xff] }
 0x285   : > { %2784 = vmatpush2.bf16.msra.mxu1 %v6934_v23  ;;  %2825 = vmatpush2.bf16.msra.mxu0 %v7062_v24  ;;  %v1297_v23 = vld [vmem:[#allocation11 + $0x5f0] sm:$0xff]  ;;  %v6878_v24 = vcombine.low %v1172_v8, %v1176_v9 }
 0x286   : > { %2785 = vmatprep.subr.bf16.mxu1 %v6927_v25  ;;  %2826 = vmatprep.subr.bf16.mxu0 %v7055_v26  ;;  %v7006_v25 = vcombine.low %v1300_v10, %v1304_v11  ;;  %v6873_v26 = vcombine.high %v1165_v20, %v1169_v21  ;;  %v7001_v28 = vcombine.high %v1293_v22, %v1297_v23  ;;  %v1117_v9 = vld [vmem:[#allocation11 + $0x50] sm:$0xff] }
 0x287   : > { %v1121_v10 = vld [vmem:[#allocation11 + $0x70] sm:$0xff] }
 0x288   : > { %v1245_v11 = vld [vmem:[#allocation11 + $0x450] sm:$0xff] }
 0x289   : > { %2786 = vmatpush2.bf16.msra.mxu1 %v6926_v34  ;;  %2827 = vmatpush2.bf16.msra.mxu0 %v7054_v35  ;;  %v1289_v34 = vld [vmem:[#allocation11 + $0x5b0] sm:$0xff]  ;;  %v6872_v35 = vcombine.low %v1165_v20, %v1169_v21 }
 0x28a   : > { %2787 = vmatprep.subr.bf16.mxu1 %v6919_v36  ;;  %2828 = vmatprep.subr.bf16.mxu0 %v7047_v37  ;;  %v7000_v36 = vcombine.low %v1293_v22, %v1297_v23  ;;  %v6865_v37 = vcombine.high %v1157_v31, %v1161_v32  ;;  %v6993_v38 = vcombine.high %v1285_v33, %v1289_v34  ;;  %v1109_v21 = vld [vmem:[#allocation11 + $0x10] sm:$0xff] }
 0x28b   : > { %v1113_v22 = vld [vmem:[#allocation11 + $0x30] sm:$0xff] }
 0x28c   : > { %v1237_v23 = vld [vmem:[#allocation11 + $0x410] sm:$0xff] }
 0x28d   : > { %2788 = vmatpush2.bf16.msra.mxu1 %v6918_v42  ;;  %2829 = vmatpush2.bf16.msra.mxu0 %v7046_v43  ;;  %v1281_v42 = vld [vmem:[#allocation11 + $0x570] sm:$0xff]  ;;  %v6864_v43 = vcombine.low %v1157_v31, %v1161_v32 }
 0x28e   : > { %2789 = vmatprep.subr.bf16.mxu1 %v6911_v44  ;;  %2830 = vmatprep.subr.bf16.mxu0 %v7039_v45  ;;  %v6992_v44 = vcombine.low %v1285_v33, %v1289_v34  ;;  %v6857_v45 = vcombine.high %v1149_v39, %v1153_v40  ;;  %v6985_v46 = vcombine.high %v1277_v41, %v1281_v42  ;;  %v1229_v32 = vld [vmem:[#allocation11 + $0x3d0] sm:$0xff] }
 0x28f   : > { %v1233_v33 = vld [vmem:[#allocation11 + $0x3f0] sm:$0xff] }
 0x290   : > { %v1357_v34 = vld [vmem:[#allocation11 + $0x7d0] sm:$0xff] }
 0x291   : > { %2790 = vmatpush2.bf16.msra.mxu1 %v6910_v52  ;;  %2831 = vmatpush2.bf16.msra.mxu0 %v7038_v53  ;;  %v1273_v52 = vld [vmem:[#allocation11 + $0x530] sm:$0xff]  ;;  %v6856_v53 = vcombine.low %v1149_v39, %v1153_v40 }
 0x292   : > { %2791 = vmatprep.subr.bf16.mxu1 %v6903_v54  ;;  %2832 = vmatprep.subr.bf16.mxu0 %v7031_v55  ;;  %v6984_v54 = vcombine.low %v1277_v41, %v1281_v42  ;;  %v6849_v55 = vcombine.high %v1141_v47, %v1145_v48  ;;  %v6977_v56 = vcombine.high %v1269_v50, %v1273_v52  ;;  %v1221_v40 = vld [vmem:[#allocation11 + $0x390] sm:$0xff] }
 0x293   : > { %v1225_v41 = vld [vmem:[#allocation11 + $0x3b0] sm:$0xff] }
 0x294   : > { %v1349_v42 = vld [vmem:[#allocation11 + $0x790] sm:$0xff] }
 0x295   : > { %2792 = vmatpush2.bf16.msra.mxu1 %v6902_v60  ;;  %2833 = vmatpush2.bf16.msra.mxu0 %v7030_v61  ;;  %v1265_v60 = vld [vmem:[#allocation11 + $0x4f0] sm:$0xff]  ;;  %v6848_v61 = vcombine.low %v1141_v47, %v1145_v48 }
 0x296   : > { %2793 = vmatprep.subr.bf16.mxu1 %v6895_v62  ;;  %2834 = vmatprep.subr.bf16.mxu0 %v7023_v63  ;;  %v6976_v62 = vcombine.low %v1269_v50, %v1273_v52  ;;  %v6841_v63 = vcombine.high %v1133_v57, %v1137_v58  ;;  %v6969_v0 = vcombine.high %v1261_v59, %v1265_v60  ;;  %v1213_v48 = vld [vmem:[#allocation11 + $0x350] sm:$0xff] }
 0x297   : > { %v1217_v50 = vld [vmem:[#allocation11 + $0x370] sm:$0xff] }
 0x298   : > { %v1341_v52 = vld [vmem:[#allocation11 + $0x750] sm:$0xff] }
 0x299   : > { %2794 = vmatpush2.bf16.msra.mxu1 %v6894_v4  ;;  %2835 = vmatpush2.bf16.msra.mxu0 %v7022_v5  ;;  %v1257_v4 = vld [vmem:[#allocation11 + $0x4b0] sm:$0xff]  ;;  %v6840_v5 = vcombine.low %v1133_v57, %v1137_v58 }
 0x29a   : > { %2795 = vmatprep.subr.bf16.mxu1 %v6887_v6  ;;  %2836 = vmatprep.subr.bf16.mxu0 %v7015_v7  ;;  %v6968_v6 = vcombine.low %v1261_v59, %v1265_v60  ;;  %v6833_v7 = vcombine.high %v1125_v1, %v1129_v2  ;;  %v6961_v8 = vcombine.high %v1253_v3, %v1257_v4  ;;  %v1205_v58 = vld [vmem:[#allocation11 + $0x310] sm:$0xff] }
 0x29b   : > { %v1209_v59 = vld [vmem:[#allocation11 + $0x330] sm:$0xff] }
 0x29c   : > { %v1333_v60 = vld [vmem:[#allocation11 + $0x710] sm:$0xff] }
 0x29d   : > { %2796 = vmatpush2.bf16.msra.mxu1 %v6886_v16  ;;  %2837 = vmatpush2.bf16.msra.mxu0 %v7014_v17  ;;  %v1249_v16 = vld [vmem:[#allocation11 + $0x470] sm:$0xff]  ;;  %v6832_v17 = vcombine.low %v1125_v1, %v1129_v2 }
 0x29e   : > { %2797 = vmatprep.subr.bf16.mxu1 %v6879_v18  ;;  %2838 = vmatprep.subr.bf16.mxu0 %v7007_v19  ;;  %v6960_v18 = vcombine.low %v1253_v3, %v1257_v4  ;;  %v6825_v19 = vcombine.high %v1117_v9, %v1121_v10  ;;  %v6953_v20 = vcombine.high %v1245_v11, %v1249_v16  ;;  %v1197_v2 = vld [vmem:[#allocation11 + $0x2d0] sm:$0xff] }
 0x29f   : > { %v1201_v3 = vld [vmem:[#allocation11 + $0x2f0] sm:$0xff] }
 0x2a0   : > { %v1325_v4 = vld [vmem:[#allocation11 + $0x6d0] sm:$0xff] }
 0x2a1   : > { %2798 = vmatpush2.bf16.msra.mxu1 %v6878_v24  ;;  %2839 = vmatpush2.bf16.msra.mxu0 %v7006_v25  ;;  %v1241_v24 = vld [vmem:[#allocation11 + $0x430] sm:$0xff]  ;;  %v6824_v25 = vcombine.low %v1117_v9, %v1121_v10 }
 0x2a2   : > { %2849 = vmatprep.subr.bf16.mxu1 %v6873_v26  ;;  %2890 = vmatprep.subr.bf16.mxu0 %v7001_v28  ;;  %v6952_v26 = vcombine.low %v1245_v11, %v1249_v16  ;;  %v6817_v28 = vcombine.high %v1109_v21, %v1113_v22  ;;  %v6945_v31 = vcombine.high %v1237_v23, %v1241_v24  ;;  %v1189_v10 = vld [vmem:[#allocation11 + $0x290] sm:$0xff] }
 0x2a3   : > { %v1193_v11 = vld [vmem:[#allocation11 + $0x2b0] sm:$0xff] }
 0x2a4   : > { %2800 = vmatmul.mubr.bf16.vlgmr.msra.gmra.mxu1 %v9134_v14  ;;  %2841 = vmatmul.mubr.bf16.vlgmr.msra.gmra.mxu0 %v9136_v15  ;;  %v1317_v16 = vld [vmem:[#allocation11 + $0x690] sm:$0xff] }
 0x2a5   : > { %2850 = vmatpush1.bf16.msra.mxu1 %v6872_v35  ;;  %2881 = vmatprep.mubr.bf16.mxu1 %v9130_v12  ;;  %v1361_v35 = vld [vmem:[#allocation11 + $0x7f0] sm:$0xff] }
 0x2a6   : > { %2891 = vmatpush1.bf16.msra.mxu0 %v7000_v36  ;;  %2922 = vmatprep.mubr.bf16.mxu0 %v9132_v13  ;;  %v6816_v36 = vcombine.low %v1109_v21, %v1113_v22  ;;  %v7065_v39 = vcombine.high %v1357_v34, %v1361_v35  ;;  %v1181_v22 = vld [vmem:[#allocation11 + $0x250] sm:$0xff] }
 0x2a7   : > { %2851 = vmatprep.subr.bf16.mxu1 %v6865_v37  ;;  %2892 = vmatprep.subr.bf16.mxu0 %v6993_v38  ;;  %v6944_v37 = vcombine.low %v1237_v23, %v1241_v24  ;;  %v6937_v38 = vcombine.high %v1229_v32, %v1233_v33  ;;  %v1185_v23 = vld [vmem:[#allocation11 + $0x270] sm:$0xff] }
 0x2a8   : > { %v1309_v24 = vld [vmem:[#allocation11 + $0x650] sm:$0xff] }
 0x2a9   : > { %2852 = vmatpush1.bf16.msra.mxu1 %v6864_v43  ;;  %v1353_v43 = vld [vmem:[#allocation11 + $0x7b0] sm:$0xff] }
 0x2aa   : > { %2893 = vmatpush1.bf16.msra.mxu0 %v6992_v44  ;;  %2853 = vmatprep.subr.bf16.mxu1 %v6857_v45  ;;  %v6936_v44 = vcombine.low %v1229_v32, %v1233_v33  ;;  %v7064_v45 = vcombine.low %v1357_v34, %v1361_v35  ;;  %v7057_v47 = vcombine.high %v1349_v42, %v1353_v43  ;;  %v1173_v33 = vld [vmem:[#allocation11 + $0x210] sm:$0xff] }
 0x2ab   : > { %2894 = vmatprep.subr.bf16.mxu0 %v6985_v46  ;;  %v6929_v46 = vcombine.high %v1221_v40, %v1225_v41  ;;  %v1177_v34 = vld [vmem:[#allocation11 + $0x230] sm:$0xff] }
 0x2ac   : > { %v1301_v35 = vld [vmem:[#allocation11 + $0x610] sm:$0xff] }
 0x2ad   : > { %2854 = vmatpush1.bf16.msra.mxu1 %v6856_v53  ;;  %v1345_v53 = vld [vmem:[#allocation11 + $0x770] sm:$0xff] }
 0x2ae   : > { %2895 = vmatpush1.bf16.msra.mxu0 %v6984_v54  ;;  %2855 = vmatprep.subr.bf16.mxu1 %v6849_v55  ;;  %v6928_v54 = vcombine.low %v1221_v40, %v1225_v41  ;;  %v7056_v55 = vcombine.low %v1349_v42, %v1353_v43  ;;  %v7049_v57 = vcombine.high %v1341_v52, %v1345_v53  ;;  %v1166_v41 = vld [vmem:[#allocation11 + $0x1d8] sm:$0xff] }
 0x2af   : > { %2896 = vmatprep.subr.bf16.mxu0 %v6977_v56  ;;  %v6921_v56 = vcombine.high %v1213_v48, %v1217_v50  ;;  %v1170_v42 = vld [vmem:[#allocation11 + $0x1f8] sm:$0xff] }
 0x2b0   : > { %v1294_v43 = vld [vmem:[#allocation11 + $0x5d8] sm:$0xff] }
 0x2b1   : > { %2856 = vmatpush1.bf16.msra.mxu1 %v6848_v61  ;;  %v1337_v61 = vld [vmem:[#allocation11 + $0x730] sm:$0xff] }
 0x2b2   : > { %2897 = vmatpush1.bf16.msra.mxu0 %v6976_v62  ;;  %2857 = vmatprep.subr.bf16.mxu1 %v6841_v63  ;;  %v6920_v62 = vcombine.low %v1213_v48, %v1217_v50  ;;  %v7048_v63 = vcombine.low %v1341_v52, %v1345_v53  ;;  %v7041_v1 = vcombine.high %v1333_v60, %v1337_v61  ;;  %v1158_v50 = vld [vmem:[#allocation11 + $0x198] sm:$0xff] }
 0x2b3   : > { %2898 = vmatprep.subr.bf16.mxu0 %v6969_v0  ;;  %v6913_v0 = vcombine.high %v1205_v58, %v1209_v59  ;;  %v1162_v52 = vld [vmem:[#allocation11 + $0x1b8] sm:$0xff]  ;;  %v6874_v53 = vcombine.low %v1166_v41, %v1170_v42 }
 0x2b5   : > { %2858 = vmatpush1.bf16.msra.mxu1 %v6840_v5  ;;  %v1329_v5 = vld [vmem:[#allocation11 + $0x6f0] sm:$0xff] }
 0x2b6   : > { %2899 = vmatpush1.bf16.msra.mxu0 %v6968_v6  ;;  %2859 = vmatprep.subr.bf16.mxu1 %v6833_v7  ;;  %v6912_v6 = vcombine.low %v1205_v58, %v1209_v59  ;;  %v7040_v7 = vcombine.low %v1333_v60, %v1337_v61  ;;  %v7033_v9 = vcombine.high %v1325_v4, %v1329_v5  ;;  %v1150_v58 = vld [vmem:[#allocation11 + $0x158] sm:$0xff] }
 0x2b7   : > { %2900 = vmatprep.subr.bf16.mxu0 %v6961_v8  ;;  %v6905_v8 = vcombine.high %v1197_v2, %v1201_v3  ;;  %v1154_v59 = vld [vmem:[#allocation11 + $0x178] sm:$0xff] }
 0x2b8   : > { %v1278_v61 = vld [vmem:[#allocation11 + $0x558] sm:$0xff] }
 0x2b9   : > { %2860 = vmatpush1.bf16.msra.mxu1 %v6832_v17  ;;  %v1321_v17 = vld [vmem:[#allocation11 + $0x6b0] sm:$0xff] }
 0x2ba   : > { %2901 = vmatpush1.bf16.msra.mxu0 %v6960_v18  ;;  %2861 = vmatprep.subr.bf16.mxu1 %v6825_v19  ;;  %v6904_v18 = vcombine.low %v1197_v2, %v1201_v3  ;;  %v7032_v19 = vcombine.low %v1325_v4, %v1329_v5  ;;  %v7025_v21 = vcombine.high %v1317_v16, %v1321_v17  ;;  %v1142_v3 = vld [vmem:[#allocation11 + $0x118] sm:$0xff] }
 0x2bb   : > { %2902 = vmatprep.subr.bf16.mxu0 %v6953_v20  ;;  %v6897_v20 = vcombine.high %v1189_v10, %v1193_v11  ;;  %v1146_v4 = vld [vmem:[#allocation11 + $0x138] sm:$0xff] }
 0x2bc   : > { %v1270_v5 = vld [vmem:[#allocation11 + $0x518] sm:$0xff] }
 0x2bd   : > { %2862 = vmatpush1.bf16.msra.mxu1 %v6824_v25  ;;  %v1313_v25 = vld [vmem:[#allocation11 + $0x670] sm:$0xff] }
 0x2be   : > { %2903 = vmatpush1.bf16.msra.mxu0 %v6952_v26  ;;  %2863 = vmatprep.subr.bf16.mxu1 %v6817_v28  ;;  %v6896_v26 = vcombine.low %v1189_v10, %v1193_v11  ;;  %v7024_v28 = vcombine.low %v1317_v16, %v1321_v17  ;;  %v7017_v32 = vcombine.high %v1309_v24, %v1313_v25  ;;  %v1134_v10 = vld [vmem:[#allocation11 + $0xd8] sm:$0xff] }
 0x2bf   : > { %2904 = vmatprep.subr.bf16.mxu0 %v6945_v31  ;;  %v6889_v31 = vcombine.high %v1181_v22, %v1185_v23  ;;  %v1138_v11 = vld [vmem:[#allocation11 + $0xf8] sm:$0xff] }
 0x2c0   : > { %v1262_v16 = vld [vmem:[#allocation11 + $0x4d8] sm:$0xff] }
 0x2c1   : > { %2864 = vmatpush1.bf16.msra.mxu1 %v6816_v36  ;;  %v1305_v36 = vld [vmem:[#allocation11 + $0x630] sm:$0xff]  ;;  %v1266_v17 = vld [vmem:[#allocation11 + $0x4f8] sm:$0xff] }
 0x2c2   : > { %2905 = vmatpush1.bf16.msra.mxu0 %v6944_v37  ;;  %2865 = vmatprep.subr.bf16.mxu1 %v6937_v38  ;;  %v6888_v37 = vcombine.low %v1181_v22, %v1185_v23  ;;  %v7016_v38 = vcombine.low %v1309_v24, %v1313_v25  ;;  %v7009_v40 = vcombine.high %v1301_v35, %v1305_v36  ;;  %v1130_v22 = vld [vmem:[#allocation11 + $0xb8] sm:$0xff] }
 0x2c3   : > { %2906 = vmatprep.subr.bf16.mxu0 %v7065_v39  ;;  %v6881_v39 = vcombine.high %v1173_v33, %v1177_v34  ;;  %v1254_v23 = vld [vmem:[#allocation11 + $0x498] sm:$0xff]  ;;  %v6842_v25 = vcombine.low %v1134_v10, %v1138_v11 }
 0x2c4   : > { %v1258_v24 = vld [vmem:[#allocation11 + $0x4b8] sm:$0xff] }
 0x2c5   : > { %2866 = vmatpush2.bf16.msra.mxu1 %v6936_v44  ;;  %v1298_v44 = vld [vmem:[#allocation11 + $0x5f8] sm:$0xff] }
 0x2c6   : > { %2907 = vmatpush2.bf16.msra.mxu0 %v7064_v45  ;;  %2867 = vmatprep.subr.bf16.mxu1 %v6929_v46  ;;  %v6880_v45 = vcombine.low %v1173_v33, %v1177_v34  ;;  %v7008_v46 = vcombine.low %v1301_v35, %v1305_v36  ;;  %v7003_v48 = vcombine.high %v1294_v43, %v1298_v44  ;;  %v1122_v33 = vld [vmem:[#allocation11 + $0x78] sm:$0xff] }
 0x2c7   : > { %2908 = vmatprep.subr.bf16.mxu0 %v7057_v47  ;;  %v6875_v47 = vcombine.high %v1166_v41, %v1170_v42  ;;  %v1246_v34 = vld [vmem:[#allocation11 + $0x458] sm:$0xff] }
 0x2c8   : > { %v1250_v35 = vld [vmem:[#allocation11 + $0x478] sm:$0xff] }
 0x2c9   : > { %2868 = vmatpush2.bf16.msra.mxu1 %v6928_v54  ;;  %v1286_v54 = vld [vmem:[#allocation11 + $0x598] sm:$0xff] }
 0x2ca   : > { %2909 = vmatpush2.bf16.msra.mxu0 %v7056_v55  ;;  %2869 = vmatprep.subr.bf16.mxu1 %v6921_v56  ;;  %v1290_v55 = vld [vmem:[#allocation11 + $0x5b8] sm:$0xff]  ;;  %v7002_v56 = vcombine.low %v1294_v43, %v1298_v44 }
 0x2cb   : > { %2910 = vmatprep.subr.bf16.mxu0 %v7049_v57  ;;  %v6867_v57 = vcombine.high %v1158_v50, %v1162_v52  ;;  %v6995_v60 = vcombine.high %v1286_v54, %v1290_v55  ;;  %v1114_v41 = vld [vmem:[#allocation11 + $0x38] sm:$0xff] }
 0x2cc   : > { %v1238_v42 = vld [vmem:[#allocation11 + $0x418] sm:$0xff] }
 0x2cd   : > { %2870 = vmatpush2.bf16.msra.mxu1 %v6920_v62  ;;  %v1282_v62 = vld [vmem:[#allocation11 + $0x578] sm:$0xff] }
 0x2ce   : > { %2911 = vmatpush2.bf16.msra.mxu0 %v7048_v63  ;;  %2871 = vmatprep.subr.bf16.mxu1 %v6913_v0  ;;  %v6866_v63 = vcombine.low %v1158_v50, %v1162_v52  ;;  %v6994_v0 = vcombine.low %v1286_v54, %v1290_v55  ;;  %v6987_v2 = vcombine.high %v1278_v61, %v1282_v62  ;;  %v1242_v43 = vld [vmem:[#allocation11 + $0x438] sm:$0xff] }
 0x2cf   : > { %2912 = vmatprep.subr.bf16.mxu0 %v7041_v1  ;;  %v6859_v1 = vcombine.high %v1150_v58, %v1154_v59  ;;  %v1234_v50 = vld [vmem:[#allocation11 + $0x3f8] sm:$0xff]  ;;  %v6946_v55 = vcombine.low %v1238_v42, %v1242_v43 }
 0x2d0   : > { %v1358_v52 = vld [vmem:[#allocation11 + $0x7d8] sm:$0xff] }
 0x2d1   : > { %2872 = vmatpush2.bf16.msra.mxu1 %v6912_v6  ;;  %v1274_v6 = vld [vmem:[#allocation11 + $0x538] sm:$0xff] }
 0x2d2   : > { %2913 = vmatpush2.bf16.msra.mxu0 %v7040_v7  ;;  %2873 = vmatprep.subr.bf16.mxu1 %v6905_v8  ;;  %v6858_v7 = vcombine.low %v1150_v58, %v1154_v59  ;;  %v6986_v8 = vcombine.low %v1278_v61, %v1282_v62  ;;  %v1222_v58 = vld [vmem:[#allocation11 + $0x398] sm:$0xff] }
 0x2d3   : > { %2914 = vmatprep.subr.bf16.mxu0 %v7033_v9  ;;  %v6851_v9 = vcombine.high %v1142_v3, %v1146_v4  ;;  %v1226_v59 = vld [vmem:[#allocation11 + $0x3b8] sm:$0xff] }
 0x2d4   : > { %v1354_v61 = vld [vmem:[#allocation11 + $0x7b8] sm:$0xff] }
 0x2d5   : > { %2874 = vmatpush2.bf16.msra.mxu1 %v6904_v18  ;;  %v6978_v18 = vcombine.low %v1270_v5, %v1274_v6 }
 0x2d6   : > { %2915 = vmatpush2.bf16.msra.mxu0 %v7032_v19  ;;  %2875 = vmatprep.subr.bf16.mxu1 %v6897_v20  ;;  %v6843_v19 = vcombine.high %v1134_v10, %v1138_v11  ;;  %v6971_v20 = vcombine.high %v1262_v16, %v1266_v17  ;;  %v1210_v10 = vld [vmem:[#allocation11 + $0x338] sm:$0xff] }
 0x2d7   : > { %2916 = vmatprep.subr.bf16.mxu0 %v7025_v21  ;;  %v1126_v21 = vld [vmem:[#allocation11 + $0x98] sm:$0xff] }
 0x2d8   : > { %v6834_v36 = vcombine.low %v1126_v21, %v1130_v22  ;;  %v1334_v11 = vld [vmem:[#allocation11 + $0x718] sm:$0xff] }
 0x2d9   : > { %2876 = vmatpush2.bf16.msra.mxu1 %v6896_v26  ;;  %v6970_v26 = vcombine.low %v1262_v16, %v1266_v17  ;;  %v1338_v16 = vld [vmem:[#allocation11 + $0x738] sm:$0xff] }
 0x2da   : > { %2917 = vmatpush2.bf16.msra.mxu0 %v7024_v28  ;;  %2877 = vmatprep.subr.bf16.mxu1 %v6889_v31  ;;  %v6835_v28 = vcombine.high %v1126_v21, %v1130_v22  ;;  %v6963_v31 = vcombine.high %v1254_v23, %v1258_v24  ;;  %v1202_v21 = vld [vmem:[#allocation11 + $0x2f8] sm:$0xff] }
 0x2db   : > { %2918 = vmatprep.subr.bf16.mxu0 %v7017_v32  ;;  %v1118_v32 = vld [vmem:[#allocation11 + $0x58] sm:$0xff] }
 0x2dc   : > { %v6826_v44 = vcombine.low %v1118_v32, %v1122_v33  ;;  %v1326_v22 = vld [vmem:[#allocation11 + $0x6d8] sm:$0xff] }
 0x2dd   : > { %2878 = vmatpush2.bf16.msra.mxu1 %v6888_v37  ;;  %v6962_v37 = vcombine.low %v1254_v23, %v1258_v24  ;;  %v1330_v23 = vld [vmem:[#allocation11 + $0x6f8] sm:$0xff] }
 0x2de   : > { %2919 = vmatpush2.bf16.msra.mxu0 %v7016_v38  ;;  %2879 = vmatprep.subr.bf16.mxu1 %v6881_v39  ;;  %v6827_v38 = vcombine.high %v1118_v32, %v1122_v33  ;;  %v6955_v39 = vcombine.high %v1246_v34, %v1250_v35  ;;  %v1194_v32 = vld [vmem:[#allocation11 + $0x2b8] sm:$0xff] }
 0x2df   : > { %2920 = vmatprep.subr.bf16.mxu0 %v7009_v40  ;;  %v1110_v40 = vld [vmem:[#allocation11 + $0x18] sm:$0xff] }
 0x2e0   : > { %v6818_v54 = vcombine.low %v1110_v40, %v1114_v41  ;;  %v1318_v33 = vld [vmem:[#allocation11 + $0x698] sm:$0xff] }
 0x2e1   : > { %2880 = vmatpush2.bf16.msra.mxu1 %v6880_v45  ;;  %v6954_v45 = vcombine.low %v1246_v34, %v1250_v35  ;;  %v1322_v34 = vld [vmem:[#allocation11 + $0x6b8] sm:$0xff] }
 0x2e2   : > { %2921 = vmatpush2.bf16.msra.mxu0 %v7008_v46  ;;  %2931 = vmatprep.subr.bf16.mxu1 %v6875_v47  ;;  %v6819_v46 = vcombine.high %v1110_v40, %v1114_v41  ;;  %v6947_v47 = vcombine.high %v1238_v42, %v1242_v43  ;;  %v1186_v40 = vld [vmem:[#allocation11 + $0x278] sm:$0xff] }
 0x2e3   : > { %2972 = vmatprep.subr.bf16.mxu0 %v7003_v48  ;;  %v1230_v48 = vld [vmem:[#allocation11 + $0x3d8] sm:$0xff] }
 0x2e4   : > { %2882 = vmatmul.mubr.bf16.vlgmr.msra.gmra.mxu1 %v9134_v14  ;;  %v6938_v62 = vcombine.low %v1230_v48, %v1234_v50  ;;  %v1310_v41 = vld [vmem:[#allocation11 + $0x658] sm:$0xff] }
 0x2e5   : > { %2923 = vmatmul.mubr.bf16.vlgmr.msra.gmra.mxu0 %v9136_v15  ;;  %2932 = vmatpush1.bf16.msra.mxu1 %v6874_v53  ;;  %v1362_v53 = vld [vmem:[#allocation11 + $0x7f8] sm:$0xff] }
 0x2e6   : > { %2963 = vmatprep.mubr.bf16.mxu1 %v9130_v12  ;;  %2973 = vmatpush1.bf16.msra.mxu0 %v7002_v56  ;;  %v6979_v12 = vcombine.high %v1270_v5, %v1274_v6  ;;  %v6939_v56 = vcombine.high %v1230_v48, %v1234_v50  ;;  %v1346_v5 = vld [vmem:[#allocation11 + $0x778] sm:$0xff]  ;;  %v6930_v6 = vcombine.low %v1222_v58, %v1226_v59 }
 0x2e7   : > { %3004 = vmatprep.mubr.bf16.mxu0 %v9132_v13  ;;  %2933 = vmatprep.subr.bf16.mxu1 %v6867_v57  ;;  %v6850_v13 = vcombine.low %v1142_v3, %v1146_v4  ;;  %v7067_v57 = vcombine.high %v1358_v52, %v1362_v53  ;;  %v1218_v3 = vld [vmem:[#allocation11 + $0x378] sm:$0xff] }
 0x2e8   : > { %2974 = vmatprep.subr.bf16.mxu0 %v6995_v60  ;;  %v1350_v60 = vld [vmem:[#allocation11 + $0x798] sm:$0xff] }
 0x2e9   : > { %2934 = vmatpush1.bf16.msra.mxu1 %v6866_v63  ;;  %v7066_v63 = vcombine.low %v1358_v52, %v1362_v53  ;;  %v1342_v4 = vld [vmem:[#allocation11 + $0x758] sm:$0xff] }
 0x2ea   : > { %2975 = vmatpush1.bf16.msra.mxu0 %v6994_v0  ;;  %2935 = vmatprep.subr.bf16.mxu1 %v6859_v1  ;;  %v6931_v0 = vcombine.high %v1222_v58, %v1226_v59  ;;  %v7059_v1 = vcombine.high %v1350_v60, %v1354_v61  ;;  %v1314_v42 = vld [vmem:[#allocation11 + $0x678] sm:$0xff]  ;;  %v7867_v59 = vld [vmem:[#allocation14 + $0x18c] ss:$28 sps:$4 sm:$0xff]  }
 0x2eb   : > { %2976 = vmatprep.subr.bf16.mxu0 %v6987_v2  ;;  %v1214_v2 = vld [vmem:[#allocation11 + $0x358] sm:$0xff] }
 0x2ec   : > { %v6922_v17 = vcombine.low %v1214_v2, %v1218_v3  ;;  %v1178_v48 = vld [vmem:[#allocation11 + $0x238] sm:$0xff] }
 0x2ed   : > { %2936 = vmatpush1.bf16.msra.mxu1 %v6858_v7  ;;  %v7058_v7 = vcombine.low %v1350_v60, %v1354_v61  ;;  %v1302_v50 = vld [vmem:[#allocation11 + $0x618] sm:$0xff]  ;;  %v7879_v60 = vld [vmem:[#allocation14 + $0x50c] ss:$28 sps:$4 sm:$0xff]  }
 0x2ee   : > { %2977 = vmatpush1.bf16.msra.mxu0 %v6986_v8  ;;  %2937 = vmatprep.subr.bf16.mxu1 %v6851_v9  ;;  %v6923_v8 = vcombine.high %v1214_v2, %v1218_v3  ;;  %v7051_v9 = vcombine.high %v1342_v4, %v1346_v5  ;;  %v1306_v52 = vld [vmem:[#allocation11 + $0x638] sm:$0xff]  ;;  %v7865_v61 = vld [vmem:[#allocation14 + $0x188] ss:$28 sps:$4 sm:$0xff]  }
 0x2ef   : > { %2978 = vmatprep.subr.bf16.mxu0 %v6979_v12  ;;  %v1206_v12 = vld [vmem:[#allocation11 + $0x318] sm:$0xff]  ;;  %v7010_v58 = vcombine.low %v1302_v50, %v1306_v52 }
 0x2f0   : > { %v6914_v24 = vcombine.low %v1206_v12, %v1210_v10  ;;  %v7885_v2 = vld [vmem:[#allocation14 + $0x4d4] ss:$28 sps:$4 sm:$0xff]  }
 0x2f1   : > { %2938 = vmatpush1.bf16.msra.mxu1 %v6850_v13  ;;  %v7050_v13 = vcombine.low %v1342_v4, %v1346_v5  ;;  %v7868_v5 = vld [vmem:[#allocation14 + $0x150] ss:$28 sps:$4 sm:$0xff]  }
 0x2f2   : > { %2979 = vmatpush1.bf16.msra.mxu0 %v6978_v18  ;;  %2939 = vmatprep.subr.bf16.mxu1 %v6843_v19  ;;  %v6915_v18 = vcombine.high %v1206_v12, %v1210_v10  ;;  %v7043_v19 = vcombine.high %v1334_v11, %v1338_v16  ;;  %v7891_v10 = vld [vmem:[#allocation14 + $0x49c] ss:$28 sps:$4 sm:$0xff]  }
 0x2f3   : > { %2980 = vmatprep.subr.bf16.mxu0 %v6971_v20  ;;  %v1198_v20 = vld [vmem:[#allocation11 + $0x2d8] sm:$0xff] }
 0x2f4   : > { %v6906_v35 = vcombine.low %v1198_v20, %v1202_v21 }
 0x2f5   : > { %2940 = vmatpush1.bf16.msra.mxu1 %v6842_v25  ;;  %v7042_v25 = vcombine.low %v1334_v11, %v1338_v16 }
 0x2f6   : > { %2981 = vmatpush1.bf16.msra.mxu0 %v6970_v26  ;;  %2941 = vmatprep.subr.bf16.mxu1 %v6835_v28  ;;  %v6907_v26 = vcombine.high %v1198_v20, %v1202_v21  ;;  %v7035_v28 = vcombine.high %v1326_v22, %v1330_v23  ;;  %v7897_v21 = vld [vmem:[#allocation14 + $0x464] ss:$28 sps:$4 sm:$0xff]  }
 0x2f7   : > { %2982 = vmatprep.subr.bf16.mxu0 %v6963_v31  ;;  %v1190_v31 = vld [vmem:[#allocation11 + $0x298] sm:$0xff] }
 0x2f8   : > { %v6898_v43 = vcombine.low %v1190_v31, %v1194_v32 }
 0x2f9   : > { %2942 = vmatpush1.bf16.msra.mxu1 %v6834_v36  ;;  %v7034_v36 = vcombine.low %v1326_v22, %v1330_v23  ;;  %v7874_v23 = vld [vmem:[#allocation14 + $0xe0] ss:$28 sps:$4 sm:$0xff]  }
 0x2fa   : > { %2983 = vmatpush1.bf16.msra.mxu0 %v6962_v37  ;;  %2943 = vmatprep.subr.bf16.mxu1 %v6827_v38  ;;  %v6899_v37 = vcombine.high %v1190_v31, %v1194_v32  ;;  %v7027_v38 = vcombine.high %v1318_v33, %v1322_v34  ;;  %v7888_v31 = vld [vmem:[#allocation14 + $0x74] ss:$28 sps:$4 sm:$0xff]   ;;  %v7901_v32 = vld [vmem:[#allocation14 + $0x428] ss:$28 sps:$4 sm:$0xff]  }
 0x2fb   : > { %2984 = vmatprep.subr.bf16.mxu0 %v6955_v39  ;;  %v1182_v39 = vld [vmem:[#allocation11 + $0x258] sm:$0xff] }
 0x2fc   : > { %v6890_v53 = vcombine.low %v1182_v39, %v1186_v40 }
 0x2fd   : > { %2944 = vmatpush1.bf16.msra.mxu1 %v6826_v44  ;;  %v7026_v44 = vcombine.low %v1318_v33, %v1322_v34  ;;  %v7909_v33 = vld [vmem:[#allocation14 + $0x3f4] ss:$28 sps:$4 sm:$0xff]  }
 0x2fe   : > { %2985 = vmatpush1.bf16.msra.mxu0 %v6954_v45  ;;  %2945 = vmatprep.subr.bf16.mxu1 %v6819_v46  ;;  %v6891_v45 = vcombine.high %v1182_v39, %v1186_v40  ;;  %v7019_v46 = vcombine.high %v1310_v41, %v1314_v42  ;;  %v7886_v34 = vld [vmem:[#allocation14 + $0x70] ss:$28 sps:$4 sm:$0xff]   ;;  %v7900_v39 = vld [vmem:[#allocation14 + $0x4] ss:$28 sps:$4 sm:$0xff]   ;;  %v7913_v40 = vld [vmem:[#allocation14 + $0x3b8] ss:$28 sps:$4 sm:$0xff]  }
 0x2ff   : > { %2986 = vmatprep.subr.bf16.mxu0 %v6947_v47  ;;  %v1174_v47 = vld [vmem:[#allocation11 + $0x218] sm:$0xff] }
 0x301   : > { %2946 = vmatpush1.bf16.msra.mxu1 %v6818_v54  ;;  %v7018_v54 = vcombine.low %v1310_v41, %v1314_v42  ;;  %v7921_v41 = vld [vmem:[#allocation14 + $0x384] ss:$28 sps:$4 sm:$0xff]  }
 0x302   : > { %2987 = vmatpush1.bf16.msra.mxu0 %v6946_v55  ;;  %2947 = vmatprep.subr.bf16.mxu1 %v6939_v56  ;;  %v6883_v55 = vcombine.high %v1174_v47, %v1178_v48  ;;  %v7011_v56 = vcombine.high %v1302_v50, %v1306_v52  ;;  %v7898_v42 = vld [vmem:[#allocation14] ss:$28 sps:$4 sm:$0xff]   ;;  %v7933_v50 = vld [vmem:[#allocation14 + $0x694] ss:$28 sps:$4 sm:$0xff]  }
 0x303   : > { %2988 = vmatprep.subr.bf16.mxu0 %v7067_v57  ;;  %v6882_v57 = vcombine.low %v1174_v47, %v1178_v48  ;;  %v7912_v47 = vld [vmem:[#allocation14 + $0x314] ss:$28 sps:$4 sm:$0xff]   ;;  %v7925_v48 = vld [vmem:[#allocation14 + $0x6c8] ss:$28 sps:$4 sm:$0xff]  }
 0x304   : > { %v7910_v52 = vld [vmem:[#allocation14 + $0x310] ss:$28 sps:$4 sm:$0xff]  }
 0x305   : > { %2948 = vmatpush2.bf16.msra.mxu1 %v6938_v62  ;;  %v9152_v62 = vld [vmem:[#allocation13] sm:$0xff] }
 0x306   : > { %2989 = vmatpush2.bf16.msra.mxu0 %v7066_v63  ;;  %2949 = vmatprep.subr.bf16.mxu1 %v6931_v0  ;;  %v7870_v63 = vld [vmem:[#allocation14 + $0x154] ss:$28 sps:$4 sm:$0xff]   ;;  %v7877_v0 = vld [vmem:[#allocation14 + $0x508] ss:$28 sps:$4 sm:$0xff]  }
 0x307   : > { %2990 = vmatprep.subr.bf16.mxu0 %v7059_v1  ;;  %v1372_v1 = vrot.slane %v9152_v62, %v9116_v30 }
 0x309   : > { %2950 = vmatpush2.bf16.msra.mxu1 %v6930_v6 }
 0x30a   : > { %2991 = vmatpush2.bf16.msra.mxu0 %v7058_v7  ;;  %2951 = vmatprep.subr.bf16.mxu1 %v6923_v8  ;;  %v7873_v8 = vld [vmem:[#allocation14 + $0x11c] ss:$28 sps:$4 sm:$0xff]  }
 0x30b   : > { %2992 = vmatprep.subr.bf16.mxu0 %v7051_v9  ;;  %v7883_v9 = vld [vmem:[#allocation14 + $0x4d0] ss:$28 sps:$4 sm:$0xff]  }
 0x30d   : > { %2952 = vmatpush2.bf16.msra.mxu1 %v6922_v17  ;;  %v7871_v17 = vld [vmem:[#allocation14 + $0x118] ss:$28 sps:$4 sm:$0xff]  }
 0x30e   : > { %2993 = vmatpush2.bf16.msra.mxu0 %v7050_v13  ;;  %2953 = vmatprep.subr.bf16.mxu1 %v6915_v18 }
 0x30f   : > { %2994 = vmatprep.subr.bf16.mxu0 %v7043_v19  ;;  %v7889_v19 = vld [vmem:[#allocation14 + $0x498] ss:$28 sps:$4 sm:$0xff]  }
 0x311   : > { %2954 = vmatpush2.bf16.msra.mxu1 %v6914_v24  ;;  %v7882_v24 = vld [vmem:[#allocation14 + $0xac] ss:$28 sps:$4 sm:$0xff]  }
 0x312   : > { %2995 = vmatpush2.bf16.msra.mxu0 %v7042_v25  ;;  %2955 = vmatprep.subr.bf16.mxu1 %v6907_v26  ;;  %v7895_v25 = vld [vmem:[#allocation14 + $0x460] ss:$28 sps:$4 sm:$0xff]   ;;  %v7903_v26 = vld [vmem:[#allocation14 + $0x42c] ss:$28 sps:$4 sm:$0xff]  }
 0x313   : > { %2996 = vmatprep.subr.bf16.mxu0 %v7035_v28  ;;  %v7880_v28 = vld [vmem:[#allocation14 + $0xa8] ss:$28 sps:$4 sm:$0xff]  }
 0x315   : > { %2956 = vmatpush2.bf16.msra.mxu1 %v6906_v35  ;;  %v7894_v35 = vld [vmem:[#allocation14 + $0x3c] ss:$28 sps:$4 sm:$0xff]  }
 0x316   : > { %2997 = vmatpush2.bf16.msra.mxu0 %v7034_v36  ;;  %2957 = vmatprep.subr.bf16.mxu1 %v6899_v37  ;;  %v7907_v36 = vld [vmem:[#allocation14 + $0x3f0] ss:$28 sps:$4 sm:$0xff]   ;;  %v7915_v37 = vld [vmem:[#allocation14 + $0x3bc] ss:$28 sps:$4 sm:$0xff]  }
 0x317   : > { %2998 = vmatprep.subr.bf16.mxu0 %v7027_v38  ;;  %v7892_v38 = vld [vmem:[#allocation14 + $0x38] ss:$28 sps:$4 sm:$0xff]  }
 0x319   : > { %2958 = vmatpush2.bf16.msra.mxu1 %v6898_v43  ;;  %v7906_v43 = vld [vmem:[#allocation14 + $0x34c] ss:$28 sps:$4 sm:$0xff]  }
 0x31a   : > { %2999 = vmatpush2.bf16.msra.mxu0 %v7026_v44  ;;  %2959 = vmatprep.subr.bf16.mxu1 %v6891_v45  ;;  %v7919_v44 = vld [vmem:[#allocation14 + $0x380] ss:$28 sps:$4 sm:$0xff]   ;;  %v7927_v45 = vld [vmem:[#allocation14 + $0x6cc] ss:$28 sps:$4 sm:$0xff]  }
 0x31b   : > { %3000 = vmatprep.subr.bf16.mxu0 %v7019_v46  ;;  %v7904_v46 = vld [vmem:[#allocation14 + $0x348] ss:$28 sps:$4 sm:$0xff]  }
 0x31d   : > { %2960 = vmatpush2.bf16.msra.mxu1 %v6890_v53  ;;  %v7918_v53 = vld [vmem:[#allocation14 + $0x2dc] ss:$28 sps:$4 sm:$0xff]  }
 0x31e   : > { %3001 = vmatpush2.bf16.msra.mxu0 %v7018_v54  ;;  %2961 = vmatprep.subr.bf16.mxu1 %v6883_v55  ;;  %v7931_v54 = vld [vmem:[#allocation14 + $0x690] ss:$28 sps:$4 sm:$0xff]   ;;  %v7939_v55 = vld [vmem:[#allocation14 + $0x65c] ss:$28 sps:$4 sm:$0xff]  }
 0x31f   : > { %3002 = vmatprep.subr.bf16.mxu0 %v7011_v56  ;;  %v7916_v56 = vld [vmem:[#allocation14 + $0x2d8] ss:$28 sps:$4 sm:$0xff]  }
 0x321   : > { %2962 = vmatpush2.bf16.msra.mxu1 %v6882_v57  ;;  %v7924_v57 = vld [vmem:[#allocation14 + $0x2a4] ss:$28 sps:$4 sm:$0xff]  }
 0x322   : > { %3003 = vmatpush2.bf16.msra.mxu0 %v7010_v58  ;;  %5882 = vmatprep.subr.bf16.mxu1 %v7867_v59  ;;  %v7937_v58 = vld [vmem:[#allocation14 + $0x658] ss:$28 sps:$4 sm:$0xff]   ;;  %v7945_v59 = vld [vmem:[#allocation14 + $0x624] ss:$28 sps:$4 sm:$0xff]  }
 0x323   : > { %5923 = vmatprep.subr.bf16.mxu0 %v7879_v60  ;;  %v7922_v60 = vld [vmem:[#allocation14 + $0x2a0] ss:$28 sps:$4 sm:$0xff]  }
 0x324   : > { %2964 = vmatmul.mubr.bf16.vlgmr.msra.gmra.mxu1 %v9134_v14  ;;  %v9157_v3 = vpop.f32.mrf.mxu1  ;;  %v9159_v4 = vpop.f32.mrf.mxu0 }
 0x325   : > { %3005 = vmatmul.mubr.bf16.vlgmr.msra.gmra.mxu0 %v9136_v15  ;;  %5883 = vmatpush1.bf16.msra.mxu1 %v7865_v61  ;;  %v7876_v15 = vld [vmem:[#allocation14 + $0xe4] ss:$28 sps:$4 sm:$0xff]   ;;  %v7930_v61 = vld [vmem:[#allocation14 + $0x26c] ss:$28 sps:$4 sm:$0xff]  }
 0x326   : > { %v2721_v6 = vpop.f32.mrf.mxu1  ;;  %v2762_v7 = vpop.f32.mrf.mxu0  ;;  %5884 = vmatprep.subr.bf16.mxu1 %v7870_v63  ;;  %5924 = vmatpush1.bf16.msra.mxu0 %v7877_v0  ;;  %v7943_v63 = vld [vmem:[#allocation14 + $0x620] ss:$28 sps:$4 sm:$0xff]   ;;  %v7951_v0 = vld [vmem:[#allocation14 + $0x5ec] ss:$28 sps:$4 sm:$0xff]  }
 0x327   : > { %v2722_v12 = vadd.f32 %v2721_v6, %v1372_v1  ;;  %5925 = vmatprep.subr.bf16.mxu0 %v7885_v2  ;;  %v7928_v1 = vld [vmem:[#allocation14 + $0x268] ss:$28 sps:$4 sm:$0xff]   ;;  %v1368_v2 = vrot.slane %v9152_v62, %v9113_v29 }
 0x328   : > { %v2723_v11 = vpop.f32.mrf.mxu1  ;;  %v2764_v16 = vpop.f32.mrf.mxu0  ;;  %v7949_v6 = vld [vmem:[#allocation14 + $0x5e8] ss:$28 sps:$4 sm:$0xff]  }
 0x329   : > { %v2763_v14 = vadd.f32 %v2762_v7, %v2722_v12  ;;  %5885 = vmatpush1.bf16.msra.mxu1 %v7868_v5  ;;  %v7936_v5 = vld [vmem:[#allocation14 + $0x234] ss:$28 sps:$4 sm:$0xff]   ;;  %v7942_v12 = vld [vmem:[#allocation14 + $0x1fc] ss:$28 sps:$4 sm:$0xff]  }
 0x32a   : > { %v2724_v13 = vpop.f32.mrf.mxu1  ;;  %v2765_v18 = vpop.f32.mrf.mxu0  ;;  %5886 = vmatprep.subr.bf16.mxu1 %v7873_v8  ;;  %5926 = vmatpush1.bf16.msra.mxu0 %v7883_v9  ;;  %v7954_v7 = vld [vmem:[#allocation14 + $0x5b4] ss:$28 sps:$4 sm:$0xff]   ;;  %v2720_v9 = vadd.f32 %v9157_v3, %v1368_v2  ;;  %v7957_v11 = vld [vmem:[#allocation14 + $0x57c] ss:$28 sps:$4 sm:$0xff]  }
 0x32b   : > { %v3014_v20 = vmax.f32 %v2763_v14, 0.0  ;;  %5927 = vmatprep.subr.bf16.mxu0 %v7891_v10  ;;  %v7934_v8 = vld [vmem:[#allocation14 + $0x230] ss:$28 sps:$4 sm:$0xff]   ;;  %v7940_v16 = vld [vmem:[#allocation14 + $0x1f8] ss:$28 sps:$4 sm:$0xff]  }
 0x32c   : > { %v7952_v10 = vld [vmem:[#allocation14 + $0x5b0] ss:$28 sps:$4 sm:$0xff]   ;;  %v2761_v14 = vadd.f32 %v9159_v4, %v2720_v9  ;;  %v7955_v13 = vld [vmem:[#allocation14 + $0x578] ss:$28 sps:$4 sm:$0xff]   ;;  %v7960_v18 = vld [vmem:[#allocation14 + $0x544] ss:$28 sps:$4 sm:$0xff]  }
 0x32d   : > { %v9162_v22 = vpack.c.bf16 %v3014_v20, %v3014_v20  ;;  %5887 = vmatpush1.bf16.msra.mxu1 %v7871_v17  ;;  %v7948_v17 = vld [vmem:[#allocation14 + $0x1c4] ss:$28 sps:$4 sm:$0xff]   ;;  %v7963_v20 = vld [vmem:[#allocation14 + $0x88c] ss:$28 sps:$4 sm:$0xff]  }
 0x32e   : > { %5888 = vmatprep.subr.bf16.mxu1 %v7876_v15  ;;  %5928 = vmatpush1.bf16.msra.mxu0 %v7889_v19  ;;  %v7946_v15 = vld [vmem:[#allocation14 + $0x1c0] ss:$28 sps:$4 sm:$0xff]   ;;  %v3013_v19 = vmax.f32 %v2761_v14, 0.0  ;;  %v7961_v4 = vld [vmem:[#allocation14 + $0x888] ss:$28 sps:$4 sm:$0xff]  }
 0x32f   : > { %5914 = vmatprep.mubr.bf16.mxu1 %v9162_v22  ;;  %5929 = vmatprep.subr.bf16.mxu0 %v7897_v21  ;;  %v7958_v3 = vld [vmem:[#allocation14 + $0x540] ss:$28 sps:$4 sm:$0xff]   ;;  %v8011_v21 = vld [vmem:[#allocation14 + $0xc0c] ss:$28 sps:$4 sm:$0xff]  }
 0x330   : > { %v8027_v2 = vld [vmem:[#allocation14 + $0xb60] ss:$28 sps:$4 sm:$0xff]   ;;  %v7987_v9 = vld [vmem:[#allocation14 + $0xa4c] ss:$28 sps:$4 sm:$0xff]  }
 0x331   : > { %5889 = vmatpush1.bf16.msra.mxu1 %v7874_v23  ;;  %v1376_v23 = vrot.slane %v9152_v62, %v9121_v49  ;;  %v8047_v14 = vld [vmem:[#allocation14 + $0xabc] ss:$28 sps:$4 sm:$0xff]  }
 0x332   : > { %5890 = vmatprep.subr.bf16.mxu1 %v7882_v24  ;;  %5930 = vmatpush1.bf16.msra.mxu0 %v7895_v25  ;;  %v9171_v24 = vpack.c.bf16 %v3013_v19, %v3013_v19  ;;  %v7966_v25 = vld [vmem:[#allocation14 + $0x854] ss:$28 sps:$4 sm:$0xff]  }
 0x333   : > { %5931 = vmatprep.subr.bf16.mxu0 %v7903_v26  ;;  %v1380_v26 = vrot.slane %v9152_v62, %v9124_v51  ;;  %v7991_v19 = vld [vmem:[#allocation14 + $0x9d8] ss:$28 sps:$4 sm:$0xff]  }
 0x335   : > { %5891 = vmatpush1.bf16.msra.mxu1 %v7880_v28 }
 0x336   : > { %5892 = vmatprep.subr.bf16.mxu1 %v7888_v31  ;;  %5932 = vmatpush1.bf16.msra.mxu0 %v7901_v32 }
 0x337   : > { %5933 = vmatprep.subr.bf16.mxu0 %v7909_v33  ;;  %v7964_v33 = vld [vmem:[#allocation14 + $0x850] ss:$28 sps:$4 sm:$0xff]  }
 0x339   : > { %5893 = vmatpush1.bf16.msra.mxu1 %v7886_v34 }
 0x33a   : > { %5894 = vmatprep.subr.bf16.mxu1 %v7894_v35  ;;  %5934 = vmatpush1.bf16.msra.mxu0 %v7907_v36  ;;  %v7969_v36 = vld [vmem:[#allocation14 + $0x81c] ss:$28 sps:$4 sm:$0xff]  }
 0x33b   : > { %5935 = vmatprep.subr.bf16.mxu0 %v7915_v37 }
 0x33d   : > { %5895 = vmatpush1.bf16.msra.mxu1 %v7892_v38 }
 0x33e   : > { %5896 = vmatprep.subr.bf16.mxu1 %v7900_v39  ;;  %5936 = vmatpush1.bf16.msra.mxu0 %v7913_v40 }
 0x33f   : > { %5937 = vmatprep.subr.bf16.mxu0 %v7921_v41 }
 0x341   : > { %5897 = vmatpush1.bf16.msra.mxu1 %v7898_v42  ;;  %v7967_v42 = vld [vmem:[#allocation14 + $0x818] ss:$28 sps:$4 sm:$0xff]  }
 0x342   : > { %5898 = vmatprep.subr.bf16.mxu1 %v7906_v43  ;;  %5938 = vmatpush1.bf16.msra.mxu0 %v7919_v44 }
 0x343   : > { %5939 = vmatprep.subr.bf16.mxu0 %v7927_v45 }
 0x345   : > { %5899 = vmatpush2.bf16.msra.mxu1 %v7904_v46  ;;  %v7972_v46 = vld [vmem:[#allocation14 + $0x7e4] ss:$28 sps:$4 sm:$0xff]  }
 0x346   : > { %5900 = vmatprep.subr.bf16.mxu1 %v7912_v47  ;;  %5940 = vmatpush2.bf16.msra.mxu0 %v7925_v48 }
 0x347   : > { %5941 = vmatprep.subr.bf16.mxu0 %v7933_v50  ;;  %v7970_v50 = vld [vmem:[#allocation14 + $0x7e0] ss:$28 sps:$4 sm:$0xff]  }
 0x349   : > { %5901 = vmatpush2.bf16.msra.mxu1 %v7910_v52  ;;  %v8009_v52 = vld [vmem:[#allocation14 + $0xc08] ss:$28 sps:$4 sm:$0xff]  }
 0x34a   : > { %5902 = vmatprep.subr.bf16.mxu1 %v7918_v53  ;;  %5942 = vmatpush2.bf16.msra.mxu0 %v7931_v54  ;;  %v7975_v54 = vld [vmem:[#allocation14 + $0x7ac] ss:$28 sps:$4 sm:$0xff]  }
 0x34b   : > { %5943 = vmatprep.subr.bf16.mxu0 %v7939_v55  ;;  %v8017_v55 = vld [vmem:[#allocation14 + $0xbd4] ss:$28 sps:$4 sm:$0xff]  }
 0x34d   : > { %5903 = vmatpush2.bf16.msra.mxu1 %v7916_v56  ;;  %v7973_v56 = vld [vmem:[#allocation14 + $0x7a8] ss:$28 sps:$4 sm:$0xff]  }
 0x34e   : > { %5904 = vmatprep.subr.bf16.mxu1 %v7924_v57  ;;  %5944 = vmatpush2.bf16.msra.mxu0 %v7937_v58  ;;  %v8015_v57 = vld [vmem:[#allocation14 + $0xbd0] ss:$28 sps:$4 sm:$0xff]  }
 0x34f   : > { %5945 = vmatprep.subr.bf16.mxu0 %v7945_v59  ;;  %v7978_v58 = vld [vmem:[#allocation14 + $0x774] ss:$28 sps:$4 sm:$0xff]   ;;  %v8023_v59 = vld [vmem:[#allocation14 + $0xb9c] ss:$28 sps:$4 sm:$0xff]  }
 0x351   : > { %5905 = vmatpush2.bf16.msra.mxu1 %v7922_v60  ;;  %v7976_v60 = vld [vmem:[#allocation14 + $0x770] ss:$28 sps:$4 sm:$0xff]  }
 0x352   : > { %5906 = vmatprep.subr.bf16.mxu1 %v7930_v61  ;;  %5946 = vmatpush2.bf16.msra.mxu0 %v7943_v63  ;;  %v8021_v61 = vld [vmem:[#allocation14 + $0xb98] ss:$28 sps:$4 sm:$0xff]  }
 0x353   : > { %5947 = vmatprep.subr.bf16.mxu0 %v7951_v0  ;;  %v7981_v63 = vld [vmem:[#allocation14 + $0x73c] ss:$28 sps:$4 sm:$0xff]   ;;  %v8029_v0 = vld [vmem:[#allocation14 + $0xb64] ss:$28 sps:$4 sm:$0xff]  }
 0x355   : > { %5907 = vmatpush2.bf16.msra.mxu1 %v7928_v1  ;;  %v7979_v1 = vld [vmem:[#allocation14 + $0x738] ss:$28 sps:$4 sm:$0xff]  }
 0x356   : > { %5908 = vmatprep.subr.bf16.mxu1 %v7936_v5  ;;  %5948 = vmatpush2.bf16.msra.mxu0 %v7949_v6  ;;  %v7984_v5 = vld [vmem:[#allocation14 + $0x704] ss:$28 sps:$4 sm:$0xff]   ;;  %v8035_v6 = vld [vmem:[#allocation14 + $0xb2c] ss:$28 sps:$4 sm:$0xff]  }
 0x357   : > { %5949 = vmatprep.subr.bf16.mxu0 %v7954_v7  ;;  %v7982_v7 = vld [vmem:[#allocation14 + $0x700] ss:$28 sps:$4 sm:$0xff]  }
 0x359   : > { %5909 = vmatpush2.bf16.msra.mxu1 %v7934_v8  ;;  %v8033_v8 = vld [vmem:[#allocation14 + $0xb28] ss:$28 sps:$4 sm:$0xff]  }
 0x35a   : > { %5910 = vmatprep.subr.bf16.mxu1 %v7942_v12  ;;  %5950 = vmatpush2.bf16.msra.mxu0 %v7952_v10  ;;  %v8041_v12 = vld [vmem:[#allocation14 + $0xaf4] ss:$28 sps:$4 sm:$0xff]   ;;  %v7985_v10 = vld [vmem:[#allocation14 + $0xa48] ss:$28 sps:$4 sm:$0xff]  }
 0x35b   : > { %5951 = vmatprep.subr.bf16.mxu0 %v7957_v11  ;;  %v8039_v11 = vld [vmem:[#allocation14 + $0xaf0] ss:$28 sps:$4 sm:$0xff]  }
 0x35d   : > { %5911 = vmatpush2.bf16.msra.mxu1 %v7940_v16  ;;  %v7990_v16 = vld [vmem:[#allocation14 + $0xa14] ss:$28 sps:$4 sm:$0xff]  }
 0x35e   : > { %5912 = vmatprep.subr.bf16.mxu1 %v7948_v17  ;;  %5952 = vmatpush2.bf16.msra.mxu0 %v7955_v13  ;;  %v7988_v17 = vld [vmem:[#allocation14 + $0xa10] ss:$28 sps:$4 sm:$0xff]   ;;  %v8045_v13 = vld [vmem:[#allocation14 + $0xab8] ss:$28 sps:$4 sm:$0xff]  }
 0x35f   : > { %5953 = vmatprep.subr.bf16.mxu0 %v7960_v18  ;;  %v7993_v18 = vld [vmem:[#allocation14 + $0x9dc] ss:$28 sps:$4 sm:$0xff]  }
 0x361   : > { %5913 = vmatpush2.bf16.msra.mxu1 %v7946_v15  ;;  %v8053_v15 = vld [vmem:[#allocation14 + $0xa84] ss:$28 sps:$4 sm:$0xff]  }
 0x362   : > { %5954 = vmatpush2.bf16.msra.mxu0 %v7958_v3  ;;  %5964 = vmatprep.subr.bf16.mxu1 %v7963_v20  ;;  %v8051_v3 = vld [vmem:[#allocation14 + $0xa80] ss:$28 sps:$4 sm:$0xff]  }
 0x363   : > { %6005 = vmatprep.subr.bf16.mxu0 %v8011_v21  ;;  %v7996_v20 = vld [vmem:[#allocation14 + $0x9a4] ss:$28 sps:$4 sm:$0xff]   ;;  %v8059_v21 = vld [vmem:[#allocation14 + $0xdcc] ss:$28 sps:$4 sm:$0xff]  }
 0x364   : > { %v2801_v28 = vpop.f32.mrf.mxu1  ;;  %v2842_v31 = vpop.f32.mrf.mxu0  ;;  %5915 = vmatmul.mubr.bf16.vlgmr.msra.gmra.mxu1 %v9171_v24 }
 0x365   : > { %v2802_v32 = vadd.f32 %v2801_v28, %v1376_v23  ;;  %5965 = vmatpush1.bf16.msra.mxu1 %v7961_v4  ;;  %v7994_v23 = vld [vmem:[#allocation14 + $0x9a0] ss:$28 sps:$4 sm:$0xff]   ;;  %v8057_v4 = vld [vmem:[#allocation14 + $0xdc8] ss:$28 sps:$4 sm:$0xff]  }
 0x366   : > { %v2803_v34 = vpop.f32.mrf.mxu1  ;;  %v2844_v35 = vpop.f32.mrf.mxu0  ;;  %5966 = vmatprep.subr.bf16.mxu1 %v7966_v25  ;;  %v7999_v25 = vld [vmem:[#allocation14 + $0x96c] ss:$28 sps:$4 sm:$0xff]  }
 0x367   : > { %v2843_v37 = vadd.f32 %v2842_v31, %v2802_v32  ;;  %v2804_v38 = vadd.f32 %v2803_v34, %v1380_v26  ;;  %v8065_v26 = vld [vmem:[#allocation14 + $0xd94] ss:$28 sps:$4 sm:$0xff]   ;;  %v7997_v28 = vld [vmem:[#allocation14 + $0x968] ss:$28 sps:$4 sm:$0xff]  }
 0x368   : > { %v2805_v39 = vpop.f32.mrf.mxu1  ;;  %v2846_v40 = vpop.f32.mrf.mxu0  ;;  %v8063_v31 = vld [vmem:[#allocation14 + $0xd90] ss:$28 sps:$4 sm:$0xff]  }
 0x369   : > { %v2845_v41 = vadd.f32 %v2844_v35, %v2804_v38  ;;  %5967 = vmatpush1.bf16.msra.mxu1 %v7964_v33  ;;  %v3015_v43 = vmax.f32 %v2843_v37, 0.0  ;;  %v8002_v32 = vld [vmem:[#allocation14 + $0x934] ss:$28 sps:$4 sm:$0xff]   ;;  %v8071_v33 = vld [vmem:[#allocation14 + $0xd5c] ss:$28 sps:$4 sm:$0xff]  }
 0x36a   : > { %v2806_v44 = vpop.f32.mrf.mxu1  ;;  %v2847_v45 = vpop.f32.mrf.mxu0  ;;  %5968 = vmatprep.subr.bf16.mxu1 %v7969_v36  ;;  %v8000_v34 = vld [vmem:[#allocation14 + $0x930] ss:$28 sps:$4 sm:$0xff]   ;;  %v8069_v35 = vld [vmem:[#allocation14 + $0xd58] ss:$28 sps:$4 sm:$0xff]   ;;  %v8077_v37 = vld [vmem:[#allocation14 + $0xd24] ss:$28 sps:$4 sm:$0xff]  }
 0x36b   : > { %v3016_v47 = vmax.f32 %v2845_v41, 0.0  ;;  %v9178_v53 = vpack.c.bf16 %v3015_v43, %v3015_v43  ;;  %v8005_v36 = vld [vmem:[#allocation14 + $0x8fc] ss:$28 sps:$4 sm:$0xff]   ;;  %v8008_v40 = vld [vmem:[#allocation14 + $0x8c4] ss:$28 sps:$4 sm:$0xff]  }
 0x36c   : > { %v8003_v38 = vld [vmem:[#allocation14 + $0x8f8] ss:$28 sps:$4 sm:$0xff]   ;;  %v8075_v39 = vld [vmem:[#allocation14 + $0xd20] ss:$28 sps:$4 sm:$0xff]   ;;  %v8083_v41 = vld [vmem:[#allocation14 + $0xcec] ss:$28 sps:$4 sm:$0xff]  }
 0x36d   : > { %v9176_v48 = vpack.c.bf16 %v3016_v47, %v3016_v47  ;;  %5969 = vmatpush1.bf16.msra.mxu1 %v7967_v42  ;;  %v1383_v42 = vsub.s32 4, %v9110_v27  ;;  %v8006_v43 = vld [vmem:[#allocation14 + $0x8c0] ss:$28 sps:$4 sm:$0xff]   ;;  %v8081_v44 = vld [vmem:[#allocation14 + $0xce8] ss:$28 sps:$4 sm:$0xff]   ;;  %v1387_v47 = vsub.s32 5, %v9110_v27 }
 0x36e   : > { %5970 = vmatprep.subr.bf16.mxu1 %v7972_v46  ;;  %v8014_v45 = vld [vmem:[#allocation14 + $0x194] ss:$28 sps:$4 sm:$0xff]  }
 0x36f   : > { %5955 = vmatprep.mubr.bf16.mxu0 %v9176_v48  ;;  %v8089_v46 = vld [vmem:[#allocation14 + $0xcb4] ss:$28 sps:$4 sm:$0xff]  }
 0x370   : > { %5956 = vmatmul.mubr.bf16.vlgmr.msra.gmra.mxu0 %v9178_v53 }
 0x371   : > { %5971 = vmatpush1.bf16.msra.mxu1 %v7970_v50  ;;  %6006 = vmatpush1.bf16.msra.mxu0 %v8009_v52  ;;  %v1384_v50 = vrot.slane %v9152_v62, %v1383_v42  ;;  %v8087_v52 = vld [vmem:[#allocation14 + $0xcb0] ss:$28 sps:$4 sm:$0xff]  }
 0x372   : > { %5972 = vmatprep.subr.bf16.mxu1 %v7975_v54  ;;  %6007 = vmatprep.subr.bf16.mxu0 %v8017_v55  ;;  %v8095_v54 = vld [vmem:[#allocation14 + $0xc7c] ss:$28 sps:$4 sm:$0xff]   ;;  %v1388_v55 = vrot.slane %v9152_v62, %v1387_v47 }
 0x375   : > { %5973 = vmatpush1.bf16.msra.mxu1 %v7973_v56  ;;  %6008 = vmatpush1.bf16.msra.mxu0 %v8015_v57 }
 0x376   : > { %5974 = vmatprep.subr.bf16.mxu1 %v7978_v58  ;;  %6009 = vmatprep.subr.bf16.mxu0 %v8023_v59  ;;  %v8093_v59 = vld [vmem:[#allocation14 + $0xc78] ss:$28 sps:$4 sm:$0xff]  }
 0x379   : > { %5975 = vmatpush1.bf16.msra.mxu1 %v7976_v60  ;;  %6010 = vmatpush1.bf16.msra.mxu0 %v8021_v61  ;;  %v8101_v61 = vld [vmem:[#allocation14 + $0xc44] ss:$28 sps:$4 sm:$0xff]  }
 0x37a   : > { %5976 = vmatprep.subr.bf16.mxu1 %v7981_v63  ;;  %6011 = vmatprep.subr.bf16.mxu0 %v8029_v0 }
 0x37d   : > { %5977 = vmatpush1.bf16.msra.mxu1 %v7979_v1  ;;  %6012 = vmatpush1.bf16.msra.mxu0 %v8027_v2 }
 0x37e   : > { %5978 = vmatprep.subr.bf16.mxu1 %v7984_v5  ;;  %6013 = vmatprep.subr.bf16.mxu0 %v8035_v6 }
 0x381   : > { %5979 = vmatpush1.bf16.msra.mxu1 %v7982_v7  ;;  %6014 = vmatpush1.bf16.msra.mxu0 %v8033_v8  ;;  %v8099_v7 = vld [vmem:[#allocation14 + $0xc40] ss:$28 sps:$4 sm:$0xff]  }
 0x382   : > { %5980 = vmatprep.subr.bf16.mxu1 %v7987_v9  ;;  %6015 = vmatprep.subr.bf16.mxu0 %v8041_v12  ;;  %v8107_v12 = vld [vmem:[#allocation14 + $0x514] ss:$28 sps:$4 sm:$0xff]  }
 0x385   : > { %5981 = vmatpush2.bf16.msra.mxu1 %v7985_v10  ;;  %6016 = vmatpush1.bf16.msra.mxu0 %v8039_v11 }
 0x386   : > { %5982 = vmatprep.subr.bf16.mxu1 %v7990_v16  ;;  %6017 = vmatprep.subr.bf16.mxu0 %v8047_v14  ;;  %v8012_v14 = vld [vmem:[#allocation14 + $0x190] ss:$28 sps:$4 sm:$0xff]  }
 0x389   : > { %5983 = vmatpush2.bf16.msra.mxu1 %v7988_v17  ;;  %6018 = vmatpush1.bf16.msra.mxu0 %v8045_v13  ;;  %v8020_v13 = vld [vmem:[#allocation14 + $0x15c] ss:$28 sps:$4 sm:$0xff]  }
 0x38a   : > { %5984 = vmatprep.subr.bf16.mxu1 %v7993_v18  ;;  %6019 = vmatprep.subr.bf16.mxu0 %v8053_v15  ;;  %v8018_v18 = vld [vmem:[#allocation14 + $0x158] ss:$28 sps:$4 sm:$0xff]   ;;  %v8026_v15 = vld [vmem:[#allocation14 + $0x124] ss:$28 sps:$4 sm:$0xff]  }
 0x38d   : > { %5985 = vmatpush2.bf16.msra.mxu1 %v7991_v19  ;;  %6020 = vmatpush1.bf16.msra.mxu0 %v8051_v3  ;;  %v8024_v19 = vld [vmem:[#allocation14 + $0x120] ss:$28 sps:$4 sm:$0xff]   ;;  %v8032_v3 = vld [vmem:[#allocation14 + $0xec] ss:$28 sps:$4 sm:$0xff]  }
 0x38e   : > { %5986 = vmatprep.subr.bf16.mxu1 %v7996_v20  ;;  %6021 = vmatprep.subr.bf16.mxu0 %v8059_v21  ;;  %v8030_v20 = vld [vmem:[#allocation14 + $0xe8] ss:$28 sps:$4 sm:$0xff]   ;;  %v8038_v21 = vld [vmem:[#allocation14 + $0xb4] ss:$28 sps:$4 sm:$0xff]  }
 0x391   : > { %5987 = vmatpush2.bf16.msra.mxu1 %v7994_v23  ;;  %6022 = vmatpush2.bf16.msra.mxu0 %v8057_v4  ;;  %v8036_v23 = vld [vmem:[#allocation14 + $0xb0] ss:$28 sps:$4 sm:$0xff]   ;;  %v8044_v4 = vld [vmem:[#allocation14 + $0x7c] ss:$28 sps:$4 sm:$0xff]  }
 0x392   : > { %5988 = vmatprep.subr.bf16.mxu1 %v7999_v25  ;;  %6023 = vmatprep.subr.bf16.mxu0 %v8065_v26  ;;  %v8042_v25 = vld [vmem:[#allocation14 + $0x78] ss:$28 sps:$4 sm:$0xff]   ;;  %v8050_v26 = vld [vmem:[#allocation14 + $0x44] ss:$28 sps:$4 sm:$0xff]  }
 0x395   : > { %5989 = vmatpush2.bf16.msra.mxu1 %v7997_v28  ;;  %6024 = vmatpush2.bf16.msra.mxu0 %v8063_v31  ;;  %v8048_v28 = vld [vmem:[#allocation14 + $0x40] ss:$28 sps:$4 sm:$0xff]   ;;  %v8056_v31 = vld [vmem:[#allocation14 + $0xc] ss:$28 sps:$4 sm:$0xff]  }
 0x396   : > { %5990 = vmatprep.subr.bf16.mxu1 %v8002_v32  ;;  %6025 = vmatprep.subr.bf16.mxu0 %v8071_v33  ;;  %v8054_v32 = vld [vmem:[#allocation14 + $0x8] ss:$28 sps:$4 sm:$0xff]   ;;  %v8062_v33 = vld [vmem:[#allocation14 + $0x354] ss:$28 sps:$4 sm:$0xff]  }
 0x399   : > { %5991 = vmatpush2.bf16.msra.mxu1 %v8000_v34  ;;  %6026 = vmatpush2.bf16.msra.mxu0 %v8069_v35  ;;  %v8060_v34 = vld [vmem:[#allocation14 + $0x350] ss:$28 sps:$4 sm:$0xff]   ;;  %v8068_v35 = vld [vmem:[#allocation14 + $0x31c] ss:$28 sps:$4 sm:$0xff]  }
 0x39a   : > { %5992 = vmatprep.subr.bf16.mxu1 %v8005_v36  ;;  %6027 = vmatprep.subr.bf16.mxu0 %v8077_v37  ;;  %v8066_v36 = vld [vmem:[#allocation14 + $0x318] ss:$28 sps:$4 sm:$0xff]   ;;  %v8074_v37 = vld [vmem:[#allocation14 + $0x2e4] ss:$28 sps:$4 sm:$0xff]  }
 0x39d   : > { %5993 = vmatpush2.bf16.msra.mxu1 %v8003_v38  ;;  %6028 = vmatpush2.bf16.msra.mxu0 %v8075_v39  ;;  %v8072_v38 = vld [vmem:[#allocation14 + $0x2e0] ss:$28 sps:$4 sm:$0xff]   ;;  %v8080_v39 = vld [vmem:[#allocation14 + $0x2ac] ss:$28 sps:$4 sm:$0xff]  }
 0x39e   : > { %5994 = vmatprep.subr.bf16.mxu1 %v8008_v40  ;;  %6029 = vmatprep.subr.bf16.mxu0 %v8083_v41  ;;  %v8078_v40 = vld [vmem:[#allocation14 + $0x2a8] ss:$28 sps:$4 sm:$0xff]   ;;  %v8086_v41 = vld [vmem:[#allocation14 + $0x274] ss:$28 sps:$4 sm:$0xff]  }
 0x3a1   : > { %5995 = vmatpush2.bf16.msra.mxu1 %v8006_v43  ;;  %6030 = vmatpush2.bf16.msra.mxu0 %v8081_v44  ;;  %v8084_v43 = vld [vmem:[#allocation14 + $0x270] ss:$28 sps:$4 sm:$0xff]   ;;  %v1391_v44 = vsub.s32 6, %v9110_v27 }
 0x3a2   : > { %6046 = vmatprep.subr.bf16.mxu1 %v8014_v45  ;;  %6031 = vmatprep.subr.bf16.mxu0 %v8089_v46  ;;  %v8092_v45 = vld [vmem:[#allocation14 + $0x23c] ss:$28 sps:$4 sm:$0xff]   ;;  %v1395_v46 = vsub.s32 7, %v9110_v27 }
 0x3a4   : > { %v2883_v56 = vpop.f32.mrf.mxu1 }
 0x3a5   : > { %v2884_v57 = vadd.f32 %v2883_v56, %v1384_v50  ;;  %v2924_v58 = vpop.f32.mrf.mxu0  ;;  %6032 = vmatpush2.bf16.msra.mxu0 %v8087_v52  ;;  %v8090_v50 = vld [vmem:[#allocation14 + $0x238] ss:$28 sps:$4 sm:$0xff]   ;;  %v1392_v52 = vrot.slane %v9152_v62, %v1391_v44 }
 0x3a6   : > { %v2885_v60 = vpop.f32.mrf.mxu1  ;;  %6033 = vmatprep.subr.bf16.mxu0 %v8095_v54  ;;  %v8098_v54 = vld [vmem:[#allocation14 + $0x204] ss:$28 sps:$4 sm:$0xff]  }
 0x3a7   : > { %v2925_v63 = vadd.f32 %v2924_v58, %v2884_v57  ;;  %v2886_v0 = vadd.f32 %v2885_v60, %v1388_v55  ;;  %v2926_v1 = vpop.f32.mrf.mxu0  ;;  %v1396_v55 = vrot.slane %v9152_v62, %v1395_v46  ;;  %v8110_v62 = vld [vmem:[#allocation14 + $0x894] ss:$28 sps:$4 sm:$0xff]   ;;  %v8144_v46 = vld [vmem:[#allocation14 + $0x740] ss:$28 sps:$4 sm:$0xff]  }
 0x3a8   : > { %v2887_v2 = vpop.f32.mrf.mxu1 }
 0x3a9   : > { %v2927_v5 = vadd.f32 %v2926_v1, %v2886_v0  ;;  %v2928_v6 = vpop.f32.mrf.mxu0  ;;  %6034 = vmatpush2.bf16.msra.mxu0 %v8093_v59  ;;  %v3017_v8 = vmax.f32 %v2925_v63, 0.0  ;;  %v8096_v59 = vld [vmem:[#allocation14 + $0x200] ss:$28 sps:$4 sm:$0xff]  }
 0x3aa   : > { %v2888_v9 = vpop.f32.mrf.mxu1  ;;  %6035 = vmatprep.subr.bf16.mxu0 %v8101_v61  ;;  %v8104_v61 = vld [vmem:[#allocation14 + $0x1cc] ss:$28 sps:$4 sm:$0xff]  }
 0x3ab   : > { %v3018_v10 = vmax.f32 %v2927_v5, 0.0  ;;  %v2929_v11 = vpop.f32.mrf.mxu0  ;;  %v9192_v17 = vpack.c.bf16 %v3017_v8, %v3017_v8 }
 0x3ad   : > { %v9190_v16 = vpack.c.bf16 %v3018_v10, %v3018_v10  ;;  %6036 = vmatpush2.bf16.msra.mxu0 %v8099_v7  ;;  %v8102_v7 = vld [vmem:[#allocation14 + $0x1c8] ss:$28 sps:$4 sm:$0xff]  }
 0x3ae   : > { %6087 = vmatprep.subr.bf16.mxu0 %v8107_v12 }
 0x3af   : > { %5996 = vmatprep.mubr.bf16.mxu1 %v9190_v16 }
 0x3b0   : > { %5997 = vmatmul.mubr.bf16.vlgmr.msra.gmra.mxu1 %v9192_v17 }
 0x3b1   : > { %6047 = vmatpush1.bf16.msra.mxu1 %v8012_v14  ;;  %6078 = vmatprep.mubr.bf16.mxu1 %v9162_v22  ;;  %v8105_v14 = vld [vmem:[#allocation14 + $0x510] ss:$28 sps:$4 sm:$0xff]  }
 0x3b2   : > { %6048 = vmatprep.subr.bf16.mxu1 %v8020_v13  ;;  %v8108_v13 = vld [vmem:[#allocation14 + $0x890] ss:$28 sps:$4 sm:$0xff]  }
 0x3b5   : > { %6049 = vmatpush1.bf16.msra.mxu1 %v8018_v18 }
 0x3b6   : > { %6050 = vmatprep.subr.bf16.mxu1 %v8026_v15  ;;  %v8113_v15 = vld [vmem:[#allocation14 + $0x4dc] ss:$28 sps:$4 sm:$0xff]  }
 0x3b9   : > { %6051 = vmatpush1.bf16.msra.mxu1 %v8024_v19  ;;  %v8116_v19 = vld [vmem:[#allocation14 + $0x85c] ss:$28 sps:$4 sm:$0xff]  }
 0x3ba   : > { %6052 = vmatprep.subr.bf16.mxu1 %v8032_v3  ;;  %v8111_v3 = vld [vmem:[#allocation14 + $0x4d8] ss:$28 sps:$4 sm:$0xff]  }
 0x3bd   : > { %6053 = vmatpush1.bf16.msra.mxu1 %v8030_v20  ;;  %v8114_v20 = vld [vmem:[#allocation14 + $0x858] ss:$28 sps:$4 sm:$0xff]  }
 0x3be   : > { %6054 = vmatprep.subr.bf16.mxu1 %v8038_v21  ;;  %v8119_v21 = vld [vmem:[#allocation14 + $0x4a4] ss:$28 sps:$4 sm:$0xff]  }
 0x3c1   : > { %6055 = vmatpush1.bf16.msra.mxu1 %v8036_v23  ;;  %v8122_v23 = vld [vmem:[#allocation14 + $0x824] ss:$28 sps:$4 sm:$0xff]  }
 0x3c2   : > { %6056 = vmatprep.subr.bf16.mxu1 %v8044_v4  ;;  %v8117_v4 = vld [vmem:[#allocation14 + $0x4a0] ss:$28 sps:$4 sm:$0xff]  }
 0x3c5   : > { %6057 = vmatpush1.bf16.msra.mxu1 %v8042_v25  ;;  %v8120_v25 = vld [vmem:[#allocation14 + $0x820] ss:$28 sps:$4 sm:$0xff]  }
 0x3c6   : > { %6058 = vmatprep.subr.bf16.mxu1 %v8050_v26  ;;  %v8125_v26 = vld [vmem:[#allocation14 + $0x46c] ss:$28 sps:$4 sm:$0xff]  }
 0x3c9   : > { %6059 = vmatpush1.bf16.msra.mxu1 %v8048_v28  ;;  %v8128_v28 = vld [vmem:[#allocation14 + $0x7ec] ss:$28 sps:$4 sm:$0xff]  }
 0x3ca   : > { %6060 = vmatprep.subr.bf16.mxu1 %v8056_v31  ;;  %v8123_v31 = vld [vmem:[#allocation14 + $0x468] ss:$28 sps:$4 sm:$0xff]  }
 0x3cd   : > { %6061 = vmatpush1.bf16.msra.mxu1 %v8054_v32  ;;  %v8126_v32 = vld [vmem:[#allocation14 + $0x7e8] ss:$28 sps:$4 sm:$0xff]  }
 0x3ce   : > { %6062 = vmatprep.subr.bf16.mxu1 %v8062_v33  ;;  %v8131_v33 = vld [vmem:[#allocation14 + $0x434] ss:$28 sps:$4 sm:$0xff]  }
 0x3d1   : > { %6063 = vmatpush2.bf16.msra.mxu1 %v8060_v34  ;;  %v8134_v34 = vld [vmem:[#allocation14 + $0x7b4] ss:$28 sps:$4 sm:$0xff]  }
 0x3d2   : > { %6064 = vmatprep.subr.bf16.mxu1 %v8068_v35  ;;  %v8129_v35 = vld [vmem:[#allocation14 + $0x430] ss:$28 sps:$4 sm:$0xff]  }
 0x3d5   : > { %6065 = vmatpush2.bf16.msra.mxu1 %v8066_v36  ;;  %v8132_v36 = vld [vmem:[#allocation14 + $0x7b0] ss:$28 sps:$4 sm:$0xff]  }
 0x3d6   : > { %6066 = vmatprep.subr.bf16.mxu1 %v8074_v37  ;;  %v8137_v37 = vld [vmem:[#allocation14 + $0x3fc] ss:$28 sps:$4 sm:$0xff]  }
 0x3d9   : > { %6067 = vmatpush2.bf16.msra.mxu1 %v8072_v38  ;;  %v8140_v38 = vld [vmem:[#allocation14 + $0x77c] ss:$28 sps:$4 sm:$0xff]  }
 0x3da   : > { %6068 = vmatprep.subr.bf16.mxu1 %v8080_v39  ;;  %v8135_v39 = vld [vmem:[#allocation14 + $0x3f8] ss:$28 sps:$4 sm:$0xff]  }
 0x3dd   : > { %6069 = vmatpush2.bf16.msra.mxu1 %v8078_v40  ;;  %v8138_v40 = vld [vmem:[#allocation14 + $0x778] ss:$28 sps:$4 sm:$0xff]  }
 0x3de   : > { %6070 = vmatprep.subr.bf16.mxu1 %v8086_v41  ;;  %v8143_v41 = vld [vmem:[#allocation14 + $0x3c4] ss:$28 sps:$4 sm:$0xff]  }
 0x3e1   : > { %6071 = vmatpush2.bf16.msra.mxu1 %v8084_v43  ;;  %v8146_v43 = vld [vmem:[#allocation14 + $0x744] ss:$28 sps:$4 sm:$0xff]  }
 0x3e2   : > { %6072 = vmatprep.subr.bf16.mxu1 %v8092_v45  ;;  %v8141_v45 = vld [vmem:[#allocation14 + $0x3c0] ss:$28 sps:$4 sm:$0xff]  }
 0x3e4   : > { %v2965_v56 = vpop.f32.mrf.mxu1 }
 0x3e5   : > { %v2966_v57 = vadd.f32 %v2965_v56, %v1392_v52  ;;  %v3006_v58 = vpop.f32.mrf.mxu0  ;;  %6073 = vmatpush2.bf16.msra.mxu1 %v8090_v50  ;;  %v8149_v50 = vld [vmem:[#allocation14 + $0x38c] ss:$28 sps:$4 sm:$0xff]   ;;  %v8155_v56 = vld [vmem:[#allocation14 + $0x6d4] ss:$28 sps:$4 sm:$0xff]  }
 0x3e6   : > { %v2967_v60 = vpop.f32.mrf.mxu1  ;;  %6074 = vmatprep.subr.bf16.mxu1 %v8098_v54  ;;  %v8152_v52 = vld [vmem:[#allocation14 + $0x70c] ss:$28 sps:$4 sm:$0xff]  }
 0x3e7   : > { %v3007_v63 = vadd.f32 %v3006_v58, %v2966_v57  ;;  %v2968_v0 = vadd.f32 %v2967_v60, %v1396_v55  ;;  %v3008_v1 = vpop.f32.mrf.mxu0  ;;  %v8147_v54 = vld [vmem:[#allocation14 + $0x388] ss:$28 sps:$4 sm:$0xff]   ;;  %v8158_v57 = vld [vmem:[#allocation14 + $0xa54] ss:$28 sps:$4 sm:$0xff]   ;;  %v8161_v60 = vld [vmem:[#allocation14 + $0x69c] ss:$28 sps:$4 sm:$0xff]  }
 0x3e8   : > { %v2969_v2 = vpop.f32.mrf.mxu1  ;;  %v8150_v55 = vld [vmem:[#allocation14 + $0x708] ss:$28 sps:$4 sm:$0xff]   ;;  %v8153_v58 = vld [vmem:[#allocation14 + $0x6d0] ss:$28 sps:$4 sm:$0xff]  }
 0x3e9   : > { %v3009_v5 = vadd.f32 %v3008_v1, %v2968_v0  ;;  %v3010_v6 = vpop.f32.mrf.mxu0  ;;  %6075 = vmatpush2.bf16.msra.mxu1 %v8096_v59  ;;  %v3019_v8 = vmax.f32 %v3007_v63, 0.0  ;;  %v8156_v59 = vld [vmem:[#allocation14 + $0xa50] ss:$28 sps:$4 sm:$0xff]   ;;  %v8159_v63 = vld [vmem:[#allocation14 + $0x698] ss:$28 sps:$4 sm:$0xff]  }
 0x3ea   : > { %v2970_v9 = vpop.f32.mrf.mxu1  ;;  %6076 = vmatprep.subr.bf16.mxu1 %v8104_v61  ;;  %v8164_v61 = vld [vmem:[#allocation14 + $0xa1c] ss:$28 sps:$4 sm:$0xff]   ;;  %v8167_v1 = vld [vmem:[#allocation14 + $0x664] ss:$28 sps:$4 sm:$0xff]  }
 0x3eb   : > { %v3020_v12 = vmax.f32 %v3009_v5, 0.0  ;;  %v3011_v10 = vpop.f32.mrf.mxu0  ;;  %v9205_v18 = vpack.c.bf16 %v3019_v8, %v3019_v8  ;;  %v8162_v0 = vld [vmem:[#allocation14 + $0xa18] ss:$28 sps:$4 sm:$0xff]   ;;  %v8170_v2 = vld [vmem:[#allocation14 + $0x9e4] ss:$28 sps:$4 sm:$0xff]  }
 0x3ec   : > { %v8165_v5 = vld [vmem:[#allocation14 + $0x660] ss:$28 sps:$4 sm:$0xff]   ;;  %v8176_v8 = vld [vmem:[#allocation14 + $0x9ac] ss:$28 sps:$4 sm:$0xff]   ;;  %v8182_v10 = vld [vmem:[#allocation14 + $0x974] ss:$28 sps:$4 sm:$0xff]  }
 0x3ed   : > { %v9203_v11 = vpack.c.bf16 %v3020_v12, %v3020_v12  ;;  %6077 = vmatpush2.bf16.msra.mxu1 %v8102_v7  ;;  %v8168_v6 = vld [vmem:[#allocation14 + $0x9e0] ss:$28 sps:$4 sm:$0xff]   ;;  %v8173_v7 = vld [vmem:[#allocation14 + $0x62c] ss:$28 sps:$4 sm:$0xff]   ;;  %v8179_v12 = vld [vmem:[#allocation14 + $0x5f4] ss:$28 sps:$4 sm:$0xff]  }
 0x3ee   : > { %6128 = vmatprep.subr.bf16.mxu1 %v8110_v62  ;;  %v8171_v9 = vld [vmem:[#allocation14 + $0x628] ss:$28 sps:$4 sm:$0xff]  }
 0x3ef   : > { %6037 = vmatprep.mubr.bf16.mxu0 %v9203_v11  ;;  %v8174_v62 = vld [vmem:[#allocation14 + $0x9a8] ss:$28 sps:$4 sm:$0xff]  }
 0x3f0   : > { %6079 = vmatmul.mubr.bf16.vlgmr.msra.gmra.mxu1 %v9171_v24  ;;  %6038 = vmatmul.mubr.bf16.vlgmr.msra.gmra.mxu0 %v9205_v18 }
 0x3f1   : > { %6088 = vmatpush1.bf16.msra.mxu0 %v8105_v14  ;;  %6129 = vmatpush1.bf16.msra.mxu1 %v8108_v13  ;;  %v8177_v14 = vld [vmem:[#allocation14 + $0x5f0] ss:$28 sps:$4 sm:$0xff]  }
 0x3f2   : > { %6160 = vmatprep.mubr.bf16.mxu1 %v9190_v16  ;;  %6119 = vmatprep.mubr.bf16.mxu0 %v9176_v48  ;;  %v8180_v13 = vld [vmem:[#allocation14 + $0x970] ss:$28 sps:$4 sm:$0xff]  }
 0x3f3   : > { %6089 = vmatprep.subr.bf16.mxu0 %v8113_v15  ;;  %6130 = vmatprep.subr.bf16.mxu1 %v8116_v19  ;;  %v8185_v15 = vld [vmem:[#allocation14 + $0x5bc] ss:$28 sps:$4 sm:$0xff]  }
 0x3f4   : > { %v8188_v19 = vld [vmem:[#allocation14 + $0x93c] ss:$28 sps:$4 sm:$0xff]  }
 0x3f5   : > { %6090 = vmatpush1.bf16.msra.mxu0 %v8111_v3  ;;  %6131 = vmatpush1.bf16.msra.mxu1 %v8114_v20  ;;  %v8183_v3 = vld [vmem:[#allocation14 + $0x5b8] ss:$28 sps:$4 sm:$0xff]  }
 0x3f6   : > { %6091 = vmatprep.subr.bf16.mxu0 %v8119_v21  ;;  %6132 = vmatprep.subr.bf16.mxu1 %v8122_v23  ;;  %v8186_v20 = vld [vmem:[#allocation14 + $0x938] ss:$28 sps:$4 sm:$0xff]   ;;  %v8191_v21 = vld [vmem:[#allocation14 + $0x584] ss:$28 sps:$4 sm:$0xff]  }
 0x3f7   : > { %v8194_v23 = vld [vmem:[#allocation14 + $0x904] ss:$28 sps:$4 sm:$0xff]  }
 0x3f9   : > { %6092 = vmatpush1.bf16.msra.mxu0 %v8117_v4  ;;  %6133 = vmatpush1.bf16.msra.mxu1 %v8120_v25  ;;  %v8189_v25 = vld [vmem:[#allocation14 + $0x580] ss:$28 sps:$4 sm:$0xff]  }
 0x3fa   : > { %6093 = vmatprep.subr.bf16.mxu0 %v8125_v26  ;;  %6134 = vmatprep.subr.bf16.mxu1 %v8128_v28  ;;  %v8192_v26 = vld [vmem:[#allocation14 + $0x900] ss:$28 sps:$4 sm:$0xff]  }
 0x3fd   : > { %6094 = vmatpush1.bf16.msra.mxu0 %v8123_v31  ;;  %6135 = vmatpush1.bf16.msra.mxu1 %v8126_v32  ;;  %v8197_v31 = vld [vmem:[#allocation14 + $0x54c] ss:$28 sps:$4 sm:$0xff]  }
 0x3fe   : > { %6095 = vmatprep.subr.bf16.mxu0 %v8131_v33  ;;  %6136 = vmatprep.subr.bf16.mxu1 %v8134_v34  ;;  %v8200_v32 = vld [vmem:[#allocation14 + $0x8cc] ss:$28 sps:$4 sm:$0xff]   ;;  %v3541_v33 = vld [vmem:[#allocation16] sm:$0xff] }
 0x401   : > { %6096 = vmatpush1.bf16.msra.mxu0 %v8129_v35  ;;  %6137 = vmatpush1.bf16.msra.mxu1 %v8132_v36  ;;  %v8195_v35 = vld [vmem:[#allocation14 + $0x548] ss:$28 sps:$4 sm:$0xff]  }
 0x402   : > { %6097 = vmatprep.subr.bf16.mxu0 %v8137_v37  ;;  %6138 = vmatprep.subr.bf16.mxu1 %v8140_v38  ;;  %v8198_v36 = vld [vmem:[#allocation14 + $0x8c8] ss:$28 sps:$4 sm:$0xff]   ;;  %v8203_v38 = vld [vmem:[#allocation14 + $0xc14] ss:$28 sps:$4 sm:$0xff]  }
 0x405   : > { %6098 = vmatpush1.bf16.msra.mxu0 %v8135_v39  ;;  %6139 = vmatpush1.bf16.msra.mxu1 %v8138_v40  ;;  %v8206_v39 = vld [vmem:[#allocation14 + $0x19c] ss:$28 sps:$4 sm:$0xff]   ;;  %v3546_v40 = vrot.slane %v3541_v33, %v9113_v29 }
 0x406   : > { %6099 = vmatprep.subr.bf16.mxu0 %v8143_v41  ;;  %6140 = vmatprep.subr.bf16.mxu1 %v8146_v43  ;;  %v3550_v41 = vrot.slane %v3541_v33, %v9116_v30  ;;  %v8201_v43 = vld [vmem:[#allocation14 + $0xc10] ss:$28 sps:$4 sm:$0xff]   ;;  %v8207_v29 = vld [vmem:[#allocation14 + $0xbd8] ss:$28 sps:$4 sm:$0xff]  }
 0x407   : > { %v8252_v33 = vld [vmem:[#allocation14 + $0x358] ss:$28 sps:$4 sm:$0xff]  }
 0x409   : > { %6100 = vmatpush1.bf16.msra.mxu0 %v8141_v45  ;;  %6141 = vmatpush1.bf16.msra.mxu1 %v8144_v46  ;;  %v8204_v45 = vld [vmem:[#allocation14 + $0x198] ss:$28 sps:$4 sm:$0xff]  }
 0x40a   : > { %6101 = vmatprep.subr.bf16.mxu0 %v8149_v50  ;;  %6142 = vmatprep.subr.bf16.mxu1 %v8152_v52  ;;  %v8209_v50 = vld [vmem:[#allocation14 + $0xbdc] ss:$28 sps:$4 sm:$0xff]   ;;  %v8212_v52 = vld [vmem:[#allocation14 + $0x164] ss:$28 sps:$4 sm:$0xff]  }
 0x40d   : > { %6102 = vmatpush1.bf16.msra.mxu0 %v8147_v54  ;;  %6143 = vmatpush1.bf16.msra.mxu1 %v8150_v55 }
 0x40e   : > { %6103 = vmatprep.subr.bf16.mxu0 %v8155_v56  ;;  %6144 = vmatprep.subr.bf16.mxu1 %v8158_v57  ;;  %v8210_v57 = vld [vmem:[#allocation14 + $0x160] ss:$28 sps:$4 sm:$0xff]  }
 0x411   : > { %6104 = vmatpush2.bf16.msra.mxu0 %v8153_v58  ;;  %6145 = vmatpush2.bf16.msra.mxu1 %v8156_v59  ;;  %v8215_v58 = vld [vmem:[#allocation14 + $0xba4] ss:$28 sps:$4 sm:$0xff]  }
 0x412   : > { %6105 = vmatprep.subr.bf16.mxu0 %v8161_v60  ;;  %6146 = vmatprep.subr.bf16.mxu1 %v8164_v61  ;;  %v8218_v60 = vld [vmem:[#allocation14 + $0x12c] ss:$28 sps:$4 sm:$0xff]  }
 0x415   : > { %6106 = vmatpush2.bf16.msra.mxu0 %v8159_v63  ;;  %6147 = vmatpush2.bf16.msra.mxu1 %v8162_v0  ;;  %v8213_v63 = vld [vmem:[#allocation14 + $0xba0] ss:$28 sps:$4 sm:$0xff]  }
 0x416   : > { %6107 = vmatprep.subr.bf16.mxu0 %v8167_v1  ;;  %6148 = vmatprep.subr.bf16.mxu1 %v8170_v2  ;;  %v8216_v1 = vld [vmem:[#allocation14 + $0x128] ss:$28 sps:$4 sm:$0xff]  }
 0x417   : > { %v8221_v2 = vld [vmem:[#allocation14 + $0xb6c] ss:$28 sps:$4 sm:$0xff]  }
 0x419   : > { %6108 = vmatpush2.bf16.msra.mxu0 %v8165_v5  ;;  %6149 = vmatpush2.bf16.msra.mxu1 %v8168_v6  ;;  %v8224_v5 = vld [vmem:[#allocation14 + $0xf4] ss:$28 sps:$4 sm:$0xff]   ;;  %v8219_v6 = vld [vmem:[#allocation14 + $0xb68] ss:$28 sps:$4 sm:$0xff]  }
 0x41a   : > { %6109 = vmatprep.subr.bf16.mxu0 %v8173_v7  ;;  %6150 = vmatprep.subr.bf16.mxu1 %v8176_v8  ;;  %v8222_v7 = vld [vmem:[#allocation14 + $0xf0] ss:$28 sps:$4 sm:$0xff]  }
 0x41b   : > { %v8227_v8 = vld [vmem:[#allocation14 + $0xb34] ss:$28 sps:$4 sm:$0xff]  }
 0x41d   : > { %6110 = vmatpush2.bf16.msra.mxu0 %v8171_v9  ;;  %6151 = vmatpush2.bf16.msra.mxu1 %v8174_v62  ;;  %v8230_v9 = vld [vmem:[#allocation14 + $0xbc] ss:$28 sps:$4 sm:$0xff]   ;;  %v8225_v62 = vld [vmem:[#allocation14 + $0xb30] ss:$28 sps:$4 sm:$0xff]  }
 0x41e   : > { %6111 = vmatprep.subr.bf16.mxu0 %v8179_v12  ;;  %6152 = vmatprep.subr.bf16.mxu1 %v8182_v10  ;;  %v8228_v12 = vld [vmem:[#allocation14 + $0xb8] ss:$28 sps:$4 sm:$0xff]  }
 0x41f   : > { %v8233_v10 = vld [vmem:[#allocation14 + $0xafc] ss:$28 sps:$4 sm:$0xff]  }
 0x421   : > { %6112 = vmatpush2.bf16.msra.mxu0 %v8177_v14  ;;  %6153 = vmatpush2.bf16.msra.mxu1 %v8180_v13  ;;  %v8236_v14 = vld [vmem:[#allocation14 + $0x84] ss:$28 sps:$4 sm:$0xff]   ;;  %v8231_v13 = vld [vmem:[#allocation14 + $0xaf8] ss:$28 sps:$4 sm:$0xff]  }
 0x422   : > { %6113 = vmatprep.subr.bf16.mxu0 %v8185_v15  ;;  %6154 = vmatprep.subr.bf16.mxu1 %v8188_v19  ;;  %v8234_v15 = vld [vmem:[#allocation14 + $0x80] ss:$28 sps:$4 sm:$0xff]  }
 0x423   : > { %v8239_v19 = vld [vmem:[#allocation14 + $0xac4] ss:$28 sps:$4 sm:$0xff]  }
 0x424   : > { %v5916_v4 = vpop.f32.mrf.mxu1 }
 0x425   : > { %6114 = vmatpush2.bf16.msra.mxu0 %v8183_v3  ;;  %6155 = vmatpush2.bf16.msra.mxu1 %v8186_v20  ;;  %v5917_v46 = vadd.f32 %v5916_v4, %v3546_v40  ;;  %v8242_v3 = vld [vmem:[#allocation14 + $0x4c] ss:$28 sps:$4 sm:$0xff]   ;;  %v8237_v20 = vld [vmem:[#allocation14 + $0xac0] ss:$28 sps:$4 sm:$0xff]   ;;  %v8248_v4 = vld [vmem:[#allocation14 + $0x14] ss:$28 sps:$4 sm:$0xff]  }
 0x426   : > { %v5918_v28 = vpop.f32.mrf.mxu1  ;;  %6115 = vmatprep.subr.bf16.mxu0 %v8191_v21  ;;  %6156 = vmatprep.subr.bf16.mxu1 %v8194_v23  ;;  %v8240_v21 = vld [vmem:[#allocation14 + $0x48] ss:$28 sps:$4 sm:$0xff]   ;;  %v8261_v40 = vld [vmem:[#allocation14 + $0xd60] ss:$28 sps:$4 sm:$0xff]  }
 0x427   : > { %v5919_v55 = vadd.f32 %v5918_v28, %v3550_v41  ;;  %v8245_v23 = vld [vmem:[#allocation14 + $0xa8c] ss:$28 sps:$4 sm:$0xff]   ;;  %v8251_v28 = vld [vmem:[#allocation14 + $0xdd4] ss:$28 sps:$4 sm:$0xff]  }
 0x428   : > { %v5920_v34 = vpop.f32.mrf.mxu1  ;;  %v8264_v41 = vld [vmem:[#allocation14 + $0x2e8] ss:$28 sps:$4 sm:$0xff]  }
 0x429   : > { %6116 = vmatpush2.bf16.msra.mxu0 %v8189_v25  ;;  %6157 = vmatpush2.bf16.msra.mxu1 %v8192_v26  ;;  %v8243_v25 = vld [vmem:[#allocation14 + $0xa88] ss:$28 sps:$4 sm:$0xff]   ;;  %v8246_v26 = vld [vmem:[#allocation14 + $0x10] ss:$28 sps:$4 sm:$0xff]   ;;  %v8257_v34 = vld [vmem:[#allocation14 + $0xd9c] ss:$28 sps:$4 sm:$0xff]  }
 0x42a   : > { %v5921_v37 = vpop.f32.mrf.mxu1  ;;  %6117 = vmatprep.subr.bf16.mxu0 %v8197_v31  ;;  %6158 = vmatprep.subr.bf16.mxu1 %v8200_v32  ;;  %v8254_v31 = vld [vmem:[#allocation14 + $0x35c] ss:$28 sps:$4 sm:$0xff]   ;;  %v8249_v32 = vld [vmem:[#allocation14 + $0xdd0] ss:$28 sps:$4 sm:$0xff]  }
 0x42b   : > { %v8258_v37 = vld [vmem:[#allocation14 + $0x320] ss:$28 sps:$4 sm:$0xff]  }
 0x42d   : > { %6118 = vmatpush2.bf16.msra.mxu0 %v8195_v35  ;;  %6159 = vmatpush2.bf16.msra.mxu1 %v8198_v36  ;;  %v8260_v35 = vld [vmem:[#allocation14 + $0x324] ss:$28 sps:$4 sm:$0xff]   ;;  %v8255_v36 = vld [vmem:[#allocation14 + $0xd98] ss:$28 sps:$4 sm:$0xff]  }
 0x42e   : > { %6169 = vmatprep.subr.bf16.mxu0 %v8203_v38  ;;  %6210 = vmatprep.subr.bf16.mxu1 %v8206_v39  ;;  %v8263_v38 = vld [vmem:[#allocation14 + $0xd64] ss:$28 sps:$4 sm:$0xff]   ;;  %v8266_v39 = vld [vmem:[#allocation14 + $0x2ec] ss:$28 sps:$4 sm:$0xff]  }
 0x430   : > { %6120 = vmatmul.mubr.bf16.vlgmr.msra.gmra.mxu0 %v9178_v53  ;;  %6161 = vmatmul.mubr.bf16.vlgmr.msra.gmra.mxu1 %v9192_v17  ;;  %v5957_v54 = vpop.f32.mrf.mxu0 }
 0x431   : > { %v9216_v56 = vadd.f32 %v5957_v54, %v5917_v46  ;;  %6170 = vmatpush1.bf16.msra.mxu0 %v8201_v43  ;;  %6201 = vmatprep.mubr.bf16.mxu0 %v9203_v11  ;;  %v8269_v43 = vld [vmem:[#allocation14 + $0xd2c] ss:$28 sps:$4 sm:$0xff]   ;;  %v8278_v54 = vld [vmem:[#allocation14 + $0x27c] ss:$28 sps:$4 sm:$0xff]  }
 0x432   : > { %6211 = vmatpush1.bf16.msra.mxu1 %v8204_v45  ;;  %6242 = vmatprep.mubr.bf16.mxu1 %v9162_v22  ;;  %v5959_v30 = vpop.f32.mrf.mxu0  ;;  %v8272_v45 = vld [vmem:[#allocation14 + $0x2b4] ss:$28 sps:$4 sm:$0xff]   ;;  %v8267_v46 = vld [vmem:[#allocation14 + $0xd28] ss:$28 sps:$4 sm:$0xff]  }
 0x433   : > { %v9220_v59 = vadd.f32 %v5959_v30, %v5919_v55  ;;  %6171 = vmatprep.subr.bf16.mxu0 %v8209_v50  ;;  %6212 = vmatprep.subr.bf16.mxu1 %v8212_v52  ;;  %v8270_v50 = vld [vmem:[#allocation14 + $0x2b0] ss:$28 sps:$4 sm:$0xff]   ;;  %v8281_v30 = vld [vmem:[#allocation14 + $0xcbc] ss:$28 sps:$4 sm:$0xff]  }
 0x434   : > { %v5961_v61 = vpop.f32.mrf.mxu0  ;;  %v8275_v52 = vld [vmem:[#allocation14 + $0xcf4] ss:$28 sps:$4 sm:$0xff]  }
 0x435   : > { %6172 = vmatpush1.bf16.msra.mxu0 %v8207_v29  ;;  %v8273_v55 = vld [vmem:[#allocation14 + $0xcf0] ss:$28 sps:$4 sm:$0xff]   ;;  %v8276_v29 = vld [vmem:[#allocation14 + $0x278] ss:$28 sps:$4 sm:$0xff]   ;;  %v8287_v61 = vld [vmem:[#allocation14 + $0xc84] ss:$28 sps:$4 sm:$0xff]  }
 0x436   : > { %6213 = vmatpush1.bf16.msra.mxu1 %v8210_v57  ;;  %v5962_v0 = vpop.f32.mrf.mxu0  ;;  %6173 = vmatprep.subr.bf16.mxu0 %v8215_v58  ;;  %v8284_v57 = vld [vmem:[#allocation14 + $0x244] ss:$28 sps:$4 sm:$0xff]   ;;  %v8279_v58 = vld [vmem:[#allocation14 + $0xcb8] ss:$28 sps:$4 sm:$0xff]  }
 0x437   : > { %6214 = vmatprep.subr.bf16.mxu1 %v8218_v60  ;;  %v8282_v60 = vld [vmem:[#allocation14 + $0x240] ss:$28 sps:$4 sm:$0xff]  }
 0x438   : > { %v8285_v0 = vld [vmem:[#allocation14 + $0xc80] ss:$28 sps:$4 sm:$0xff]  }
 0x439   : > { %6174 = vmatpush1.bf16.msra.mxu0 %v8213_v63  ;;  %v8290_v63 = vld [vmem:[#allocation14 + $0x20c] ss:$28 sps:$4 sm:$0xff]  }
 0x43a   : > { %6215 = vmatpush1.bf16.msra.mxu1 %v8216_v1  ;;  %6175 = vmatprep.subr.bf16.mxu0 %v8221_v2  ;;  %v8288_v1 = vld [vmem:[#allocation14 + $0x208] ss:$28 sps:$4 sm:$0xff]  }
 0x43b   : > { %6216 = vmatprep.subr.bf16.mxu1 %v8224_v5  ;;  %v8293_v2 = vld [vmem:[#allocation14 + $0xc4c] ss:$28 sps:$4 sm:$0xff]   ;;  %v8296_v5 = vld [vmem:[#allocation14 + $0x1d4] ss:$28 sps:$4 sm:$0xff]  }
 0x43d   : > { %6176 = vmatpush1.bf16.msra.mxu0 %v8219_v6  ;;  %v8291_v6 = vld [vmem:[#allocation14 + $0xc48] ss:$28 sps:$4 sm:$0xff]  }
 0x43e   : > { %6217 = vmatpush1.bf16.msra.mxu1 %v8222_v7  ;;  %6177 = vmatprep.subr.bf16.mxu0 %v8227_v8  ;;  %v8294_v7 = vld [vmem:[#allocation14 + $0x1d0] ss:$28 sps:$4 sm:$0xff]   ;;  %v8299_v8 = vld [vmem:[#allocation14 + $0x51c] ss:$28 sps:$4 sm:$0xff]  }
 0x43f   : > { %6218 = vmatprep.subr.bf16.mxu1 %v8230_v9  ;;  %v8302_v9 = vld [vmem:[#allocation14 + $0x89c] ss:$28 sps:$4 sm:$0xff]  }
 0x441   : > { %6178 = vmatpush1.bf16.msra.mxu0 %v8225_v62  ;;  %v8297_v62 = vld [vmem:[#allocation14 + $0x518] ss:$28 sps:$4 sm:$0xff]  }
 0x442   : > { %6219 = vmatpush1.bf16.msra.mxu1 %v8228_v12  ;;  %6179 = vmatprep.subr.bf16.mxu0 %v8233_v10  ;;  %v8300_v12 = vld [vmem:[#allocation14 + $0x898] ss:$28 sps:$4 sm:$0xff]   ;;  %v8305_v10 = vld [vmem:[#allocation14 + $0x4e4] ss:$28 sps:$4 sm:$0xff]  }
 0x443   : > { %6220 = vmatprep.subr.bf16.mxu1 %v8236_v14 }
 0x445   : > { %6180 = vmatpush1.bf16.msra.mxu0 %v8231_v13  ;;  %v8308_v13 = vld [vmem:[#allocation14 + $0x864] ss:$28 sps:$4 sm:$0xff]  }
 0x446   : > { %6221 = vmatpush1.bf16.msra.mxu1 %v8234_v15  ;;  %6181 = vmatprep.subr.bf16.mxu0 %v8239_v19  ;;  %v8303_v15 = vld [vmem:[#allocation14 + $0x4e0] ss:$28 sps:$4 sm:$0xff]  }
 0x447   : > { %6222 = vmatprep.subr.bf16.mxu1 %v8242_v3  ;;  %v8306_v3 = vld [vmem:[#allocation14 + $0x860] ss:$28 sps:$4 sm:$0xff]  }
 0x449   : > { %6182 = vmatpush1.bf16.msra.mxu0 %v8237_v20  ;;  %v8311_v20 = vld [vmem:[#allocation14 + $0x4ac] ss:$28 sps:$4 sm:$0xff]  }
 0x44a   : > { %6223 = vmatpush1.bf16.msra.mxu1 %v8240_v21  ;;  %6183 = vmatprep.subr.bf16.mxu0 %v8245_v23  ;;  %v8314_v21 = vld [vmem:[#allocation14 + $0x82c] ss:$28 sps:$4 sm:$0xff]  }
 0x44b   : > { %6224 = vmatprep.subr.bf16.mxu1 %v8248_v4  ;;  %v8309_v4 = vld [vmem:[#allocation14 + $0x4a8] ss:$28 sps:$4 sm:$0xff]  }
 0x44d   : > { %6184 = vmatpush1.bf16.msra.mxu0 %v8243_v25 }
 0x44e   : > { %6225 = vmatpush1.bf16.msra.mxu1 %v8246_v26  ;;  %6185 = vmatprep.subr.bf16.mxu0 %v8251_v28  ;;  %v8312_v26 = vld [vmem:[#allocation14 + $0x828] ss:$28 sps:$4 sm:$0xff]   ;;  %v8317_v28 = vld [vmem:[#allocation14 + $0x474] ss:$28 sps:$4 sm:$0xff]  }
 0x44f   : > { %6226 = vmatprep.subr.bf16.mxu1 %v8254_v31  ;;  %v8320_v31 = vld [vmem:[#allocation14 + $0x7f4] ss:$28 sps:$4 sm:$0xff]  }
 0x451   : > { %6186 = vmatpush2.bf16.msra.mxu0 %v8249_v32  ;;  %v8315_v32 = vld [vmem:[#allocation14 + $0x470] ss:$28 sps:$4 sm:$0xff]  }
 0x452   : > { %6227 = vmatpush2.bf16.msra.mxu1 %v8252_v33  ;;  %6187 = vmatprep.subr.bf16.mxu0 %v8257_v34  ;;  %v8318_v33 = vld [vmem:[#allocation14 + $0x7f0] ss:$28 sps:$4 sm:$0xff]   ;;  %v8323_v34 = vld [vmem:[#allocation14 + $0x43c] ss:$28 sps:$4 sm:$0xff]  }
 0x453   : > { %6228 = vmatprep.subr.bf16.mxu1 %v8260_v35  ;;  %v8326_v35 = vld [vmem:[#allocation14 + $0x7bc] ss:$28 sps:$4 sm:$0xff]  }
 0x455   : > { %6188 = vmatpush2.bf16.msra.mxu0 %v8255_v36  ;;  %v8321_v36 = vld [vmem:[#allocation14 + $0x438] ss:$28 sps:$4 sm:$0xff]  }
 0x456   : > { %6229 = vmatpush2.bf16.msra.mxu1 %v8258_v37  ;;  %6189 = vmatprep.subr.bf16.mxu0 %v8263_v38  ;;  %v8324_v37 = vld [vmem:[#allocation14 + $0x7b8] ss:$28 sps:$4 sm:$0xff]   ;;  %v8329_v38 = vld [vmem:[#allocation14 + $0x404] ss:$28 sps:$4 sm:$0xff]  }
 0x457   : > { %6230 = vmatprep.subr.bf16.mxu1 %v8266_v39  ;;  %v8332_v39 = vld [vmem:[#allocation14 + $0x784] ss:$28 sps:$4 sm:$0xff]  }
 0x459   : > { %6190 = vmatpush2.bf16.msra.mxu0 %v8261_v40  ;;  %v8327_v40 = vld [vmem:[#allocation14 + $0x400] ss:$28 sps:$4 sm:$0xff]  }
 0x45a   : > { %6231 = vmatpush2.bf16.msra.mxu1 %v8264_v41  ;;  %6191 = vmatprep.subr.bf16.mxu0 %v8269_v43  ;;  %v8330_v41 = vld [vmem:[#allocation14 + $0x780] ss:$28 sps:$4 sm:$0xff]   ;;  %v8335_v43 = vld [vmem:[#allocation14 + $0x3cc] ss:$28 sps:$4 sm:$0xff]  }
 0x45b   : > { %6232 = vmatprep.subr.bf16.mxu1 %v8272_v45  ;;  %v8338_v45 = vld [vmem:[#allocation14 + $0x74c] ss:$28 sps:$4 sm:$0xff]  }
 0x45d   : > { %6192 = vmatpush2.bf16.msra.mxu0 %v8267_v46  ;;  %v8333_v46 = vld [vmem:[#allocation14 + $0x3c8] ss:$28 sps:$4 sm:$0xff]  }
 0x45e   : > { %6233 = vmatpush2.bf16.msra.mxu1 %v8270_v50  ;;  %6193 = vmatprep.subr.bf16.mxu0 %v8275_v52  ;;  %v8336_v50 = vld [vmem:[#allocation14 + $0x748] ss:$28 sps:$4 sm:$0xff]   ;;  %v8341_v52 = vld [vmem:[#allocation14 + $0x394] ss:$28 sps:$4 sm:$0xff]  }
 0x45f   : > { %6234 = vmatprep.subr.bf16.mxu1 %v8278_v54  ;;  %v8344_v54 = vld [vmem:[#allocation14 + $0x714] ss:$28 sps:$4 sm:$0xff]  }
 0x461   : > { %6194 = vmatpush2.bf16.msra.mxu0 %v8273_v55  ;;  %v8339_v55 = vld [vmem:[#allocation14 + $0x390] ss:$28 sps:$4 sm:$0xff]  }
 0x462   : > { %6235 = vmatpush2.bf16.msra.mxu1 %v8276_v29  ;;  %6195 = vmatprep.subr.bf16.mxu0 %v8281_v30  ;;  %v8342_v29 = vld [vmem:[#allocation14 + $0x710] ss:$28 sps:$4 sm:$0xff]   ;;  %v8347_v30 = vld [vmem:[#allocation14 + $0x6dc] ss:$28 sps:$4 sm:$0xff]  }
 0x463   : > { %6236 = vmatprep.subr.bf16.mxu1 %v8284_v57  ;;  %v8350_v57 = vld [vmem:[#allocation14 + $0xa5c] ss:$28 sps:$4 sm:$0xff]  }
 0x465   : > { %6196 = vmatpush2.bf16.msra.mxu0 %v8279_v58  ;;  %v8345_v58 = vld [vmem:[#allocation14 + $0x6d8] ss:$28 sps:$4 sm:$0xff]  }
 0x466   : > { %6237 = vmatpush2.bf16.msra.mxu1 %v8282_v60  ;;  %6197 = vmatprep.subr.bf16.mxu0 %v8287_v61  ;;  %v8348_v60 = vld [vmem:[#allocation14 + $0xa58] ss:$28 sps:$4 sm:$0xff]   ;;  %v8353_v61 = vld [vmem:[#allocation14 + $0x6a4] ss:$28 sps:$4 sm:$0xff]  }
 0x467   : > { %6238 = vmatprep.subr.bf16.mxu1 %v8290_v63  ;;  %v8356_v63 = vld [vmem:[#allocation14 + $0xa24] ss:$28 sps:$4 sm:$0xff]  }
 0x469   : > { %6198 = vmatpush2.bf16.msra.mxu0 %v8285_v0  ;;  %v8351_v0 = vld [vmem:[#allocation14 + $0x6a0] ss:$28 sps:$4 sm:$0xff]  }
 0x46a   : > { %6239 = vmatpush2.bf16.msra.mxu1 %v8288_v1  ;;  %6199 = vmatprep.subr.bf16.mxu0 %v8293_v2  ;;  %v8354_v1 = vld [vmem:[#allocation14 + $0xa20] ss:$28 sps:$4 sm:$0xff]   ;;  %v8359_v2 = vld [vmem:[#allocation14 + $0x66c] ss:$28 sps:$4 sm:$0xff]  }
 0x46b   : > { %6240 = vmatprep.subr.bf16.mxu1 %v8296_v5  ;;  %v8362_v5 = vld [vmem:[#allocation14 + $0x9ec] ss:$28 sps:$4 sm:$0xff]  }
 0x46d   : > { %6200 = vmatpush2.bf16.msra.mxu0 %v8291_v6  ;;  %v8357_v6 = vld [vmem:[#allocation14 + $0x668] ss:$28 sps:$4 sm:$0xff]  }
 0x46e   : > { %6241 = vmatpush2.bf16.msra.mxu1 %v8294_v7  ;;  %6251 = vmatprep.subr.bf16.mxu0 %v8299_v8  ;;  %v8360_v7 = vld [vmem:[#allocation14 + $0x9e8] ss:$28 sps:$4 sm:$0xff]   ;;  %v8365_v8 = vld [vmem:[#allocation14 + $0x634] ss:$28 sps:$4 sm:$0xff]  }
 0x46f   : > { %6292 = vmatprep.subr.bf16.mxu1 %v8302_v9  ;;  %v8368_v9 = vld [vmem:[#allocation14 + $0x9b4] ss:$28 sps:$4 sm:$0xff]  }
 0x470   : > { %6202 = vmatmul.mubr.bf16.vlgmr.msra.gmra.mxu0 %v9205_v18  ;;  %v9223_v14 = vpop.f32.mrf.mxu1 }
 0x471   : > { %6243 = vmatmul.mubr.bf16.vlgmr.msra.gmra.mxu1 %v9171_v24  ;;  %6252 = vmatpush1.bf16.msra.mxu0 %v8297_v62  ;;  %v8363_v62 = vld [vmem:[#allocation14 + $0x630] ss:$28 sps:$4 sm:$0xff]  }
 0x472   : > { %6283 = vmatprep.mubr.bf16.mxu0 %v9176_v48  ;;  %6293 = vmatpush1.bf16.msra.mxu1 %v8300_v12  ;;  %v9227_v19 = vpop.f32.mrf.mxu1  ;;  %v8366_v12 = vld [vmem:[#allocation14 + $0x9b0] ss:$28 sps:$4 sm:$0xff]  }
 0x473   : > { %6324 = vmatprep.mubr.bf16.mxu1 %v9190_v16  ;;  %6253 = vmatprep.subr.bf16.mxu0 %v8305_v10  ;;  %v8371_v10 = vld [vmem:[#allocation14 + $0x5fc] ss:$28 sps:$4 sm:$0xff]  }
 0x474   : > { %6294 = vmatprep.subr.bf16.mxu1 %v8308_v13  ;;  %v6002_v23 = vpop.f32.mrf.mxu1  ;;  %v8374_v13 = vld [vmem:[#allocation14 + $0x97c] ss:$28 sps:$4 sm:$0xff]  }
 0x475   : > { %6254 = vmatpush1.bf16.msra.mxu0 %v8303_v15  ;;  %v8369_v15 = vld [vmem:[#allocation14 + $0x5f8] ss:$28 sps:$4 sm:$0xff]   ;;  %v8375_v23 = vld [vmem:[#allocation14 + $0x5c0] ss:$28 sps:$4 sm:$0xff]  }
 0x476   : > { %6295 = vmatpush1.bf16.msra.mxu1 %v8306_v3  ;;  %v6003_v25 = vpop.f32.mrf.mxu1  ;;  %6255 = vmatprep.subr.bf16.mxu0 %v8311_v20  ;;  %v8372_v3 = vld [vmem:[#allocation14 + $0x978] ss:$28 sps:$4 sm:$0xff]   ;;  %v8377_v20 = vld [vmem:[#allocation14 + $0x5c4] ss:$28 sps:$4 sm:$0xff]  }
 0x477   : > { %6296 = vmatprep.subr.bf16.mxu1 %v8314_v21  ;;  %v8380_v21 = vld [vmem:[#allocation14 + $0x944] ss:$28 sps:$4 sm:$0xff]   ;;  %v8383_v25 = vld [vmem:[#allocation14 + $0x58c] ss:$28 sps:$4 sm:$0xff]  }
 0x479   : > { %6256 = vmatpush1.bf16.msra.mxu0 %v8309_v4  ;;  %v8378_v4 = vld [vmem:[#allocation14 + $0x940] ss:$28 sps:$4 sm:$0xff]  }
 0x47a   : > { %6297 = vmatpush1.bf16.msra.mxu1 %v8312_v26  ;;  %6257 = vmatprep.subr.bf16.mxu0 %v8317_v28  ;;  %v8386_v26 = vld [vmem:[#allocation14 + $0x90c] ss:$28 sps:$4 sm:$0xff]  }
 0x47b   : > { %6298 = vmatprep.subr.bf16.mxu1 %v8320_v31  ;;  %v8381_v28 = vld [vmem:[#allocation14 + $0x588] ss:$28 sps:$4 sm:$0xff]  }
 0x47c   : > { %v8384_v31 = vld [vmem:[#allocation14 + $0x908] ss:$28 sps:$4 sm:$0xff]  }
 0x47d   : > { %6258 = vmatpush1.bf16.msra.mxu0 %v8315_v32  ;;  %v8389_v32 = vld [vmem:[#allocation14 + $0x554] ss:$28 sps:$4 sm:$0xff]  }
 0x47e   : > { %6299 = vmatpush1.bf16.msra.mxu1 %v8318_v33  ;;  %6259 = vmatprep.subr.bf16.mxu0 %v8323_v34  ;;  %v8392_v33 = vld [vmem:[#allocation14 + $0x8d4] ss:$28 sps:$4 sm:$0xff]  }
 0x47f   : > { %6300 = vmatprep.subr.bf16.mxu1 %v8326_v35  ;;  %v8387_v34 = vld [vmem:[#allocation14 + $0x550] ss:$28 sps:$4 sm:$0xff]  }
 0x480   : > { %v8390_v35 = vld [vmem:[#allocation14 + $0x8d0] ss:$28 sps:$4 sm:$0xff]  }
 0x481   : > { %6260 = vmatpush1.bf16.msra.mxu0 %v8321_v36  ;;  %v8395_v36 = vld [vmem:[#allocation14 + $0xc1c] ss:$28 sps:$4 sm:$0xff]  }
 0x482   : > { %6301 = vmatpush1.bf16.msra.mxu1 %v8324_v37  ;;  %6261 = vmatprep.subr.bf16.mxu0 %v8329_v38  ;;  %v8396_v37 = vld [vmem:[#allocation14 + $0x360] ss:$28 sps:$4 sm:$0xff]   ;;  %v8393_v38 = vld [vmem:[#allocation14 + $0xc18] ss:$28 sps:$4 sm:$0xff]  }
 0x483   : > { %6302 = vmatprep.subr.bf16.mxu1 %v8332_v39  ;;  %v8397_v39 = vld [vmem:[#allocation14 + $0x1a0] ss:$28 sps:$4 sm:$0xff]  }
 0x485   : > { %6262 = vmatpush1.bf16.msra.mxu0 %v8327_v40  ;;  %v5999_v40 = vadd.f32 %v9223_v14, %v9216_v56 }
 0x486   : > { %6303 = vmatpush1.bf16.msra.mxu1 %v8330_v41  ;;  %6263 = vmatprep.subr.bf16.mxu0 %v8335_v43  ;;  %v8400_v41 = vld [vmem:[#allocation14 + $0xbe4] ss:$28 sps:$4 sm:$0xff]  }
 0x487   : > { %6304 = vmatprep.subr.bf16.mxu1 %v8338_v45 }
 0x489   : > { %6264 = vmatpush1.bf16.msra.mxu0 %v8333_v46  ;;  %v8401_v46 = vld [vmem:[#allocation14 + $0x328] ss:$28 sps:$4 sm:$0xff]  }
 0x48a   : > { %6305 = vmatpush1.bf16.msra.mxu1 %v8336_v50  ;;  %6265 = vmatprep.subr.bf16.mxu0 %v8341_v52  ;;  %v6001_v50 = vadd.f32 %v9227_v19, %v9220_v59 }
 0x48b   : > { %6306 = vmatprep.subr.bf16.mxu1 %v8344_v54  ;;  %v8398_v54 = vld [vmem:[#allocation14 + $0xbe0] ss:$28 sps:$4 sm:$0xff]  }
 0x48d   : > { %6266 = vmatpush1.bf16.msra.mxu0 %v8339_v55  ;;  %v8402_v55 = vld [vmem:[#allocation14 + $0x168] ss:$28 sps:$4 sm:$0xff]  }
 0x48e   : > { %6307 = vmatpush1.bf16.msra.mxu1 %v8342_v29  ;;  %6267 = vmatprep.subr.bf16.mxu0 %v8347_v30  ;;  %v8405_v29 = vld [vmem:[#allocation14 + $0xbac] ss:$28 sps:$4 sm:$0xff]  }
 0x48f   : > { %6308 = vmatprep.subr.bf16.mxu1 %v8350_v57  ;;  %v8406_v57 = vld [vmem:[#allocation14 + $0x2f0] ss:$28 sps:$4 sm:$0xff]  }
 0x491   : > { %6268 = vmatpush2.bf16.msra.mxu0 %v8345_v58  ;;  %v8403_v58 = vld [vmem:[#allocation14 + $0xba8] ss:$28 sps:$4 sm:$0xff]  }
 0x492   : > { %6309 = vmatpush2.bf16.msra.mxu1 %v8348_v60  ;;  %6269 = vmatprep.subr.bf16.mxu0 %v8353_v61 }
 0x493   : > { %6310 = vmatprep.subr.bf16.mxu1 %v8356_v63  ;;  %v8407_v63 = vld [vmem:[#allocation14 + $0x130] ss:$28 sps:$4 sm:$0xff]  }
 0x495   : > { %6270 = vmatpush2.bf16.msra.mxu0 %v8351_v0  ;;  %v8410_v0 = vld [vmem:[#allocation14 + $0xb74] ss:$28 sps:$4 sm:$0xff]  }
 0x496   : > { %6311 = vmatpush2.bf16.msra.mxu1 %v8354_v1  ;;  %6271 = vmatprep.subr.bf16.mxu0 %v8359_v2  ;;  %v8411_v1 = vld [vmem:[#allocation14 + $0x2b8] ss:$28 sps:$4 sm:$0xff]  }
 0x497   : > { %6312 = vmatprep.subr.bf16.mxu1 %v8362_v5  ;;  %v8412_v2 = vld [vmem:[#allocation14 + $0xf8] ss:$28 sps:$4 sm:$0xff]  }
 0x498   : > { %v8415_v5 = vld [vmem:[#allocation14 + $0xb3c] ss:$28 sps:$4 sm:$0xff]  }
 0x499   : > { %6272 = vmatpush2.bf16.msra.mxu0 %v8357_v6  ;;  %v8416_v6 = vld [vmem:[#allocation14 + $0x280] ss:$28 sps:$4 sm:$0xff]  }
 0x49a   : > { %6313 = vmatpush2.bf16.msra.mxu1 %v8360_v7  ;;  %6273 = vmatprep.subr.bf16.mxu0 %v8365_v8  ;;  %v8413_v7 = vld [vmem:[#allocation14 + $0xb38] ss:$28 sps:$4 sm:$0xff]   ;;  %v8417_v8 = vld [vmem:[#allocation14 + $0xc0] ss:$28 sps:$4 sm:$0xff]  }
 0x49b   : > { %6314 = vmatprep.subr.bf16.mxu1 %v8368_v9  ;;  %v8420_v9 = vld [vmem:[#allocation14 + $0xb04] ss:$28 sps:$4 sm:$0xff]  }
 0x49d   : > { %6274 = vmatpush2.bf16.msra.mxu0 %v8363_v62  ;;  %v8421_v62 = vld [vmem:[#allocation14 + $0x248] ss:$28 sps:$4 sm:$0xff]  }
 0x49e   : > { %6315 = vmatpush2.bf16.msra.mxu1 %v8366_v12  ;;  %6275 = vmatprep.subr.bf16.mxu0 %v8371_v10  ;;  %v8418_v10 = vld [vmem:[#allocation14 + $0xb00] ss:$28 sps:$4 sm:$0xff]  }
 0x49f   : > { %6316 = vmatprep.subr.bf16.mxu1 %v8374_v13 }
 0x4a1   : > { %6276 = vmatpush2.bf16.msra.mxu0 %v8369_v15  ;;  %v8422_v15 = vld [vmem:[#allocation14 + $0x88] ss:$28 sps:$4 sm:$0xff]  }
 0x4a2   : > { %6317 = vmatpush2.bf16.msra.mxu1 %v8372_v3  ;;  %6277 = vmatprep.subr.bf16.mxu0 %v8377_v20  ;;  %v8425_v3 = vld [vmem:[#allocation14 + $0xacc] ss:$28 sps:$4 sm:$0xff]  }
 0x4a3   : > { %6318 = vmatprep.subr.bf16.mxu1 %v8380_v21  ;;  %v8426_v20 = vld [vmem:[#allocation14 + $0x210] ss:$28 sps:$4 sm:$0xff]   ;;  %v8423_v21 = vld [vmem:[#allocation14 + $0xac8] ss:$28 sps:$4 sm:$0xff]  }
 0x4a5   : > { %6278 = vmatpush2.bf16.msra.mxu0 %v8375_v23  ;;  %v8427_v23 = vld [vmem:[#allocation14 + $0x50] ss:$28 sps:$4 sm:$0xff]  }
 0x4a6   : > { %6319 = vmatpush2.bf16.msra.mxu1 %v8378_v4  ;;  %6279 = vmatprep.subr.bf16.mxu0 %v8383_v25  ;;  %v8430_v4 = vld [vmem:[#allocation14 + $0xa94] ss:$28 sps:$4 sm:$0xff]  }
 0x4a7   : > { %6320 = vmatprep.subr.bf16.mxu1 %v8386_v26  ;;  %v8431_v25 = vld [vmem:[#allocation14 + $0x1d8] ss:$28 sps:$4 sm:$0xff]   ;;  %v8428_v26 = vld [vmem:[#allocation14 + $0xa90] ss:$28 sps:$4 sm:$0xff]  }
 0x4a9   : > { %6280 = vmatpush2.bf16.msra.mxu0 %v8381_v28  ;;  %v8432_v28 = vld [vmem:[#allocation14 + $0x18] ss:$28 sps:$4 sm:$0xff]  }
 0x4aa   : > { %6321 = vmatpush2.bf16.msra.mxu1 %v8384_v31  ;;  %6281 = vmatprep.subr.bf16.mxu0 %v8389_v32  ;;  %v8435_v31 = vld [vmem:[#allocation14 + $0xddc] ss:$28 sps:$4 sm:$0xff]  }
 0x4ab   : > { %6322 = vmatprep.subr.bf16.mxu1 %v8392_v33  ;;  %v8436_v32 = vld [vmem:[#allocation14 + $0xa60] ss:$28 sps:$4 sm:$0xff]   ;;  %v8433_v33 = vld [vmem:[#allocation14 + $0xdd8] ss:$28 sps:$4 sm:$0xff]  }
 0x4ad   : > { %6282 = vmatpush2.bf16.msra.mxu0 %v8387_v34  ;;  %v8437_v34 = vld [vmem:[#allocation14 + $0x8a0] ss:$28 sps:$4 sm:$0xff]  }
 0x4ae   : > { %6323 = vmatpush2.bf16.msra.mxu1 %v8390_v35  ;;  %6333 = vmatprep.subr.bf16.mxu0 %v8395_v36  ;;  %v8440_v35 = vld [vmem:[#allocation14 + $0xda4] ss:$28 sps:$4 sm:$0xff]  }
 0x4af   : > { %7519 = vmatprep.subr.bf16.mxu1 %v8396_v37  ;;  %v8441_v36 = vld [vmem:[#allocation14 + $0xa28] ss:$28 sps:$4 sm:$0xff]   ;;  %v8438_v37 = vld [vmem:[#allocation14 + $0xda0] ss:$28 sps:$4 sm:$0xff]  }
 0x4b0   : > { %v9232_v43 = vpop.f32.mrf.mxu1  ;;  %6284 = vmatmul.mubr.bf16.vlgmr.msra.gmra.mxu0 %v9178_v53  ;;  %v6039_v45 = vpop.f32.mrf.mxu0 }
 0x4b1   : > { %6325 = vmatmul.mubr.bf16.vlgmr.msra.gmra.mxu1 %v9192_v17  ;;  %v6040_v52 = vadd.f32 %v6039_v45, %v5999_v40  ;;  %6334 = vmatpush1.bf16.msra.mxu0 %v8393_v38  ;;  %v8442_v38 = vld [vmem:[#allocation14 + $0x868] ss:$28 sps:$4 sm:$0xff]   ;;  %v8446_v40 = vld [vmem:[#allocation14 + $0x9f0] ss:$28 sps:$4 sm:$0xff]  }
 0x4b2   : > { %6365 = vmatprep.mubr.bf16.mxu0 %v9203_v11  ;;  %7520 = vmatpush3.bf16.msra.mxu1 %v8397_v39  ;;  %v9239_v56 = vpop.f32.mrf.mxu1  ;;  %v6041_v14 = vpop.f32.mrf.mxu0  ;;  %v8445_v39 = vld [vmem:[#allocation14 + $0xd6c] ss:$28 sps:$4 sm:$0xff]  }
 0x4b3   : > { %8505 = vtanh.f32 %v6040_v52  ;;  %6406 = vmatprep.mubr.bf16.mxu1 %v9162_v22  ;;  %v6042_v30 = vadd.f32 %v6041_v14, %v6001_v50  ;;  %6335 = vmatprep.subr.bf16.mxu0 %v8400_v41  ;;  %v8408_v22 = vld [vmem:[#allocation14 + $0xb70] ss:$28 sps:$4 sm:$0xff]   ;;  %v8443_v41 = vld [vmem:[#allocation14 + $0xd68] ss:$28 sps:$4 sm:$0xff]   ;;  %v8451_v50 = vld [vmem:[#allocation14 + $0x9b8] ss:$28 sps:$4 sm:$0xff]  }
 0x4b4   : > { %v6084_v59 = vpop.f32.mrf.mxu1  ;;  %7521 = vmatprep.subr.bf16.mxu1 %v8401_v46  ;;  %v6043_v19 = vpop.f32.mrf.mxu0  ;;  %v8447_v45 = vld [vmem:[#allocation14 + $0x830] ss:$28 sps:$4 sm:$0xff]   ;;  %v8452_v52 = vld [vmem:[#allocation14 + $0x7f8] ss:$28 sps:$4 sm:$0xff]  }
 0x4b5   : > { %8507 = vtanh.f32 %v6042_v30  ;;  %6336 = vmatpush1.bf16.msra.mxu0 %v8398_v54  ;;  %v8450_v46 = vld [vmem:[#allocation14 + $0xd34] ss:$28 sps:$4 sm:$0xff]   ;;  %v8455_v54 = vld [vmem:[#allocation14 + $0xcfc] ss:$28 sps:$4 sm:$0xff]   ;;  %v8461_v30 = vld [vmem:[#allocation14 + $0x948] ss:$28 sps:$4 sm:$0xff]  }
 0x4b6   : > { %7522 = vmatpush3.bf16.msra.mxu1 %v8402_v55  ;;  %v6085_v60 = vpop.f32.mrf.mxu1  ;;  %v6044_v61 = vpop.f32.mrf.mxu0  ;;  %6337 = vmatprep.subr.bf16.mxu0 %v8405_v29  ;;  %v8453_v14 = vld [vmem:[#allocation14 + $0xcf8] ss:$28 sps:$4 sm:$0xff]   ;;  %v8457_v55 = vld [vmem:[#allocation14 + $0x7c0] ss:$28 sps:$4 sm:$0xff]   ;;  %v8462_v59 = vld [vmem:[#allocation14 + $0x788] ss:$28 sps:$4 sm:$0xff]  }
 0x4b7   : > { %7523 = vmatprep.subr.bf16.mxu1 %v8406_v57  ;;  %v8460_v29 = vld [vmem:[#allocation14 + $0xcc4] ss:$28 sps:$4 sm:$0xff]   ;;  %v8465_v19 = vld [vmem:[#allocation14 + $0xc8c] ss:$28 sps:$4 sm:$0xff]  }
 0x4b8   : > { %v8458_v57 = vld [vmem:[#allocation14 + $0xcc0] ss:$28 sps:$4 sm:$0xff]   ;;  %v8463_v60 = vld [vmem:[#allocation14 + $0xc88] ss:$28 sps:$4 sm:$0xff]   ;;  %v8467_v61 = vld [vmem:[#allocation14 + $0x750] ss:$28 sps:$4 sm:$0xff]  }
 0x4b9   : > { %6338 = vmatpush1.bf16.msra.mxu0 %v8403_v58  ;;  %v8466_v58 = vld [vmem:[#allocation14 + $0x910] ss:$28 sps:$4 sm:$0xff]  }
 0x4ba   : > { %7524 = vmatpush3.bf16.msra.mxu1 %v8407_v63  ;;  %6339 = vmatprep.subr.bf16.mxu0 %v8410_v0  ;;  %v8470_v63 = vld [vmem:[#allocation14 + $0xc54] ss:$28 sps:$4 sm:$0xff]  }
 0x4bb   : > { %7525 = vmatprep.subr.bf16.mxu1 %v8411_v1  ;;  %v8471_v0 = vld [vmem:[#allocation14 + $0x8d8] ss:$28 sps:$4 sm:$0xff]   ;;  %v8468_v1 = vld [vmem:[#allocation14 + $0xc50] ss:$28 sps:$4 sm:$0xff]  }
 0x4bd   : > { %6340 = vmatpush1.bf16.msra.mxu0 %v8408_v22  ;;  %v8472_v22 = vld [vmem:[#allocation14 + $0x718] ss:$28 sps:$4 sm:$0xff]  }
 0x4be   : > { %7526 = vmatpush3.bf16.msra.mxu1 %v8412_v2  ;;  %6341 = vmatprep.subr.bf16.mxu0 %v8415_v5  ;;  %v8473_v2 = vld [vmem:[#allocation14 + $0x6e0] ss:$28 sps:$4 sm:$0xff]  }
 0x4bf   : > { %7527 = vmatprep.subr.bf16.mxu1 %v8416_v6  ;;  %v8474_v5 = vld [vmem:[#allocation14 + $0x520] ss:$28 sps:$4 sm:$0xff]   ;;  %v8475_v6 = vld [vmem:[#allocation14 + $0x6a8] ss:$28 sps:$4 sm:$0xff]  }
 0x4c0   : > { %v8506_v12 = vpop.eup %8505 }
 0x4c1   : > { %6342 = vmatpush1.bf16.msra.mxu0 %v8413_v7  ;;  %6541 = vst [vmem:[%s9243_s4] sm:$0xff] %v8506_v12 }
 0x4c2   : > { %v8508_v13 = vpop.eup %8507  ;;  %7528 = vmatpush3.bf16.msra.mxu1 %v8417_v8  ;;  %6343 = vmatprep.subr.bf16.mxu0 %v8420_v9  ;;  %v8476_v9 = vld [vmem:[#allocation14 + $0x4e8] ss:$28 sps:$4 sm:$0xff]  }
 0x4c3   : > { %7529 = vmatprep.subr.bf16.mxu1 %v8421_v62  ;;  %6542 = vst [vmem:[%s9243_s4 + $0x8] sm:$0xff] %v8508_v13 }
 0x4c5   : > { %6344 = vmatpush1.bf16.msra.mxu0 %v8418_v10  ;;  %v8477_v10 = vld [vmem:[#allocation14 + $0x670] ss:$28 sps:$4 sm:$0xff]  }
 0x4c6   : > { %7530 = vmatpush3.bf16.msra.mxu1 %v8422_v15  ;;  %6345 = vmatprep.subr.bf16.mxu0 %v8425_v3  ;;  %v8478_v3 = vld [vmem:[#allocation14 + $0x4b0] ss:$28 sps:$4 sm:$0xff]  }
 0x4c7   : > { %7531 = vmatprep.subr.bf16.mxu1 %v8426_v20 }
 0x4c9   : > { %6346 = vmatpush1.bf16.msra.mxu0 %v8423_v21 }
 0x4ca   : > { %7532 = vmatpush3.bf16.msra.mxu1 %v8427_v23  ;;  %6347 = vmatprep.subr.bf16.mxu0 %v8430_v4  ;;  %v8479_v23 = vld [vmem:[#allocation14 + $0x638] ss:$28 sps:$4 sm:$0xff]   ;;  %v8481_v4 = vld [vmem:[#allocation14 + $0x600] ss:$28 sps:$4 sm:$0xff]  }
 0x4cb   : > { %7533 = vmatprep.subr.bf16.mxu1 %v8431_v25  ;;  %v8483_v25 = vld [vmem:[#allocation14 + $0x5c8] ss:$28 sps:$4 sm:$0xff]  }
 0x4cd   : > { %6348 = vmatpush1.bf16.msra.mxu0 %v8428_v26  ;;  %v8484_v26 = vld [vmem:[#allocation14 + $0x408] ss:$28 sps:$4 sm:$0xff]  }
 0x4ce   : > { %7534 = vmatpush3.bf16.msra.mxu1 %v8432_v28  ;;  %6349 = vmatprep.subr.bf16.mxu0 %v8435_v31  ;;  %v8485_v28 = vld [vmem:[#allocation14 + $0x590] ss:$28 sps:$4 sm:$0xff]  }
 0x4cf   : > { %7563 = vmatprep.subr.bf16.mxu1 %v8436_v32  ;;  %v8486_v31 = vld [vmem:[#allocation14 + $0x3d0] ss:$28 sps:$4 sm:$0xff]   ;;  %v8487_v32 = vld [vmem:[#allocation14 + $0x558] ss:$28 sps:$4 sm:$0xff]  }
 0x4d1   : > { %6407 = vmatmul.mubr.bf16.vlgmr.msra.gmra.mxu1 %v9171_v24  ;;  %6350 = vmatpush2.bf16.msra.mxu0 %v8433_v33  ;;  %v8448_v24 = vld [vmem:[#allocation14 + $0xd30] ss:$28 sps:$4 sm:$0xff]   ;;  %v8488_v33 = vld [vmem:[#allocation14 + $0x398] ss:$28 sps:$4 sm:$0xff]  }
 0x4d2   : > { %7564 = vmatpush3.bf16.msra.mxu1 %v8437_v34  ;;  %6486 = vmatprep.mubr.bf16.mxu1 %v9190_v16  ;;  %v8456_v16 = vld [vmem:[#allocation14 + $0x980] ss:$28 sps:$4 sm:$0xff]  }
 0x4d3   : > { %6351 = vmatprep.subr.bf16.mxu0 %v8440_v35  ;;  %7565 = vmatprep.subr.bf16.mxu1 %v8441_v36  ;;  %v8489_v34 = vld [vmem:[#allocation14 + $0xde0] ss:$28 sps:$4 sm:$0xff]   ;;  %v8491_v36 = vld [vmem:[#allocation14 + $0xda8] ss:$28 sps:$4 sm:$0xff]  }
 0x4d4   : > { %v8490_v35 = vld [vmem:[#allocation14 + $0xc20] ss:$28 sps:$4 sm:$0xff]  }
 0x4d5   : > { %6352 = vmatpush2.bf16.msra.mxu0 %v8438_v37  ;;  %v8492_v37 = vld [vmem:[#allocation14 + $0xbe8] ss:$28 sps:$4 sm:$0xff]  }
 0x4d6   : > { %7566 = vmatpush3.bf16.msra.mxu1 %v8442_v38  ;;  %6353 = vmatprep.subr.bf16.mxu0 %v8445_v39  ;;  %v8493_v38 = vld [vmem:[#allocation14 + $0xd70] ss:$28 sps:$4 sm:$0xff]  }
 0x4d7   : > { %7567 = vmatprep.subr.bf16.mxu1 %v8446_v40  ;;  %v8494_v39 = vld [vmem:[#allocation14 + $0xbb0] ss:$28 sps:$4 sm:$0xff]   ;;  %v8495_v40 = vld [vmem:[#allocation14 + $0xd38] ss:$28 sps:$4 sm:$0xff]  }
 0x4d9   : > { %6354 = vmatpush2.bf16.msra.mxu0 %v8443_v41  ;;  %v8496_v41 = vld [vmem:[#allocation14 + $0xb78] ss:$28 sps:$4 sm:$0xff]  }
 0x4da   : > { %7568 = vmatpush3.bf16.msra.mxu1 %v8447_v45  ;;  %6355 = vmatprep.subr.bf16.mxu0 %v8450_v46  ;;  %v8497_v45 = vld [vmem:[#allocation14 + $0xd00] ss:$28 sps:$4 sm:$0xff]  }
 0x4db   : > { %7569 = vmatprep.subr.bf16.mxu1 %v8451_v50  ;;  %v8498_v46 = vld [vmem:[#allocation14 + $0xb40] ss:$28 sps:$4 sm:$0xff]   ;;  %v8499_v50 = vld [vmem:[#allocation14 + $0xcc8] ss:$28 sps:$4 sm:$0xff]  }
 0x4dd   : > { %6356 = vmatpush2.bf16.msra.mxu0 %v8448_v24  ;;  %v8501_v24 = vld [vmem:[#allocation14 + $0xc90] ss:$28 sps:$4 sm:$0xff]  }
 0x4de   : > { %7570 = vmatpush3.bf16.msra.mxu1 %v8452_v52  ;;  %6357 = vmatprep.subr.bf16.mxu0 %v8455_v54  ;;  %v8502_v54 = vld [vmem:[#allocation14 + $0xad0] ss:$28 sps:$4 sm:$0xff]  }
 0x4df   : > { %7571 = vmatprep.subr.bf16.mxu1 %v8456_v16  ;;  %v8503_v16 = vld [vmem:[#allocation14 + $0xc58] ss:$28 sps:$4 sm:$0xff]  }
 0x4e1   : > { %6358 = vmatpush2.bf16.msra.mxu0 %v8453_v14 }
 0x4e2   : > { %7572 = vmatpush3.bf16.msra.mxu1 %v8457_v55  ;;  %6359 = vmatprep.subr.bf16.mxu0 %v8460_v29  ;;  %v8504_v29 = vld [vmem:[#allocation14 + $0xa98] ss:$28 sps:$4 sm:$0xff]  }
 0x4e3   : > { %7573 = vmatprep.subr.bf16.mxu1 %v8461_v30 }
 0x4e5   : > { %6360 = vmatpush2.bf16.msra.mxu0 %v8458_v57 }
 0x4e6   : > { %7574 = vmatpush3.bf16.msra.mxu1 %v8462_v59  ;;  %6361 = vmatprep.subr.bf16.mxu0 %v8465_v19 }
 0x4e7   : > { %7575 = vmatprep.subr.bf16.mxu1 %v8466_v58 }
 0x4e9   : > { %6362 = vmatpush2.bf16.msra.mxu0 %v8463_v60 }
 0x4ea   : > { %7576 = vmatpush3.bf16.msra.mxu1 %v8467_v61  ;;  %6363 = vmatprep.subr.bf16.mxu0 %v8470_v63 }
 0x4eb   : > { %7577 = vmatprep.subr.bf16.mxu1 %v8471_v0 }
 0x4ed   : > { %6364 = vmatpush2.bf16.msra.mxu0 %v8468_v1 }
 0x4ee   : > { %7578 = vmatpush3.bf16.msra.mxu1 %v8472_v22  ;;  %7541 = vmatprep.subr.bf16.mxu0 %v8473_v2 }
 0x4f0   : > { %v9249_v7 = vpop.f32.mrf.mxu0  ;;  %v9251_v8 = vpop.f32.mrf.mxu1  ;;  %6366 = vmatmul.mubr.bf16.vlgmr.msra.gmra.mxu0 %v9205_v18 }
 0x4f1   : > { %6487 = vmatmul.mubr.bf16.vlgmr.msra.gmra.mxu1 %v9192_v17  ;;  %7542 = vmatpush3.bf16.msra.mxu0 %v8474_v5  ;;  %v8480_v17 = vld [vmem:[#allocation14 + $0x478] ss:$28 sps:$4 sm:$0xff]  }
 0x4f2   : > { %6446 = vmatprep.mubr.bf16.mxu0 %v9176_v48  ;;  %v9256_v62 = vpop.f32.mrf.mxu0  ;;  %v9258_v12 = vpop.f32.mrf.mxu1  ;;  %7543 = vmatprep.subr.bf16.mxu0 %v8475_v6  ;;  %v8482_v48 = vld [vmem:[#allocation14 + $0x440] ss:$28 sps:$4 sm:$0xff]  }
 0x4f4   : > { %v6125_v13 = vpop.f32.mrf.mxu0  ;;  %v6166_v15 = vpop.f32.mrf.mxu1 }
 0x4f5   : > { %7544 = vmatpush3.bf16.msra.mxu0 %v8476_v9 }
 0x4f6   : > { %v6126_v20 = vpop.f32.mrf.mxu0  ;;  %v6167_v21 = vpop.f32.mrf.mxu1  ;;  %7545 = vmatprep.subr.bf16.mxu0 %v8477_v10 }
 0x4f9   : > { %7546 = vmatpush3.bf16.msra.mxu0 %v8478_v3 }
 0x4fa   : > { %7547 = vmatprep.subr.bf16.mxu0 %v8479_v23 }
 0x4fd   : > { %7548 = vmatpush3.bf16.msra.mxu0 %v8480_v17 }
 0x4fe   : > { %7549 = vmatprep.subr.bf16.mxu0 %v8481_v4 }
 0x501   : > { %7550 = vmatpush3.bf16.msra.mxu0 %v8482_v48 }
 0x502   : > { %7551 = vmatprep.subr.bf16.mxu0 %v8483_v25 }
 0x505   : > { %7552 = vmatpush3.bf16.msra.mxu0 %v8484_v26 }
 0x506   : > { %7553 = vmatprep.subr.bf16.mxu0 %v8485_v28 }
 0x509   : > { %7554 = vmatpush3.bf16.msra.mxu0 %v8486_v31 }
 0x50a   : > { %7555 = vmatprep.subr.bf16.mxu0 %v8487_v32 }
 0x50d   : > { %7556 = vmatpush3.bf16.msra.mxu0 %v8488_v33 }
 0x50e   : > { %7585 = vmatprep.subr.bf16.mxu0 %v8489_v34 }
 0x510   : > { %6447 = vmatmul.mubr.bf16.vlgmr.msra.gmra.mxu0 %v9178_v53  ;;  %v8500_v53 = vld [vmem:[#allocation14 + $0xb08] ss:$28 sps:$4 sm:$0xff]  }
 0x511   : > { %7586 = vmatpush3.bf16.msra.mxu0 %v8490_v35  ;;  %6526 = vmatprep.mubr.bf16.mxu0 %v9203_v11  ;;  %v9262_v11 = vld [vmem:[#allocation16] sm:$0xff] }
 0x512   : > { %7587 = vmatprep.subr.bf16.mxu0 %v8491_v36  ;;  %v3554_v52 = vrot.slane %v9262_v11, %v9121_v49  ;;  %v3558_v14 = vrot.slane %v9262_v11, %v9124_v51  ;;  %v3562_v23 = vrot.slane %v9262_v11, %v1383_v42  ;;  %v3566_v17 = vrot.slane %v9262_v11, %v1387_v47 }
 0x514   : > { %v6081_v55 = vadd.f32 %v9232_v43, %v3554_v52  ;;  %v6083_v30 = vadd.f32 %v9239_v56, %v3558_v14 }
 0x515   : > { %7588 = vmatpush3.bf16.msra.mxu0 %v8492_v37 }
 0x516   : > { %7589 = vmatprep.subr.bf16.mxu0 %v8493_v38  ;;  %v6122_v57 = vadd.f32 %v9249_v7, %v6081_v55  ;;  %v6124_v59 = vadd.f32 %v9256_v62, %v6083_v30 }
 0x518   : > { %v6163_v49 = vadd.f32 %v9251_v8, %v6122_v57  ;;  %v6165_v51 = vadd.f32 %v9258_v12, %v6124_v59 }
 0x519   : > { %7590 = vmatpush3.bf16.msra.mxu0 %v8494_v39 }
 0x51a   : > { %7591 = vmatprep.subr.bf16.mxu0 %v8495_v40 }
 0x51d   : > { %7592 = vmatpush3.bf16.msra.mxu0 %v8496_v41 }
 0x51e   : > { %7593 = vmatprep.subr.bf16.mxu0 %v8497_v45 }
 0x521   : > { %7594 = vmatpush3.bf16.msra.mxu0 %v8498_v46 }
 0x522   : > { %7595 = vmatprep.subr.bf16.mxu0 %v8499_v50 }
 0x525   : > { %7596 = vmatpush3.bf16.msra.mxu0 %v8500_v53 }
 0x526   : > { %7597 = vmatprep.subr.bf16.mxu0 %v8501_v24  ;;  %v3570_v24 = vrot.slane %v9262_v11, %v1391_v44 }
 0x529   : > { %7598 = vmatpush3.bf16.msra.mxu0 %v8502_v54 }
 0x52a   : > { %7599 = vmatprep.subr.bf16.mxu0 %v8503_v16 }
 0x52d   : > { %7600 = vmatpush3.bf16.msra.mxu0 %v8504_v29 }
 0x530   : > { %v6203_v19 = vpop.f32.mrf.mxu0  ;;  %6527 = vmatmul.mubr.bf16.vlgmr.msra.gmra.mxu0 %v9205_v18 }
 0x531   : > { %v6204_v43 = vadd.f32 %v6203_v19, %v6163_v49  ;;  %v6244_v58 = vpop.f32.mrf.mxu1 }
 0x532   : > { %v6205_v60 = vpop.f32.mrf.mxu0  ;;  %v6245_v4 = vadd.f32 %v6244_v58, %v3562_v23 }
 0x533   : > { %8509 = vtanh.f32 %v6204_v43  ;;  %v6206_v61 = vadd.f32 %v6205_v60, %v6165_v51  ;;  %v6246_v56 = vpop.f32.mrf.mxu1 }
 0x534   : > { %v6207_v63 = vpop.f32.mrf.mxu0  ;;  %v6247_v48 = vadd.f32 %v6246_v56, %v3566_v17 }
 0x535   : > { %8511 = vtanh.f32 %v6206_v61  ;;  %v6248_v0 = vpop.f32.mrf.mxu1 }
 0x536   : > { %v6208_v1 = vpop.f32.mrf.mxu0 }
 0x537   : > { %v6249_v22 = vpop.f32.mrf.mxu1 }
 0x540   : > { %v8510_v2 = vpop.eup %8509 }
 0x541   : > { %6543 = vst [vmem:[%s9243_s4 + $0x10] sm:$0xff] %v8510_v2 }
 0x542   : > { %v8512_v5 = vpop.eup %8511 }
 0x543   : > { %6544 = vst [vmem:[%s9243_s4 + $0x18] sm:$0xff] %v8512_v5 }
 0x570   : > { %v6285_v6 = vpop.f32.mrf.mxu0 }
 0x571   : > { %v6326_v18 = vpop.f32.mrf.mxu1  ;;  %v6286_v25 = vadd.f32 %v6285_v6, %v6245_v4 }
 0x572   : > { %v6287_v7 = vpop.f32.mrf.mxu0 }
 0x573   : > { %v6328_v8 = vpop.f32.mrf.mxu1  ;;  %v6288_v26 = vadd.f32 %v6287_v7, %v6247_v48  ;;  %v6327_v28 = vadd.f32 %v6326_v18, %v6286_v25 }
 0x574   : > { %v6289_v9 = vpop.f32.mrf.mxu0 }
 0x575   : > { %v6330_v62 = vpop.f32.mrf.mxu1  ;;  %v6329_v32 = vadd.f32 %v6328_v8, %v6288_v26 }
 0x576   : > { %v6290_v12 = vpop.f32.mrf.mxu0 }
 0x577   : > { %v6331_v10 = vpop.f32.mrf.mxu1 }
 0x591   : > { %v7535_v13 = vpop.f32.mrf.mxu1 }
 0x593   : > { %v7536_v15 = vpop.f32.mrf.mxu1 }
 0x594   : > { %v7537_v3 = vadd.f32 %v7536_v15, %v7535_v13 }
 0x595   : > { %v7538_v20 = vpop.f32.mrf.mxu1 }
 0x596   : > { %v6409_v54 = vadd.f32 %v7537_v3, %v3570_v24 }
 0x597   : > { %v7539_v21 = vpop.f32.mrf.mxu1 }
 0x5b0   : > { %v6367_v31 = vpop.f32.mrf.mxu0 }
 0x5b1   : > { %v6368_v33 = vadd.f32 %v6367_v31, %v6327_v28  ;;  %v7579_v34 = vpop.f32.mrf.mxu1 }
 0x5b2   : > { %v6369_v35 = vpop.f32.mrf.mxu0 }
 0x5b3   : > { %8513 = vtanh.f32 %v6368_v33  ;;  %v6370_v36 = vadd.f32 %v6369_v35, %v6329_v32  ;;  %v7580_v37 = vpop.f32.mrf.mxu1 }
 0x5b4   : > { %v6371_v42 = vpop.f32.mrf.mxu0  ;;  %v7581_v55 = vadd.f32 %v7580_v37, %v7579_v34 }
 0x5b5   : > { %8515 = vtanh.f32 %v6370_v36  ;;  %v7582_v38 = vpop.f32.mrf.mxu1 }
 0x5b6   : > { %v6372_v39 = vpop.f32.mrf.mxu0 }
 0x5b7   : > { %v7583_v47 = vpop.f32.mrf.mxu1 }
 0x5c0   : > { %v8514_v40 = vpop.eup %8513 }
 0x5c1   : > { %6545 = vst [vmem:[%s9243_s4 + $0x20] sm:$0xff] %v8514_v40 }
 0x5c2   : > { %v8516_v41 = vpop.eup %8515 }
 0x5c3   : > { %6546 = vst [vmem:[%s9243_s4 + $0x28] sm:$0xff] %v8516_v41 }
 0x5d0   : > { %v7557_v45 = vpop.f32.mrf.mxu0 }
 0x5d2   : > { %v7558_v46 = vpop.f32.mrf.mxu0 }
 0x5d3   : > { %v7559_v52 = vadd.f32 %v7558_v46, %v7557_v45 }
 0x5d4   : > { %v7560_v50 = vpop.f32.mrf.mxu0 }
 0x5d5   : > { %v6449_v16 = vadd.f32 %v7559_v52, %v6409_v54 }
 0x5d6   : > { %v7561_v53 = vpop.f32.mrf.mxu0 }
 0x5d7   : > { %v6489_v30 = vadd.f32 %v7581_v55, %v6449_v16 }
 0x5f0   : > { %v7601_v14 = vpop.f32.mrf.mxu0 }
 0x5f2   : > { %v7602_v29 = vpop.f32.mrf.mxu0 }
 0x5f3   : > { %v7603_v57 = vadd.f32 %v7602_v29, %v7601_v14 }
 0x5f4   : > { %v7604_v59 = vpop.f32.mrf.mxu0 }
 0x5f5   : > { %v6529_v49 = vadd.f32 %v7603_v57, %v6489_v30 }
 0x5f6   : > { %v7605_v19 = vpop.f32.mrf.mxu0 }
 0x5f7   : > { %8517 = vtanh.f32 %v6529_v49 }
 0x604   : > { %v8518_v27 = vpop.eup %8517 }
 0x605   : > { %6547 = vst [vmem:[%s9243_s4 + $0x30] sm:$0xff] %v8518_v27 }
 0x606   : > { %8769 = shalt.err (!%p8766_p9)
}
 0x607   : > { %s8770_s15 = scalar_lea.hbm %s9293_s29, 896  ;;  %s8774_s26 = scalar_lea.hbm %s9340_s9, 1792 }
 0x608   : > { %p8771_p10 = scmp.ne.s32.totalorder %s9293_s29, %s8770_s15  ;;  %p8775_p13 = scmp.lt.s32.totalorder %s9293_s29, %s9340_s9 }
 0x609   : > { %p8776_p0 = scmp.lt.s32.totalorder %s8774_s26, %s8770_s15 }
 0x60a   : > { %p8772_p11 = pnand %p8771_p10, %p9372_p8 }
 0x60b   : > { %p8777_p2 = por %p8776_p0, %p8775_p13 }
 0x60c   : > { %p8773_p3 = pneg %p8772_p11 }
 0x60e   : > { %p8778_p5 = pnand %p8777_p2, %p8773_p3 }
 0x610   : > { %8781 = shalt.err (!%p8778_p5)
}
 0x611   : > { %7643 = dma.vmem_to_hbm [thread:$0]  (%p9372_p8), %s6564_s21, 896, %s9293_s29, %s6549_s18  }
 0x612 PF: > { %s6575_s4 = sand.u32 1, %s8824_s30   ;;  %p9373_p12 = scmp.ne.s32.totalorder %s9360_s23, 0 }
 0x613   : > { %p9374_p1 = scmp.ge.s32.totalorder %s8836_s12, 2  ;;  %s6576_s16 = scalar_lea.sflag [#allocation4], %s6575_s4 }
 0x615   : > { %p7675_p4 = pnand %p9374_p1, %p9373_p12 }
 0x617   : > { %p7676_p7 = pneg %p7675_p4 }
 0x619   : > { %8819 = dma.done.wait (%p7676_p7), %s6576_s16, 896  }
 0x61a   : > { %8821 = vsyncadd (%p7676_p7), %s6576_s16, 4294966400  ;;  %p26_p6 = scmp.ge.s32.totalorder %s9020_s19, 4   ;;  %s9375_s30 = smov %s8828_s10 }
 0x61b   : > { %s9376_s10 = smov %s8832_s11  ;;  %s9377_s11 = smov %s9031_s13 }
 0x61c   : > { %s9378_s12 = smov %s9020_s19  ;;  %28 = sbr.rel (!%p26_p6) target bundleno = 14 (0xe), region = 133 }
 0x621   :  { %6581 = vsyncpa [#allocation3], 1 }
 0x622   :  { %6583 = vsyncpa [#allocation3 + $0x1], 1 }
 0x623   :  { %6584 = vsyncpa [#allocation6], 1 }
 0x624   :  { %6585 = vsyncpa [#allocation9], 1 }
 0x625   :  { %6586 = vsyncpa [#allocation12], 1 }
 0x626   :  { %6587 = vsyncpa [#allocation15], 1 }
 0x627   :  { %6588 = vsyncpa [#allocation4], 1 }
 0x628   :  { %6590 = vsyncpa [#allocation4 + $0x1], 1 }

</bundles_post_ra>
